<compile_context>
chip_gen: v6e
topology: v6e:2x2x1
jax: 0.10.0
libtpu: 0.0.40
codegen_flags: <defaults>
</compile_context>

<pallas_src>
import math

import jax
import jax.numpy as jnp
from jax.experimental import pallas as pl
from jax.experimental.pallas import tpu as pltpu

_EPS = 1e-5


# ------------------------------------------------------------------ Pallas kernels
def _in_relu_kernel(x_ref, g_ref, b_ref, o_ref):
    """InstanceNorm2d(affine=True) + ReLU for one sample. x_ref: (1, HW, C)."""
    x = x_ref[0].astype(jnp.float32)                         # (HW, C)
    mean = jnp.mean(x, axis=0, keepdims=True)                # (1, C)
    xc = x - mean
    var = jnp.mean(xc * xc, axis=0, keepdims=True)
    y = xc * jax.lax.rsqrt(var + _EPS) * g_ref[...] + b_ref[...]
    o_ref[0] = jnp.maximum(y, 0.0).astype(o_ref.dtype)


def _mm_in_relu_kernel(p_ref, w_ref, g_ref, b_ref, o_ref):
    """(patches @ W) for one sample, fused with InstanceNorm2d(affine) + ReLU."""
    p = p_ref[0].astype(jnp.float32)                         # (HW, K)
    y = jnp.dot(p, w_ref[...].astype(jnp.float32),
                preferred_element_type=jnp.float32,
                precision=jax.lax.Precision.HIGHEST)         # (HW, Cout)
    mean = jnp.mean(y, axis=0, keepdims=True)
    yc = y - mean
    var = jnp.mean(yc * yc, axis=0, keepdims=True)
    z = yc * jax.lax.rsqrt(var + _EPS) * g_ref[...] + b_ref[...]
    o_ref[0] = jnp.maximum(z, 0.0).astype(o_ref.dtype)


def _mm_kernel(x_ref, w_ref, o_ref):
    """Row-tiled  x @ W  (used by the 1x1 projection conv)."""
    y = jnp.dot(x_ref[...].astype(jnp.float32), w_ref[...].astype(jnp.float32),
                preferred_element_type=jnp.float32,
                precision=jax.lax.Precision.HIGHEST)
    o_ref[...] = y.astype(o_ref.dtype)


def _mm_add_kernel(x_ref, w_ref, s_ref, o_ref):
    """Row-tiled  x @ W + shortcut  (conv_1 fused with the residual add)."""
    y = jnp.dot(x_ref[...].astype(jnp.float32), w_ref[...].astype(jnp.float32),
                preferred_element_type=jnp.float32,
                precision=jax.lax.Precision.HIGHEST)
    o_ref[...] = (y + s_ref[...].astype(jnp.float32)).astype(o_ref.dtype)


# ------------------------------------------------------------------ wrappers (NHWC)
def instance_norm_relu(x, gamma, beta):
    """x: (B, H, W, C) NHWC.  Fused InstanceNorm2d(affine=True, eps=1e-5) + ReLU."""
    B, H, W, C = x.shape
    xf = x.reshape(B, H * W, C)
    out = pl.pallas_call(
        _in_relu_kernel,
        out_shape=jax.ShapeDtypeStruct((B, H * W, C), x.dtype),
        grid_spec=pltpu.PrefetchScalarGridSpec(
            num_scalar_prefetch=0,
            grid=(B,),
            in_specs=[
                pl.BlockSpec((1, H * W, C), lambda b: (b, 0, 0)),
                pl.BlockSpec((1, C), lambda b: (0, 0)),
                pl.BlockSpec((1, C), lambda b: (0, 0)),
            ],
            out_specs=pl.BlockSpec((1, H * W, C), lambda b: (b, 0, 0)),
        ),
        compiler_params=pltpu.CompilerParams(dimension_semantics=("parallel",)),
    )(xf, gamma.reshape(1, C), beta.reshape(1, C))
    return out.reshape(B, H, W, C)


def _matmul_rows(x2d, w, shortcut2d=None, *, tile_m=512):
    """(M, K) @ (K, N) [+ shortcut], row-tiled with a cdiv grid (no pad copies)."""
    M, K = x2d.shape
    N = w.shape[1]
    tm = M if M <= tile_m else tile_m            # tile_m is a multiple of 8
    grid = (pl.cdiv(M, tm),)
    in_specs = [pl.BlockSpec((tm, K), lambda i: (i, 0)),
                pl.BlockSpec((K, N), lambda i: (0, 0))]       # weight resident
    args = [x2d, w]
    kernel = _mm_kernel
    if shortcut2d is not None:
        in_specs.append(pl.BlockSpec((tm, N), lambda i: (i, 0)))
        args.append(shortcut2d)
        kernel = _mm_add_kernel
    return pl.pallas_call(
        kernel,
        out_shape=jax.ShapeDtypeStruct((M, N), x2d.dtype),
        grid_spec=pltpu.PrefetchScalarGridSpec(
            num_scalar_prefetch=0,
            grid=grid,
            in_specs=in_specs,
            out_specs=pl.BlockSpec((tm, N), lambda i: (i, 0)),
        ),
        compiler_params=pltpu.CompilerParams(dimension_semantics=("parallel",)),
    )(*args)


def _extract_patches(xp, stride, Ho, Wo):
    """3x3 im2col on an already-padded NHWC tensor -> (B, Ho, Wo, 9*C)."""
    # TODO(synk): patch extraction (shifted strided slices) is done with XLA ops in
    # the wrapper; an in-kernel halo-DMA formulation would avoid the 9x activation
    # materialization but requires manual strided DMAs.
    B, Hp, Wp, C = xp.shape
    taps = []
    for dy in range(3):
        for dx in range(3):
            taps.append(jax.lax.slice(
                xp,
                (0, dy, dx, 0),
                (B, dy + (Ho - 1) * stride + 1, dx + (Wo - 1) * stride + 1, C),
                (1, stride, stride, 1)))
    return jnp.concatenate(taps, axis=-1)


def conv3x3_in_relu(x, w_hwio, gamma, beta, *, stride, pad):
    """conv_0 (3x3, no bias, explicit pad/stride) fused with bn_1 + ReLU."""
    B, H, W, Cin = x.shape
    Cout = w_hwio.shape[-1]
    xp = jnp.pad(x, ((0, 0), pad[0], pad[1], (0, 0)))
    Ho = (H + sum(pad[0]) - 3) // stride + 1
    Wo = (W + sum(pad[1]) - 3) // stride + 1
    K = 9 * Cin
    patches = _extract_patches(xp, stride, Ho, Wo).reshape(B, Ho * Wo, K)
    out = pl.pallas_call(
        _mm_in_relu_kernel,
        out_shape=jax.ShapeDtypeStruct((B, Ho * Wo, Cout), x.dtype),
        grid_spec=pltpu.PrefetchScalarGridSpec(
            num_scalar_prefetch=0,
            grid=(B,),
            in_specs=[
                pl.BlockSpec((1, Ho * Wo, K), lambda b: (b, 0, 0)),
                pl.BlockSpec((K, Cout), lambda b: (0, 0)),
                pl.BlockSpec((1, Cout), lambda b: (0, 0)),
                pl.BlockSpec((1, Cout), lambda b: (0, 0)),
            ],
            out_specs=pl.BlockSpec((1, Ho * Wo, Cout), lambda b: (b, 0, 0)),
        ),
        compiler_params=pltpu.CompilerParams(dimension_semantics=("parallel",)),
    )(patches, w_hwio.reshape(K, Cout), gamma.reshape(1, Cout), beta.reshape(1, Cout))
    return out.reshape(B, Ho, Wo, Cout)


def conv3x3_add(x, w_hwio, shortcut):
    """conv_1 (3x3, stride 1, pad 1, no bias) fused with the residual add."""
    B, H, W, Cin = x.shape
    Cout = w_hwio.shape[-1]
    xp = jnp.pad(x, ((0, 0), (1, 1), (1, 1), (0, 0)))
    patches = _extract_patches(xp, 1, H, W).reshape(B * H * W, 9 * Cin)
    out2d = _matmul_rows(patches, w_hwio.reshape(9 * Cin, Cout),
                         shortcut2d=shortcut.reshape(B * H * W, Cout))
    return out2d.reshape(B, H, W, Cout)


def conv1x1(x, w_io, stride):
    """Projection conv: 1x1, given stride, no bias.  w_io: (Cin, Cout)."""
    if stride != 1:
        x = x[:, ::stride, ::stride, :]
    B, Ho, Wo, Cin = x.shape
    out2d = _matmul_rows(x.reshape(B * Ho * Wo, Cin), w_io)
    return out2d.reshape(B, Ho, Wo, w_io.shape[1])


def block_v2_forward_nhwc(x, p, *, stride, use_projection):
    """ResNet-V2 block (NHWC), matching BlockV2.forward."""
    shortcut = x
    x = instance_norm_relu(x, p["g0"], p["b0"])                 # bn_0 + relu
    if use_projection:
        shortcut = conv1x1(x, p["w_proj"], stride)              # proj_conv(relu(bn_0(x)))
    # F.pad semantics: stride 1 -> (1,1,1,1); stride 2 -> (0,2,0,2)   (H-pad, W-pad)
    pad = ((1, 1), (1, 1)) if stride == 1 else ((0, 2), (0, 2))
    x = conv3x3_in_relu(x, p["w0"], p["g1"], p["b1"], stride=stride, pad=pad)
    x = conv3x3_add(x, p["w1"], shortcut)                       # conv_1 + shortcut
    return x


def block_group_forward_nhwc(x, params, *, stride, use_projection):
    out = x
    for i, p in enumerate(params):
        out = block_v2_forward_nhwc(out, p,
                                    stride=stride if i == 0 else 1,
                                    use_projection=(use_projection and i == 0))
    return out


def block_group_forward(x_nchw, params, *, stride, use_projection):
    """NCHW entry point (matches the PyTorch module's interface)."""
    x = jnp.transpose(x_nchw, (0, 2, 3, 1))                     # NCHW -> NHWC
    y = block_group_forward_nhwc(x, params, stride=stride, use_projection=use_projection)
    return jnp.transpose(y, (0, 3, 1, 2))                       # NHWC -> NCHW


# ------------------------------------------------------------------ pure-JAX reference
def _in_relu_ref(x, g, b):                                       # NHWC
    mean = jnp.mean(x, axis=(1, 2), keepdims=True)
    var = jnp.mean((x - mean) ** 2, axis=(1, 2), keepdims=True)
    y = (x - mean) * jax.lax.rsqrt(var + _EPS) * g + b
    return jnp.maximum(y, 0.0)


def _conv_ref(x, w, stride, padding):
    return jax.lax.conv_general_dilated(
        x, w, window_strides=(stride, stride), padding=padding,
        dimension_numbers=("NHWC", "HWIO", "NHWC"),
        precision=jax.lax.Precision.HIGHEST)


def _block_v2_ref(x, p, stride, use_projection):
    shortcut = x
    x = _in_relu_ref(x, p["g0"], p["b0"])
    if use_projection:
        w_proj = p["w_proj"].reshape(1, 1, *p["w_proj"].shape)
        shortcut = _conv_ref(x, w_proj, stride, [(0, 0), (0, 0)])
    padding = [(1, 1), (1, 1)] if stride == 1 else [(0, 2), (0, 2)]
    x = _conv_ref(x, p["w0"], stride, padding)
    x = _in_relu_ref(x, p["g1"], p["b1"])
    x = _conv_ref(x, p["w1"], 1, [(1, 1), (1, 1)])
    return x + shortcut


def _block_group_ref(x_nchw, params, stride, use_projection):
    x = jnp.transpose(x_nchw, (0, 2, 3, 1))
    for i, p in enumerate(params):
        x = _block_v2_ref(x, p, stride if i == 0 else 1, use_projection and i == 0)
    return jnp.transpose(x, (0, 3, 1, 2))


# ------------------------------------------------------------------ test
def _make_block_params(key, cin, cout, use_projection):
    ks = jax.random.split(key, 7)

    def uinit(k, shape, fan_in):
        bound = 1.0 / math.sqrt(fan_in)
        return jax.random.uniform(k, shape, jnp.float32, -bound, bound)

    p = {
        "g0": 1.0 + 0.1 * jax.random.normal(ks[0], (cin,), jnp.float32),
        "b0": 0.1 * jax.random.normal(ks[1], (cin,), jnp.float32),
        "w0": uinit(ks[2], (3, 3, cin, cout), 9 * cin),
        "g1": 1.0 + 0.1 * jax.random.normal(ks[3], (cout,), jnp.float32),
        "b1": 0.1 * jax.random.normal(ks[4], (cout,), jnp.float32),
        "w1": uinit(ks[5], (3, 3, cout, cout), 9 * cout),
    }
    if use_projection:
        p["w_proj"] = uinit(ks[6], (cin, cout), cin)
    return p


if __name__ == "__main__":
    key = jax.random.PRNGKey(0)
    B, Cin, Cout, H, W = 2, 4, 8, 16, 16
    num_blocks, stride, use_projection = 2, 2, True

    kx, kp = jax.random.split(key)
    x = jax.random.normal(kx, (B, Cin, H, W), jnp.float32)       # NCHW, like the module
    pkeys = jax.random.split(kp, num_blocks)
    params = [
        _make_block_params(pkeys[i], Cin if i == 0 else Cout, Cout,
                           use_projection and i == 0)
        for i in range(num_blocks)
    ]

    fwd = jax.jit(lambda xx, pp: block_group_forward(
        xx, pp, stride=stride, use_projection=use_projection))
    y = jax.block_until_ready(fwd(x, params))

    y_ref = _block_group_ref(x, params, stride, use_projection)
    assert y.shape == (B, Cout, H // stride, W // stride), y.shape
    assert jnp.allclose(y, y_ref, atol=1e-3, rtol=1e-3), \
        float(jnp.max(jnp.abs(y - y_ref)))

    print("KERNEL_OK")
</pallas_src>

<mosaic_0001>
module attributes {stable_mosaic.version = 11 : i64} {
  func.func @_in_relu_kernel(%arg0: i32, %arg1: memref<1x256x4xf32, #tpu.memory_space<vmem>>, %arg2: memref<1x4xf32, #tpu.memory_space<vmem>>, %arg3: memref<1x4xf32, #tpu.memory_space<vmem>>, %arg4: memref<1x256x4xf32, #tpu.memory_space<vmem>>) attributes {dimension_semantics = [#tpu.dimension_semantics<parallel>], iteration_bounds = array<i64: 2>, scalar_prefetch = 0 : i64, scratch_operands = 0 : i64, tpu.core_type = #tpu.core_type<tc>, window_params = [{transform_indices = @transform_0, window_bounds = array<i64: 1, 256, 4>}, {pipeline_mode = #tpu.pipeline_mode<synchronous>, transform_indices = @transform_1, window_bounds = array<i64: 1, 4>}, {pipeline_mode = #tpu.pipeline_mode<synchronous>, transform_indices = @transform_2, window_bounds = array<i64: 1, 4>}, {transform_indices = @transform_3, window_bounds = array<i64: 1, 256, 4>}]} {
    %c0 = arith.constant 0 : index
    %c0_0 = arith.constant 0 : index
    %c0_1 = arith.constant 0 : index
    %0 = vector.load %arg1[%c0, %c0_0, %c0_1] : memref<1x256x4xf32, #tpu.memory_space<vmem>>, vector<1x256x4xf32>
    %1 = vector.shape_cast %0 : vector<1x256x4xf32> to vector<256x4xf32>
    %cst = arith.constant dense<0.000000e+00> : vector<4xf32>
    %2 = vector.multi_reduction <add>, %1, %cst [0] : vector<256x4xf32> to vector<4xf32>
    %3 = vector.shape_cast %2 : vector<4xf32> to vector<1x4xf32>
    %cst_2 = arith.constant 2.560000e+02 : f32
    %4 = vector.broadcast %cst_2 : f32 to vector<1x4xf32>
    %5 = arith.divf %3, %4 : vector<1x4xf32>
    %6 = vector.broadcast %5 : vector<1x4xf32> to vector<256x4xf32>
    %7 = arith.subf %1, %6 : vector<256x4xf32>
    %8 = arith.mulf %7, %7 : vector<256x4xf32>
    %cst_3 = arith.constant dense<0.000000e+00> : vector<4xf32>
    %9 = vector.multi_reduction <add>, %8, %cst_3 [0] : vector<256x4xf32> to vector<4xf32>
    %10 = vector.shape_cast %9 : vector<4xf32> to vector<1x4xf32>
    %cst_4 = arith.constant 2.560000e+02 : f32
    %11 = vector.broadcast %cst_4 : f32 to vector<1x4xf32>
    %12 = arith.divf %10, %11 : vector<1x4xf32>
    %cst_5 = arith.constant 9.99999974E-6 : f32
    %13 = vector.broadcast %cst_5 : f32 to vector<1x4xf32>
    %14 = arith.addf %12, %13 : vector<1x4xf32>
    %15 = math.rsqrt %14 : vector<1x4xf32>
    %16 = vector.broadcast %15 : vector<1x4xf32> to vector<256x4xf32>
    %17 = arith.mulf %7, %16 : vector<256x4xf32>
    %c0_6 = arith.constant 0 : index
    %c0_7 = arith.constant 0 : index
    %18 = vector.load %arg2[%c0_6, %c0_7] : memref<1x4xf32, #tpu.memory_space<vmem>>, vector<1x4xf32>
    %19 = vector.broadcast %18 : vector<1x4xf32> to vector<256x4xf32>
    %20 = arith.mulf %17, %19 : vector<256x4xf32>
    %c0_8 = arith.constant 0 : index
    %c0_9 = arith.constant 0 : index
    %21 = vector.load %arg3[%c0_8, %c0_9] : memref<1x4xf32, #tpu.memory_space<vmem>>, vector<1x4xf32>
    %22 = vector.broadcast %21 : vector<1x4xf32> to vector<256x4xf32>
    %23 = arith.addf %20, %22 : vector<256x4xf32>
    %cst_10 = arith.constant 0.000000e+00 : f32
    %24 = vector.broadcast %cst_10 : f32 to vector<256x4xf32>
    %25 = arith.maximumf %23, %24 : vector<256x4xf32>
    %c0_11 = arith.constant 0 : index
    %c0_12 = arith.constant 0 : index
    %c0_13 = arith.constant 0 : index
    %26 = vector.load %arg4[%c0_11, %c0_12, %c0_13] : memref<1x256x4xf32, #tpu.memory_space<vmem>>, vector<1x256x4xf32>
    %27 = vector.shape_cast %26 : vector<1x256x4xf32> to vector<256x4xf32>
    %28 = vector.shape_cast %25 : vector<256x4xf32> to vector<1x256x4xf32>
    tpu.vector_store %arg4[%c0_11, %c0_12, %c0_13], %28 {strides = array<i32>} : memref<1x256x4xf32, #tpu.memory_space<vmem>>, vector<1x256x4xf32>,
    return
  }
  func.func @transform_0(%arg0: i32) -> (i32, i32, i32) {
    %c0_i32 = arith.constant 0 : i32
    %c0_i32_0 = arith.constant 0 : i32
    %c0_i32_1 = arith.constant 0 : i32
    return %arg0, %c0_i32, %c0_i32_0 : i32, i32, i32
  }
  func.func @transform_1(%arg0: i32) -> (i32, i32) {
    %c0_i32 = arith.constant 0 : i32
    %c0_i32_0 = arith.constant 0 : i32
    %c0_i32_1 = arith.constant 0 : i32
    return %c0_i32, %c0_i32_0 : i32, i32
  }
  func.func @transform_2(%arg0: i32) -> (i32, i32) {
    %c0_i32 = arith.constant 0 : i32
    %c0_i32_0 = arith.constant 0 : i32
    %c0_i32_1 = arith.constant 0 : i32
    return %c0_i32, %c0_i32_0 : i32, i32
  }
  func.func @transform_3(%arg0: i32) -> (i32, i32, i32) {
    %c0_i32 = arith.constant 0 : i32
    %c0_i32_0 = arith.constant 0 : i32
    %c0_i32_1 = arith.constant 0 : i32
    return %arg0, %c0_i32, %c0_i32_0 : i32, i32, i32
  }
}

module attributes {stable_mosaic.version = 11 : i64} {
  func.func @_mm_kernel(%arg0: i32, %arg1: memref<128x4xf32, #tpu.memory_space<vmem>>, %arg2: memref<4x8xf32, #tpu.memory_space<vmem>>, %arg3: memref<128x8xf32, #tpu.memory_space<vmem>>) attributes {dimension_semantics = [#tpu.dimension_semantics<parallel>], iteration_bounds = array<i64: 1>, scalar_prefetch = 0 : i64, scratch_operands = 0 : i64, tpu.core_type = #tpu.core_type<tc>, window_params = [{transform_indices = @transform_0, window_bounds = array<i64: 128, 4>}, {pipeline_mode = #tpu.pipeline_mode<synchronous>, transform_indices = @transform_1, window_bounds = array<i64: 4, 8>}, {transform_indices = @transform_2, window_bounds = array<i64: 128, 8>}]} {
    %c0 = arith.constant 0 : index
    %c0_0 = arith.constant 0 : index
    %0 = vector.load %arg1[%c0, %c0_0] : memref<128x4xf32, #tpu.memory_space<vmem>>, vector<128x4xf32>
    %c0_1 = arith.constant 0 : index
    %c0_2 = arith.constant 0 : index
    %1 = vector.load %arg2[%c0_1, %c0_2] : memref<4x8xf32, #tpu.memory_space<vmem>>, vector<4x8xf32>
    %cst = arith.constant dense<0.000000e+00> : vector<128x8xf32>
    %2 = tpu.matmul %0, %1, %cst {dimension_numbers = #tpu.dot_dimension_numbers<[1], [0], [0], [1], [0, 0, 1, 1], [], []>, precision = #tpu.contract_precision<fp32>} : vector<128x4xf32>, vector<4x8xf32>, vector<128x8xf32> -> vector<128x8xf32>
    %c0_3 = arith.constant 0 : index
    %c0_4 = arith.constant 0 : index
    %3 = vector.load %arg3[%c0_3, %c0_4] : memref<128x8xf32, #tpu.memory_space<vmem>>, vector<128x8xf32>
    tpu.vector_store %arg3[%c0_3, %c0_4], %2 {strides = array<i32>} : memref<128x8xf32, #tpu.memory_space<vmem>>, vector<128x8xf32>,
    return
  }
  func.func @transform_0(%arg0: i32) -> (i32, i32) {
    %c0_i32 = arith.constant 0 : i32
    %c0_i32_0 = arith.constant 0 : i32
    return %arg0, %c0_i32 : i32, i32
  }
  func.func @transform_1(%arg0: i32) -> (i32, i32) {
    %c0_i32 = arith.constant 0 : i32
    %c0_i32_0 = arith.constant 0 : i32
    %c0_i32_1 = arith.constant 0 : i32
    return %c0_i32, %c0_i32_0 : i32, i32
  }
  func.func @transform_2(%arg0: i32) -> (i32, i32) {
    %c0_i32 = arith.constant 0 : i32
    %c0_i32_0 = arith.constant 0 : i32
    return %arg0, %c0_i32 : i32, i32
  }
}

module attributes {stable_mosaic.version = 11 : i64} {
  func.func @_mm_in_relu_kernel(%arg0: i32, %arg1: memref<1x64x36xf32, #tpu.memory_space<vmem>>, %arg2: memref<36x8xf32, #tpu.memory_space<vmem>>, %arg3: memref<1x8xf32, #tpu.memory_space<vmem>>, %arg4: memref<1x8xf32, #tpu.memory_space<vmem>>, %arg5: memref<1x64x8xf32, #tpu.memory_space<vmem>>) attributes {dimension_semantics = [#tpu.dimension_semantics<parallel>], iteration_bounds = array<i64: 2>, scalar_prefetch = 0 : i64, scratch_operands = 0 : i64, tpu.core_type = #tpu.core_type<tc>, window_params = [{transform_indices = @transform_0, window_bounds = array<i64: 1, 64, 36>}, {pipeline_mode = #tpu.pipeline_mode<synchronous>, transform_indices = @transform_1, window_bounds = array<i64: 36, 8>}, {pipeline_mode = #tpu.pipeline_mode<synchronous>, transform_indices = @transform_2, window_bounds = array<i64: 1, 8>}, {pipeline_mode = #tpu.pipeline_mode<synchronous>, transform_indices = @transform_3, window_bounds = array<i64: 1, 8>}, {transform_indices = @transform_4, window_bounds = array<i64: 1, 64, 8>}]} {
    %c0 = arith.constant 0 : index
    %c0_0 = arith.constant 0 : index
    %c0_1 = arith.constant 0 : index
    %0 = vector.load %arg1[%c0, %c0_0, %c0_1] : memref<1x64x36xf32, #tpu.memory_space<vmem>>, vector<1x64x36xf32>
    %1 = vector.shape_cast %0 : vector<1x64x36xf32> to vector<64x36xf32>
    %c0_2 = arith.constant 0 : index
    %c0_3 = arith.constant 0 : index
    %2 = vector.load %arg2[%c0_2, %c0_3] : memref<36x8xf32, #tpu.memory_space<vmem>>, vector<36x8xf32>
    %cst = arith.constant dense<0.000000e+00> : vector<64x8xf32>
    %3 = tpu.matmul %1, %2, %cst {dimension_numbers = #tpu.dot_dimension_numbers<[1], [0], [0], [1], [0, 0, 1, 1], [], []>, precision = #tpu.contract_precision<fp32>} : vector<64x36xf32>, vector<36x8xf32>, vector<64x8xf32> -> vector<64x8xf32>
    %cst_4 = arith.constant dense<0.000000e+00> : vector<8xf32>
    %4 = vector.multi_reduction <add>, %3, %cst_4 [0] : vector<64x8xf32> to vector<8xf32>
    %5 = vector.shape_cast %4 : vector<8xf32> to vector<1x8xf32>
    %cst_5 = arith.constant 6.400000e+01 : f32
    %6 = vector.broadcast %cst_5 : f32 to vector<1x8xf32>
    %7 = arith.divf %5, %6 : vector<1x8xf32>
    %8 = vector.broadcast %7 : vector<1x8xf32> to vector<64x8xf32>
    %9 = arith.subf %3, %8 : vector<64x8xf32>
    %10 = arith.mulf %9, %9 : vector<64x8xf32>
    %cst_6 = arith.constant dense<0.000000e+00> : vector<8xf32>
    %11 = vector.multi_reduction <add>, %10, %cst_6 [0] : vector<64x8xf32> to vector<8xf32>
    %12 = vector.shape_cast %11 : vector<8xf32> to vector<1x8xf32>
    %cst_7 = arith.constant 6.400000e+01 : f32
    %13 = vector.broadcast %cst_7 : f32 to vector<1x8xf32>
    %14 = arith.divf %12, %13 : vector<1x8xf32>
    %cst_8 = arith.constant 9.99999974E-6 : f32
    %15 = vector.broadcast %cst_8 : f32 to vector<1x8xf32>
    %16 = arith.addf %14, %15 : vector<1x8xf32>
    %17 = math.rsqrt %16 : vector<1x8xf32>
    %18 = vector.broadcast %17 : vector<1x8xf32> to vector<64x8xf32>
    %19 = arith.mulf %9, %18 : vector<64x8xf32>
    %c0_9 = arith.constant 0 : index
    %c0_10 = arith.constant 0 : index
    %20 = vector.load %arg3[%c0_9, %c0_10] : memref<1x8xf32, #tpu.memory_space<vmem>>, vector<1x8xf32>
    %21 = vector.broadcast %20 : vector<1x8xf32> to vector<64x8xf32>
    %22 = arith.mulf %19, %21 : vector<64x8xf32>
    %c0_11 = arith.constant 0 : index
    %c0_12 = arith.constant 0 : index
    %23 = vector.load %arg4[%c0_11, %c0_12] : memref<1x8xf32, #tpu.memory_space<vmem>>, vector<1x8xf32>
    %24 = vector.broadcast %23 : vector<1x8xf32> to vector<64x8xf32>
    %25 = arith.addf %22, %24 : vector<64x8xf32>
    %cst_13 = arith.constant 0.000000e+00 : f32
    %26 = vector.broadcast %cst_13 : f32 to vector<64x8xf32>
    %27 = arith.maximumf %25, %26 : vector<64x8xf32>
    %c0_14 = arith.constant 0 : index
    %c0_15 = arith.constant 0 : index
    %c0_16 = arith.constant 0 : index
    %28 = vector.load %arg5[%c0_14, %c0_15, %c0_16] : memref<1x64x8xf32, #tpu.memory_space<vmem>>, vector<1x64x8xf32>
    %29 = vector.shape_cast %28 : vector<1x64x8xf32> to vector<64x8xf32>
    %30 = vector.shape_cast %27 : vector<64x8xf32> to vector<1x64x8xf32>
    tpu.vector_store %arg5[%c0_14, %c0_15, %c0_16], %30 {strides = array<i32>} : memref<1x64x8xf32, #tpu.memory_space<vmem>>, vector<1x64x8xf32>,
    return
  }
  func.func @transform_0(%arg0: i32) -> (i32, i32, i32) {
    %c0_i32 = arith.constant 0 : i32
    %c0_i32_0 = arith.constant 0 : i32
    %c0_i32_1 = arith.constant 0 : i32
    return %arg0, %c0_i32, %c0_i32_0 : i32, i32, i32
  }
  func.func @transform_1(%arg0: i32) -> (i32, i32) {
    %c0_i32 = arith.constant 0 : i32
    %c0_i32_0 = arith.constant 0 : i32
    %c0_i32_1 = arith.constant 0 : i32
    return %c0_i32, %c0_i32_0 : i32, i32
  }
  func.func @transform_2(%arg0: i32) -> (i32, i32) {
    %c0_i32 = arith.constant 0 : i32
    %c0_i32_0 = arith.constant 0 : i32
    %c0_i32_1 = arith.constant 0 : i32
    return %c0_i32, %c0_i32_0 : i32, i32
  }
  func.func @transform_3(%arg0: i32) -> (i32, i32) {
    %c0_i32 = arith.constant 0 : i32
    %c0_i32_0 = arith.constant 0 : i32
    %c0_i32_1 = arith.constant 0 : i32
    return %c0_i32, %c0_i32_0 : i32, i32
  }
  func.func @transform_4(%arg0: i32) -> (i32, i32, i32) {
    %c0_i32 = arith.constant 0 : i32
    %c0_i32_0 = arith.constant 0 : i32
    %c0_i32_1 = arith.constant 0 : i32
    return %arg0, %c0_i32, %c0_i32_0 : i32, i32, i32
  }
}

module attributes {stable_mosaic.version = 11 : i64} {
  func.func @_mm_add_kernel(%arg0: i32, %arg1: memref<128x72xf32, #tpu.memory_space<vmem>>, %arg2: memref<72x8xf32, #tpu.memory_space<vmem>>, %arg3: memref<128x8xf32, #tpu.memory_space<vmem>>, %arg4: memref<128x8xf32, #tpu.memory_space<vmem>>) attributes {dimension_semantics = [#tpu.dimension_semantics<parallel>], iteration_bounds = array<i64: 1>, scalar_prefetch = 0 : i64, scratch_operands = 0 : i64, tpu.core_type = #tpu.core_type<tc>, window_params = [{transform_indices = @transform_0, window_bounds = array<i64: 128, 72>}, {pipeline_mode = #tpu.pipeline_mode<synchronous>, transform_indices = @transform_1, window_bounds = array<i64: 72, 8>}, {transform_indices = @transform_2, window_bounds = array<i64: 128, 8>}, {transform_indices = @transform_3, window_bounds = array<i64: 128, 8>}]} {
    %c0 = arith.constant 0 : index
    %c0_0 = arith.constant 0 : index
    %0 = vector.load %arg1[%c0, %c0_0] : memref<128x72xf32, #tpu.memory_space<vmem>>, vector<128x72xf32>
    %c0_1 = arith.constant 0 : index
    %c0_2 = arith.constant 0 : index
    %1 = vector.load %arg2[%c0_1, %c0_2] : memref<72x8xf32, #tpu.memory_space<vmem>>, vector<72x8xf32>
    %cst = arith.constant dense<0.000000e+00> : vector<128x8xf32>
    %2 = tpu.matmul %0, %1, %cst {dimension_numbers = #tpu.dot_dimension_numbers<[1], [0], [0], [1], [0, 0, 1, 1], [], []>, precision = #tpu.contract_precision<fp32>} : vector<128x72xf32>, vector<72x8xf32>, vector<128x8xf32> -> vector<128x8xf32>
    %c0_3 = arith.constant 0 : index
    %c0_4 = arith.constant 0 : index
    %3 = vector.load %arg3[%c0_3, %c0_4] : memref<128x8xf32, #tpu.memory_space<vmem>>, vector<128x8xf32>
    %4 = arith.addf %2, %3 : vector<128x8xf32>
    %c0_5 = arith.constant 0 : index
    %c0_6 = arith.constant 0 : index
    %5 = vector.load %arg4[%c0_5, %c0_6] : memref<128x8xf32, #tpu.memory_space<vmem>>, vector<128x8xf32>
    tpu.vector_store %arg4[%c0_5, %c0_6], %4 {strides = array<i32>} : memref<128x8xf32, #tpu.memory_space<vmem>>, vector<128x8xf32>,
    return
  }
  func.func @transform_0(%arg0: i32) -> (i32, i32) {
    %c0_i32 = arith.constant 0 : i32
    %c0_i32_0 = arith.constant 0 : i32
    return %arg0, %c0_i32 : i32, i32
  }
  func.func @transform_1(%arg0: i32) -> (i32, i32) {
    %c0_i32 = arith.constant 0 : i32
    %c0_i32_0 = arith.constant 0 : i32
    %c0_i32_1 = arith.constant 0 : i32
    return %c0_i32, %c0_i32_0 : i32, i32
  }
  func.func @transform_2(%arg0: i32) -> (i32, i32) {
    %c0_i32 = arith.constant 0 : i32
    %c0_i32_0 = arith.constant 0 : i32
    return %arg0, %c0_i32 : i32, i32
  }
  func.func @transform_3(%arg0: i32) -> (i32, i32) {
    %c0_i32 = arith.constant 0 : i32
    %c0_i32_0 = arith.constant 0 : i32
    return %arg0, %c0_i32 : i32, i32
  }
}

module attributes {stable_mosaic.version = 11 : i64} {
  func.func @_in_relu_kernel(%arg0: i32, %arg1: memref<1x64x8xf32, #tpu.memory_space<vmem>>, %arg2: memref<1x8xf32, #tpu.memory_space<vmem>>, %arg3: memref<1x8xf32, #tpu.memory_space<vmem>>, %arg4: memref<1x64x8xf32, #tpu.memory_space<vmem>>) attributes {dimension_semantics = [#tpu.dimension_semantics<parallel>], iteration_bounds = array<i64: 2>, scalar_prefetch = 0 : i64, scratch_operands = 0 : i64, tpu.core_type = #tpu.core_type<tc>, window_params = [{transform_indices = @transform_0, window_bounds = array<i64: 1, 64, 8>}, {pipeline_mode = #tpu.pipeline_mode<synchronous>, transform_indices = @transform_1, window_bounds = array<i64: 1, 8>}, {pipeline_mode = #tpu.pipeline_mode<synchronous>, transform_indices = @transform_2, window_bounds = array<i64: 1, 8>}, {transform_indices = @transform_3, window_bounds = array<i64: 1, 64, 8>}]} {
    %c0 = arith.constant 0 : index
    %c0_0 = arith.constant 0 : index
    %c0_1 = arith.constant 0 : index
    %0 = vector.load %arg1[%c0, %c0_0, %c0_1] : memref<1x64x8xf32, #tpu.memory_space<vmem>>, vector<1x64x8xf32>
    %1 = vector.shape_cast %0 : vector<1x64x8xf32> to vector<64x8xf32>
    %cst = arith.constant dense<0.000000e+00> : vector<8xf32>
    %2 = vector.multi_reduction <add>, %1, %cst [0] : vector<64x8xf32> to vector<8xf32>
    %3 = vector.shape_cast %2 : vector<8xf32> to vector<1x8xf32>
    %cst_2 = arith.constant 6.400000e+01 : f32
    %4 = vector.broadcast %cst_2 : f32 to vector<1x8xf32>
    %5 = arith.divf %3, %4 : vector<1x8xf32>
    %6 = vector.broadcast %5 : vector<1x8xf32> to vector<64x8xf32>
    %7 = arith.subf %1, %6 : vector<64x8xf32>
    %8 = arith.mulf %7, %7 : vector<64x8xf32>
    %cst_3 = arith.constant dense<0.000000e+00> : vector<8xf32>
    %9 = vector.multi_reduction <add>, %8, %cst_3 [0] : vector<64x8xf32> to vector<8xf32>
    %10 = vector.shape_cast %9 : vector<8xf32> to vector<1x8xf32>
    %cst_4 = arith.constant 6.400000e+01 : f32
    %11 = vector.broadcast %cst_4 : f32 to vector<1x8xf32>
    %12 = arith.divf %10, %11 : vector<1x8xf32>
    %cst_5 = arith.constant 9.99999974E-6 : f32
    %13 = vector.broadcast %cst_5 : f32 to vector<1x8xf32>
    %14 = arith.addf %12, %13 : vector<1x8xf32>
    %15 = math.rsqrt %14 : vector<1x8xf32>
    %16 = vector.broadcast %15 : vector<1x8xf32> to vector<64x8xf32>
    %17 = arith.mulf %7, %16 : vector<64x8xf32>
    %c0_6 = arith.constant 0 : index
    %c0_7 = arith.constant 0 : index
    %18 = vector.load %arg2[%c0_6, %c0_7] : memref<1x8xf32, #tpu.memory_space<vmem>>, vector<1x8xf32>
    %19 = vector.broadcast %18 : vector<1x8xf32> to vector<64x8xf32>
    %20 = arith.mulf %17, %19 : vector<64x8xf32>
    %c0_8 = arith.constant 0 : index
    %c0_9 = arith.constant 0 : index
    %21 = vector.load %arg3[%c0_8, %c0_9] : memref<1x8xf32, #tpu.memory_space<vmem>>, vector<1x8xf32>
    %22 = vector.broadcast %21 : vector<1x8xf32> to vector<64x8xf32>
    %23 = arith.addf %20, %22 : vector<64x8xf32>
    %cst_10 = arith.constant 0.000000e+00 : f32
    %24 = vector.broadcast %cst_10 : f32 to vector<64x8xf32>
    %25 = arith.maximumf %23, %24 : vector<64x8xf32>
    %c0_11 = arith.constant 0 : index
    %c0_12 = arith.constant 0 : index
    %c0_13 = arith.constant 0 : index
    %26 = vector.load %arg4[%c0_11, %c0_12, %c0_13] : memref<1x64x8xf32, #tpu.memory_space<vmem>>, vector<1x64x8xf32>
    %27 = vector.shape_cast %26 : vector<1x64x8xf32> to vector<64x8xf32>
    %28 = vector.shape_cast %25 : vector<64x8xf32> to vector<1x64x8xf32>
    tpu.vector_store %arg4[%c0_11, %c0_12, %c0_13], %28 {strides = array<i32>} : memref<1x64x8xf32, #tpu.memory_space<vmem>>, vector<1x64x8xf32>,
    return
  }
  func.func @transform_0(%arg0: i32) -> (i32, i32, i32) {
    %c0_i32 = arith.constant 0 : i32
    %c0_i32_0 = arith.constant 0 : i32
    %c0_i32_1 = arith.constant 0 : i32
    return %arg0, %c0_i32, %c0_i32_0 : i32, i32, i32
  }
  func.func @transform_1(%arg0: i32) -> (i32, i32) {
    %c0_i32 = arith.constant 0 : i32
    %c0_i32_0 = arith.constant 0 : i32
    %c0_i32_1 = arith.constant 0 : i32
    return %c0_i32, %c0_i32_0 : i32, i32
  }
  func.func @transform_2(%arg0: i32) -> (i32, i32) {
    %c0_i32 = arith.constant 0 : i32
    %c0_i32_0 = arith.constant 0 : i32
    %c0_i32_1 = arith.constant 0 : i32
    return %c0_i32, %c0_i32_0 : i32, i32
  }
  func.func @transform_3(%arg0: i32) -> (i32, i32, i32) {
    %c0_i32 = arith.constant 0 : i32
    %c0_i32_0 = arith.constant 0 : i32
    %c0_i32_1 = arith.constant 0 : i32
    return %arg0, %c0_i32, %c0_i32_0 : i32, i32, i32
  }
}

module attributes {stable_mosaic.version = 11 : i64} {
  func.func @_mm_in_relu_kernel(%arg0: i32, %arg1: memref<1x64x72xf32, #tpu.memory_space<vmem>>, %arg2: memref<72x8xf32, #tpu.memory_space<vmem>>, %arg3: memref<1x8xf32, #tpu.memory_space<vmem>>, %arg4: memref<1x8xf32, #tpu.memory_space<vmem>>, %arg5: memref<1x64x8xf32, #tpu.memory_space<vmem>>) attributes {dimension_semantics = [#tpu.dimension_semantics<parallel>], iteration_bounds = array<i64: 2>, scalar_prefetch = 0 : i64, scratch_operands = 0 : i64, tpu.core_type = #tpu.core_type<tc>, window_params = [{transform_indices = @transform_0, window_bounds = array<i64: 1, 64, 72>}, {pipeline_mode = #tpu.pipeline_mode<synchronous>, transform_indices = @transform_1, window_bounds = array<i64: 72, 8>}, {pipeline_mode = #tpu.pipeline_mode<synchronous>, transform_indices = @transform_2, window_bounds = array<i64: 1, 8>}, {pipeline_mode = #tpu.pipeline_mode<synchronous>, transform_indices = @transform_3, window_bounds = array<i64: 1, 8>}, {transform_indices = @transform_4, window_bounds = array<i64: 1, 64, 8>}]} {
    %c0 = arith.constant 0 : index
    %c0_0 = arith.constant 0 : index
    %c0_1 = arith.constant 0 : index
    %0 = vector.load %arg1[%c0, %c0_0, %c0_1] : memref<1x64x72xf32, #tpu.memory_space<vmem>>, vector<1x64x72xf32>
    %1 = vector.shape_cast %0 : vector<1x64x72xf32> to vector<64x72xf32>
    %c0_2 = arith.constant 0 : index
    %c0_3 = arith.constant 0 : index
    %2 = vector.load %arg2[%c0_2, %c0_3] : memref<72x8xf32, #tpu.memory_space<vmem>>, vector<72x8xf32>
    %cst = arith.constant dense<0.000000e+00> : vector<64x8xf32>
    %3 = tpu.matmul %1, %2, %cst {dimension_numbers = #tpu.dot_dimension_numbers<[1], [0], [0], [1], [0, 0, 1, 1], [], []>, precision = #tpu.contract_precision<fp32>} : vector<64x72xf32>, vector<72x8xf32>, vector<64x8xf32> -> vector<64x8xf32>
    %cst_4 = arith.constant dense<0.000000e+00> : vector<8xf32>
    %4 = vector.multi_reduction <add>, %3, %cst_4 [0] : vector<64x8xf32> to vector<8xf32>
    %5 = vector.shape_cast %4 : vector<8xf32> to vector<1x8xf32>
    %cst_5 = arith.constant 6.400000e+01 : f32
    %6 = vector.broadcast %cst_5 : f32 to vector<1x8xf32>
    %7 = arith.divf %5, %6 : vector<1x8xf32>
    %8 = vector.broadcast %7 : vector<1x8xf32> to vector<64x8xf32>
    %9 = arith.subf %3, %8 : vector<64x8xf32>
    %10 = arith.mulf %9, %9 : vector<64x8xf32>
    %cst_6 = arith.constant dense<0.000000e+00> : vector<8xf32>
    %11 = vector.multi_reduction <add>, %10, %cst_6 [0] : vector<64x8xf32> to vector<8xf32>
    %12 = vector.shape_cast %11 : vector<8xf32> to vector<1x8xf32>
    %cst_7 = arith.constant 6.400000e+01 : f32
    %13 = vector.broadcast %cst_7 : f32 to vector<1x8xf32>
    %14 = arith.divf %12, %13 : vector<1x8xf32>
    %cst_8 = arith.constant 9.99999974E-6 : f32
    %15 = vector.broadcast %cst_8 : f32 to vector<1x8xf32>
    %16 = arith.addf %14, %15 : vector<1x8xf32>
    %17 = math.rsqrt %16 : vector<1x8xf32>
    %18 = vector.broadcast %17 : vector<1x8xf32> to vector<64x8xf32>
    %19 = arith.mulf %9, %18 : vector<64x8xf32>
    %c0_9 = arith.constant 0 : index
    %c0_10 = arith.constant 0 : index
    %20 = vector.load %arg3[%c0_9, %c0_10] : memref<1x8xf32, #tpu.memory_space<vmem>>, vector<1x8xf32>
    %21 = vector.broadcast %20 : vector<1x8xf32> to vector<64x8xf32>
    %22 = arith.mulf %19, %21 : vector<64x8xf32>
    %c0_11 = arith.constant 0 : index
    %c0_12 = arith.constant 0 : index
    %23 = vector.load %arg4[%c0_11, %c0_12] : memref<1x8xf32, #tpu.memory_space<vmem>>, vector<1x8xf32>
    %24 = vector.broadcast %23 : vector<1x8xf32> to vector<64x8xf32>
    %25 = arith.addf %22, %24 : vector<64x8xf32>
    %cst_13 = arith.constant 0.000000e+00 : f32
    %26 = vector.broadcast %cst_13 : f32 to vector<64x8xf32>
    %27 = arith.maximumf %25, %26 : vector<64x8xf32>
    %c0_14 = arith.constant 0 : index
    %c0_15 = arith.constant 0 : index
    %c0_16 = arith.constant 0 : index
    %28 = vector.load %arg5[%c0_14, %c0_15, %c0_16] : memref<1x64x8xf32, #tpu.memory_space<vmem>>, vector<1x64x8xf32>
    %29 = vector.shape_cast %28 : vector<1x64x8xf32> to vector<64x8xf32>
    %30 = vector.shape_cast %27 : vector<64x8xf32> to vector<1x64x8xf32>
    tpu.vector_store %arg5[%c0_14, %c0_15, %c0_16], %30 {strides = array<i32>} : memref<1x64x8xf32, #tpu.memory_space<vmem>>, vector<1x64x8xf32>,
    return
  }
  func.func @transform_0(%arg0: i32) -> (i32, i32, i32) {
    %c0_i32 = arith.constant 0 : i32
    %c0_i32_0 = arith.constant 0 : i32
    %c0_i32_1 = arith.constant 0 : i32
    return %arg0, %c0_i32, %c0_i32_0 : i32, i32, i32
  }
  func.func @transform_1(%arg0: i32) -> (i32, i32) {
    %c0_i32 = arith.constant 0 : i32
    %c0_i32_0 = arith.constant 0 : i32
    %c0_i32_1 = arith.constant 0 : i32
    return %c0_i32, %c0_i32_0 : i32, i32
  }
  func.func @transform_2(%arg0: i32) -> (i32, i32) {
    %c0_i32 = arith.constant 0 : i32
    %c0_i32_0 = arith.constant 0 : i32
    %c0_i32_1 = arith.constant 0 : i32
    return %c0_i32, %c0_i32_0 : i32, i32
  }
  func.func @transform_3(%arg0: i32) -> (i32, i32) {
    %c0_i32 = arith.constant 0 : i32
    %c0_i32_0 = arith.constant 0 : i32
    %c0_i32_1 = arith.constant 0 : i32
    return %c0_i32, %c0_i32_0 : i32, i32
  }
  func.func @transform_4(%arg0: i32) -> (i32, i32, i32) {
    %c0_i32 = arith.constant 0 : i32
    %c0_i32_0 = arith.constant 0 : i32
    %c0_i32_1 = arith.constant 0 : i32
    return %arg0, %c0_i32, %c0_i32_0 : i32, i32, i32
  }
}

</mosaic_0001>

<bundles_post_ra>
// kernel: _lambda_.7
= control target key start
LH: loop header
LB: loop body
LE: loop exit
PB: predicated region body
PF: predicated region fallthrough
CT: control target
= control target key end

     0   :  { %s693_s12 = smov 0   ;;  %s1311_s0 = inlined_call_operand.vmem [shape: f32[2,256,4], index: 0, kind: input, shape index: {}]   ;;  %s1312_s1 = inlined_call_operand.vmem [shape: f32[1,4], index: 1, kind: input, shape index: {}]   ;;  %s1313_s2 = inlined_call_operand.vmem [shape: f32[1,4], index: 2, kind: input, shape index: {}]   ;;  %s1314_s3 = inlined_call_operand.vmem [shape: f32[2,256,4], index: 3, kind: output, shape index: {}]  }
   0x1 LB: > { %s640_s13 = sadd.s32 4294967295, %s671_s12   ;;  %p644_p0 = scmp.ge.s32.totalorder %s671_s12, 1  ;;  %s671_s12 = sphi %s693_s12, %s13_s12  }
   0x2   : > { %p137_p1 = scmp.lt.s32.totalorder %s671_s12, 3 }
   0x4   : > { %p138_p2 = pnand %p644_p0, %p137_p1 }
   0x5   : > { %p161_p3 = scmp.lt.s32.totalorder (!%p138_p2), %s640_s13, 1 }
   0x6   : > { %141 = sbr.rel (%p138_p2) target bundleno = 228 (0xe4), region = 32 }
   0xb   : > { %s1316_s13 = smov (!%p161_p3, %s640_s13), 1  ;;  %vm203_vm0 = vcmask 31744  }
   0xc   : > { %s653_s14 = sshll.u32 %s1316_s13, 8 }
   0xd   : > { %s709_s17 = scalar_lea.vmem %s1311_s0, %s653_s14  ;;  %s1142_s24 = scalar_lea.vmem %s1314_s3, %s653_s14 }
   0xe   : > { %v712_v0 = vld [vmem:[%s709_s17] sm:$0xff]  ;;  %v715_v1 = vld [vmem:[%s709_s17 + $0x8] sm:$0xff]  ;;  %v718_v2 = vld [vmem:[%s709_s17 + $0x10] sm:$0xff] }
   0xf   : > { %v721_v3 = vld [vmem:[%s709_s17 + $0x18] sm:$0xff]  ;;  %v204_v4 = vsel %vm203_vm0, %v712_v0, 0.0  ;;  %v205_v5 = vsel %vm203_vm0, %v715_v1, 0.0  ;;  %v207_v6 = vsel %vm203_vm0, %v718_v2, 0.0  ;;  %v730_v7 = vld [vmem:[%s709_s17 + $0x20] sm:$0xff]  ;;  %v735_v10 = vld [vmem:[%s709_s17 + $0x28] sm:$0xff] }
  0x10   : > { %v206_v8 = vadd.f32 %v205_v5, %v204_v4  ;;  %v209_v9 = vsel %vm203_vm0, %v721_v3, 0.0  ;;  %v211_v12 = vsel %vm203_vm0, %v730_v7, 0.0  ;;  %v740_v13 = vld [vmem:[%s709_s17 + $0x30] sm:$0xff]  ;;  %v213_v15 = vsel %vm203_vm0, %v735_v10, 0.0  ;;  %v745_v16 = vld [vmem:[%s709_s17 + $0x38] sm:$0xff]  ;;  %v750_v19 = vld [vmem:[%s709_s17 + $0x40] sm:$0xff] }
  0x11   : > { %v215_v18 = vsel %vm203_vm0, %v740_v13, 0.0  ;;  %v217_v21 = vsel %vm203_vm0, %v745_v16, 0.0  ;;  %v755_v22 = vld [vmem:[%s709_s17 + $0x48] sm:$0xff]  ;;  %v219_v24 = vsel %vm203_vm0, %v750_v19, 0.0  ;;  %v760_v25 = vld [vmem:[%s709_s17 + $0x50] sm:$0xff]  ;;  %v765_v28 = vld [vmem:[%s709_s17 + $0x58] sm:$0xff] }
  0x12   : > { %v208_v11 = vadd.f32 %v207_v6, %v206_v8  ;;  %v221_v27 = vsel %vm203_vm0, %v755_v22, 0.0  ;;  %v223_v30 = vsel %vm203_vm0, %v760_v25, 0.0  ;;  %v770_v31 = vld [vmem:[%s709_s17 + $0x60] sm:$0xff]  ;;  %v225_v33 = vsel %vm203_vm0, %v765_v28, 0.0  ;;  %v775_v34 = vld [vmem:[%s709_s17 + $0x68] sm:$0xff]  ;;  %v780_v37 = vld [vmem:[%s709_s17 + $0x70] sm:$0xff] }
  0x13   : > { %v227_v36 = vsel %vm203_vm0, %v770_v31, 0.0  ;;  %v229_v39 = vsel %vm203_vm0, %v775_v34, 0.0  ;;  %v785_v40 = vld [vmem:[%s709_s17 + $0x78] sm:$0xff]  ;;  %v231_v42 = vsel %vm203_vm0, %v780_v37, 0.0  ;;  %v790_v43 = vld [vmem:[%s709_s17 + $0x80] sm:$0xff]  ;;  %v795_v46 = vld [vmem:[%s709_s17 + $0x88] sm:$0xff] }
  0x14   : > { %v210_v14 = vadd.f32 %v209_v9, %v208_v11  ;;  %v233_v45 = vsel %vm203_vm0, %v785_v40, 0.0  ;;  %v235_v48 = vsel %vm203_vm0, %v790_v43, 0.0  ;;  %v800_v49 = vld [vmem:[%s709_s17 + $0x90] sm:$0xff]  ;;  %v237_v51 = vsel %vm203_vm0, %v795_v46, 0.0  ;;  %v805_v52 = vld [vmem:[%s709_s17 + $0x98] sm:$0xff]  ;;  %v810_v55 = vld [vmem:[%s709_s17 + $0xa0] sm:$0xff] }
  0x15   : > { %v239_v54 = vsel %vm203_vm0, %v800_v49, 0.0  ;;  %v241_v57 = vsel %vm203_vm0, %v805_v52, 0.0  ;;  %v815_v58 = vld [vmem:[%s709_s17 + $0xa8] sm:$0xff]  ;;  %v243_v60 = vsel %vm203_vm0, %v810_v55, 0.0  ;;  %v820_v61 = vld [vmem:[%s709_s17 + $0xb0] sm:$0xff]  ;;  %v825_v4 = vld [vmem:[%s709_s17 + $0xb8] sm:$0xff] }
  0x16   : > { %v212_v17 = vadd.f32 %v211_v12, %v210_v14  ;;  %v245_v63 = vsel %vm203_vm0, %v815_v58, 0.0  ;;  %v247_v6 = vsel %vm203_vm0, %v820_v61, 0.0  ;;  %v830_v8 = vld [vmem:[%s709_s17 + $0xc0] sm:$0xff]  ;;  %v249_v11 = vsel %vm203_vm0, %v825_v4, 0.0  ;;  %v835_v12 = vld [vmem:[%s709_s17 + $0xc8] sm:$0xff] }
  0x18   : > { %v214_v20 = vadd.f32 %v213_v15, %v212_v17  ;;  %v251_v15 = vsel %vm203_vm0, %v830_v8, 0.0  ;;  %v840_v17 = vld [vmem:[%s709_s17 + $0xd0] sm:$0xff] }
  0x1a   : > { %v216_v23 = vadd.f32 %v215_v18, %v214_v20  ;;  %v253_v20 = vsel %vm203_vm0, %v835_v12, 0.0 }
  0x1c   : > { %v218_v26 = vadd.f32 %v217_v21, %v216_v23  ;;  %v845_v21 = vld [vmem:[%s709_s17 + $0xd8] sm:$0xff] }
  0x1e   : > { %v220_v29 = vadd.f32 %v219_v24, %v218_v26  ;;  %v255_v24 = vsel %vm203_vm0, %v840_v17, 0.0  ;;  %v850_v26 = vld [vmem:[%s709_s17 + $0xe0] sm:$0xff] }
  0x20   : > { %v222_v32 = vadd.f32 %v221_v27, %v220_v29  ;;  %v257_v29 = vsel %vm203_vm0, %v845_v21, 0.0 }
  0x22   : > { %v224_v35 = vadd.f32 %v223_v30, %v222_v32  ;;  %v855_v30 = vld [vmem:[%s709_s17 + $0xe8] sm:$0xff] }
  0x24   : > { %v226_v38 = vadd.f32 %v225_v33, %v224_v35  ;;  %v259_v33 = vsel %vm203_vm0, %v850_v26, 0.0  ;;  %v860_v35 = vld [vmem:[%s709_s17 + $0xf0] sm:$0xff] }
  0x26   : > { %v228_v41 = vadd.f32 %v227_v36, %v226_v38  ;;  %v261_v38 = vsel %vm203_vm0, %v855_v30, 0.0 }
  0x28   : > { %v230_v44 = vadd.f32 %v229_v39, %v228_v41  ;;  %v865_v39 = vld [vmem:[%s709_s17 + $0xf8] sm:$0xff] }
  0x2a   : > { %v232_v47 = vadd.f32 %v231_v42, %v230_v44  ;;  %v263_v42 = vsel %vm203_vm0, %v860_v35, 0.0 }
  0x2c   : > { %v234_v50 = vadd.f32 %v233_v45, %v232_v47  ;;  %v265_v45 = vsel %vm203_vm0, %v865_v39, 0.0 }
  0x2e   : > { %v236_v53 = vadd.f32 %v235_v48, %v234_v50 }
  0x30   : > { %v238_v56 = vadd.f32 %v237_v51, %v236_v53 }
  0x32   : > { %v240_v59 = vadd.f32 %v239_v54, %v238_v56 }
  0x34   : > { %v242_v62 = vadd.f32 %v241_v57, %v240_v59 }
  0x36   : > { %v244_v5 = vadd.f32 %v243_v60, %v242_v62 }
  0x38   : > { %v246_v9 = vadd.f32 %v245_v63, %v244_v5 }
  0x3a   : > { %v248_v14 = vadd.f32 %v247_v6, %v246_v9 }
  0x3c   : > { %v250_v18 = vadd.f32 %v249_v11, %v248_v14 }
  0x3e   : > { %v252_v23 = vadd.f32 %v251_v15, %v250_v18 }
  0x40   : > { %v254_v27 = vadd.f32 %v253_v20, %v252_v23 }
  0x42   : > { %v256_v32 = vadd.f32 %v255_v24, %v254_v27 }
  0x44   : > { %v258_v36 = vadd.f32 %v257_v29, %v256_v32 }
  0x46   : > { %v260_v41 = vadd.f32 %v259_v33, %v258_v36 }
  0x48   : > { %v262_v44 = vadd.f32 %v261_v38, %v260_v41 }
  0x4a   : > { %v264_v47 = vadd.f32 %v263_v42, %v262_v44 }
  0x4c   : > { %v266_v48 = vadd.f32 %v265_v45, %v264_v47 }
  0x4e   : > { %v267_v50 = vrot.slane %v266_v48, 4 }
  0x50   : > { %v268_v51 = vadd.f32 %v267_v50, %v266_v48 }
  0x52   : > { %v269_v53 = vrot.slane %v268_v51, 2 }
  0x54   : > { %v270_v54 = vadd.f32 %v269_v53, %v268_v51 }
  0x56   : > { %v271_v56 = vrot.slane %v270_v54, 1 }
  0x58   : > { %v272_v57 = vadd.f32 %v271_v56, %v270_v54 }
  0x5a   : > { %v871_v59 = vmul.f32 0.00390625, %v272_v57 }
  0x5c   : > { %v875_v60 = vsub.f32 %v712_v0, %v871_v59  ;;  %v879_v62 = vsub.f32 %v715_v1, %v871_v59  ;;  %v883_v63 = vsub.f32 %v718_v2, %v871_v59  ;;  %v887_v5 = vsub.f32 %v721_v3, %v871_v59 }
  0x5d   : > { %v891_v6 = vsub.f32 %v730_v7, %v871_v59  ;;  %v901_v2 = vsub.f32 %v735_v10, %v871_v59  ;;  %v907_v7 = vsub.f32 %v740_v13, %v871_v59  ;;  %v916_v10 = vsub.f32 %v745_v16, %v871_v59 }
  0x5e   : > { %v307_v0 = vmul.f32 %v875_v60, %v875_v60  ;;  %v308_v9 = vmul.f32 %v879_v62, %v879_v62  ;;  %v309_v1 = vmul.f32 %v883_v63, %v883_v63  ;;  %v310_v3 = vmul.f32 %v887_v5, %v887_v5 }
  0x5f   : > { %v311_v11 = vmul.f32 %v891_v6, %v891_v6  ;;  %v312_v23 = vmul.f32 %v901_v2, %v901_v2  ;;  %v923_v27 = vsub.f32 %v750_v19, %v871_v59  ;;  %v313_v29 = vmul.f32 %v907_v7, %v907_v7 }
  0x60   : > { %v339_v14 = vsel %vm203_vm0, %v307_v0, 0.0  ;;  %v340_v15 = vsel %vm203_vm0, %v308_v9, 0.0  ;;  %v342_v18 = vsel %vm203_vm0, %v309_v1, 0.0  ;;  %v344_v13 = vsel %vm203_vm0, %v310_v3, 0.0 }
  0x61   : > { %v341_v20 = vadd.f32 %v340_v15, %v339_v14  ;;  %v346_v32 = vsel %vm203_vm0, %v311_v11, 0.0  ;;  %v930_v16 = vsub.f32 %v755_v22, %v871_v59  ;;  %v314_v36 = vmul.f32 %v916_v10, %v916_v10 }
  0x62   : > { %v348_v38 = vsel %vm203_vm0, %v312_v23, 0.0  ;;  %v937_v19 = vsub.f32 %v760_v25, %v871_v59  ;;  %v315_v42 = vmul.f32 %v923_v27, %v923_v27  ;;  %v350_v44 = vsel %vm203_vm0, %v313_v29, 0.0 }
  0x63   : > { %v343_v24 = vadd.f32 %v342_v18, %v341_v20  ;;  %v944_v22 = vsub.f32 %v765_v28, %v871_v59  ;;  %v316_v47 = vmul.f32 %v930_v16, %v930_v16  ;;  %v352_v48 = vsel %vm203_vm0, %v314_v36, 0.0 }
  0x64   : > { %v951_v25 = vsub.f32 %v770_v31, %v871_v59  ;;  %v317_v51 = vmul.f32 %v937_v19, %v937_v19  ;;  %v354_v53 = vsel %vm203_vm0, %v315_v42, 0.0  ;;  %v958_v28 = vsub.f32 %v775_v34, %v871_v59 }
  0x65   : > { %v345_v33 = vadd.f32 %v344_v13, %v343_v24  ;;  %v318_v56 = vmul.f32 %v944_v22, %v944_v22  ;;  %v356_v57 = vsel %vm203_vm0, %v316_v47, 0.0  ;;  %v965_v31 = vsub.f32 %v780_v37, %v871_v59 }
  0x66   : > { %v319_v9 = vmul.f32 %v951_v25, %v951_v25  ;;  %v358_v1 = vsel %vm203_vm0, %v317_v51, 0.0  ;;  %v972_v34 = vsub.f32 %v785_v40, %v871_v59  ;;  %v320_v11 = vmul.f32 %v958_v28, %v958_v28 }
  0x67   : > { %v347_v41 = vadd.f32 %v346_v32, %v345_v33  ;;  %v360_v14 = vsel %vm203_vm0, %v318_v56, 0.0  ;;  %v979_v37 = vsub.f32 %v790_v43, %v871_v59  ;;  %v321_v18 = vmul.f32 %v965_v31, %v965_v31 }
  0x68   : > { %v362_v20 = vsel %vm203_vm0, %v319_v9, 0.0  ;;  %v986_v40 = vsub.f32 %v795_v46, %v871_v59  ;;  %v322_v13 = vmul.f32 %v972_v34, %v972_v34  ;;  %v364_v24 = vsel %vm203_vm0, %v320_v11, 0.0 }
  0x69   : > { %v349_v45 = vadd.f32 %v348_v38, %v347_v41  ;;  %v993_v43 = vsub.f32 %v800_v49, %v871_v59  ;;  %v323_v32 = vmul.f32 %v979_v37, %v979_v37  ;;  %v366_v33 = vsel %vm203_vm0, %v321_v18, 0.0 }
  0x6a   : > { %v1000_v46 = vsub.f32 %v805_v52, %v871_v59  ;;  %v324_v38 = vmul.f32 %v986_v40, %v986_v40  ;;  %v368_v41 = vsel %vm203_vm0, %v322_v13, 0.0  ;;  %v1007_v49 = vsub.f32 %v810_v55, %v871_v59 }
  0x6b   : > { %v351_v50 = vadd.f32 %v350_v44, %v349_v45  ;;  %v325_v44 = vmul.f32 %v993_v43, %v993_v43  ;;  %v370_v45 = vsel %vm203_vm0, %v323_v32, 0.0  ;;  %v1014_v52 = vsub.f32 %v815_v58, %v871_v59 }
  0x6c   : > { %v1021_v55 = vsub.f32 %v820_v61, %v871_v59  ;;  %v1028_v58 = vsub.f32 %v825_v4, %v871_v59  ;;  %v1035_v61 = vsub.f32 %v830_v8, %v871_v59  ;;  %v1042_v4 = vsub.f32 %v835_v12, %v871_v59 }
  0x6d   : > { %v353_v54 = vadd.f32 %v352_v48, %v351_v50  ;;  %v326_v48 = vmul.f32 %v1000_v46, %v1000_v46  ;;  %v372_v50 = vsel %vm203_vm0, %v324_v38, 0.0  ;;  %v1049_v8 = vsub.f32 %v840_v17, %v871_v59 }
  0x6e   : > { %v1056_v12 = vsub.f32 %v845_v21, %v871_v59  ;;  %v1063_v17 = vsub.f32 %v850_v26, %v871_v59  ;;  %v1070_v21 = vsub.f32 %v855_v30, %v871_v59  ;;  %v1077_v26 = vsub.f32 %v860_v35, %v871_v59 }
  0x6f   : > { %v355_v0 = vadd.f32 %v354_v53, %v353_v54  ;;  %v327_v53 = vmul.f32 %v1007_v49, %v1007_v49  ;;  %v374_v54 = vsel %vm203_vm0, %v325_v44, 0.0  ;;  %v1084_v30 = vsub.f32 %v865_v39, %v871_v59 }
  0x70   : > { %v337_v35 = vmul.f32 %v1077_v26, %v1077_v26 }
  0x71   : > { %v357_v3 = vadd.f32 %v356_v57, %v355_v0  ;;  %v328_v57 = vmul.f32 %v1014_v52, %v1014_v52  ;;  %v376_v0 = vsel %vm203_vm0, %v326_v48, 0.0 }
  0x72   : > { %v398_v39 = vsel %vm203_vm0, %v337_v35, 0.0 }
  0x73   : > { %v359_v15 = vadd.f32 %v358_v1, %v357_v3  ;;  %v329_v1 = vmul.f32 %v1021_v55, %v1021_v55  ;;  %v378_v3 = vsel %vm203_vm0, %v327_v53, 0.0 }
  0x75   : > { %v361_v23 = vadd.f32 %v360_v14, %v359_v15  ;;  %v330_v14 = vmul.f32 %v1028_v58, %v1028_v58  ;;  %v380_v15 = vsel %vm203_vm0, %v328_v57, 0.0  ;;  %v338_v57 = vmul.f32 %v1084_v30, %v1084_v30 }
  0x77   : > { %v363_v29 = vadd.f32 %v362_v20, %v361_v23  ;;  %v331_v20 = vmul.f32 %v1035_v61, %v1035_v61  ;;  %v382_v23 = vsel %vm203_vm0, %v329_v1, 0.0  ;;  %v400_v1 = vsel %vm203_vm0, %v338_v57, 0.0 }
  0x79   : > { %v365_v36 = vadd.f32 %v364_v24, %v363_v29  ;;  %v332_v24 = vmul.f32 %v1042_v4, %v1042_v4  ;;  %v384_v29 = vsel %vm203_vm0, %v330_v14, 0.0 }
  0x7b   : > { %v367_v42 = vadd.f32 %v366_v33, %v365_v36  ;;  %v333_v33 = vmul.f32 %v1049_v8, %v1049_v8  ;;  %v386_v36 = vsel %vm203_vm0, %v331_v20, 0.0 }
  0x7d   : > { %v369_v47 = vadd.f32 %v368_v41, %v367_v42  ;;  %v334_v41 = vmul.f32 %v1056_v12, %v1056_v12  ;;  %v388_v42 = vsel %vm203_vm0, %v332_v24, 0.0 }
  0x7f   : > { %v371_v51 = vadd.f32 %v370_v45, %v369_v47  ;;  %v335_v45 = vmul.f32 %v1063_v17, %v1063_v17  ;;  %v390_v47 = vsel %vm203_vm0, %v333_v33, 0.0  ;;  %v1102_v33 = vld [vmem:[%s1312_s1] ss:$0 sm:$0xff] }
  0x81   : > { %v373_v56 = vadd.f32 %v372_v50, %v371_v51  ;;  %v336_v50 = vmul.f32 %v1070_v21, %v1070_v21  ;;  %v392_v51 = vsel %vm203_vm0, %v334_v41, 0.0 }
  0x83   : > { %v375_v9 = vadd.f32 %v374_v54, %v373_v56  ;;  %v394_v54 = vsel %vm203_vm0, %v335_v45, 0.0 }
  0x85   : > { %v377_v11 = vadd.f32 %v376_v0, %v375_v9  ;;  %v396_v0 = vsel %vm203_vm0, %v336_v50, 0.0 }
  0x87   : > { %v379_v18 = vadd.f32 %v378_v3, %v377_v11 }
  0x89   : > { %v381_v13 = vadd.f32 %v380_v15, %v379_v18 }
  0x8b   : > { %v383_v32 = vadd.f32 %v382_v23, %v381_v13 }
  0x8d   : > { %v385_v38 = vadd.f32 %v384_v29, %v383_v32 }
  0x8f   : > { %v387_v44 = vadd.f32 %v386_v36, %v385_v38 }
  0x91   : > { %v389_v48 = vadd.f32 %v388_v42, %v387_v44  ;;  %v1115_v44 = vld [vmem:[%s1313_s2] ss:$0 sm:$0xff] }
  0x93   : > { %v391_v53 = vadd.f32 %v390_v47, %v389_v48 }
  0x95   : > { %v393_v56 = vadd.f32 %v392_v51, %v391_v53 }
  0x97   : > { %v395_v9 = vadd.f32 %v394_v54, %v393_v56 }
  0x99   : > { %v397_v59 = vadd.f32 %v396_v0, %v395_v9 }
  0x9b   : > { %v399_v3 = vadd.f32 %v398_v39, %v397_v59 }
  0x9d   : > { %v401_v11 = vadd.f32 %v400_v1, %v399_v3 }
  0x9f   : > { %v402_v14 = vrot.slane %v401_v11, 4 }
  0xa1   : > { %v403_v15 = vadd.f32 %v402_v14, %v401_v11 }
  0xa3   : > { %v404_v18 = vrot.slane %v403_v15, 2 }
  0xa5   : > { %v405_v20 = vadd.f32 %v404_v18, %v403_v15 }
  0xa7   : > { %v406_v23 = vrot.slane %v405_v20, 1 }
  0xa9   : > { %v407_v13 = vadd.f32 %v406_v23, %v405_v20 }
  0xab   : > { %v408_v24 = vmul.f32 0.00390625, %v407_v13 }
  0xad   : > { %v409_v29 = vadd.f32 1e-05, %v408_v24 }
  0xaf   : > { %663 = vrsqrt.f32 %v409_v29 }
  0xbc   : > { %v1097_v32 = vpop.eup %663 }
  0xbd   : > { %v411_v36 = vmul.f32 %v1097_v32, %v875_v60  ;;  %v412_v38 = vmul.f32 %v1097_v32, %v879_v62  ;;  %v413_v41 = vmul.f32 %v1097_v32, %v883_v63  ;;  %v414_v42 = vmul.f32 %v1097_v32, %v887_v5 }
  0xbe   : > { %v415_v45 = vmul.f32 %v1097_v32, %v891_v6  ;;  %v416_v60 = vmul.f32 %v1097_v32, %v901_v2  ;;  %v417_v62 = vmul.f32 %v1097_v32, %v907_v7  ;;  %v418_v63 = vmul.f32 %v1097_v32, %v916_v10 }
  0xbf   : > { %v450_v5 = vmul.f32 %v1102_v33, %v411_v36  ;;  %v451_v47 = vmul.f32 %v1102_v33, %v412_v38  ;;  %v452_v48 = vmul.f32 %v1102_v33, %v413_v41  ;;  %v453_v50 = vmul.f32 %v1102_v33, %v414_v42 }
  0xc0   : > { %v454_v6 = vmul.f32 %v1102_v33, %v415_v45  ;;  %v455_v51 = vmul.f32 %v1102_v33, %v416_v60  ;;  %v456_v2 = vmul.f32 %v1102_v33, %v417_v62  ;;  %v457_v53 = vmul.f32 %v1102_v33, %v418_v63 }
  0xc1   : > { %v489_v7 = vadd.f32 %v1115_v44, %v450_v5  ;;  %v490_v10 = vadd.f32 %v1115_v44, %v451_v47  ;;  %v491_v35 = vadd.f32 %v1115_v44, %v452_v48  ;;  %v492_v54 = vadd.f32 %v1115_v44, %v453_v50 }
  0xc2   : > { %v493_v56 = vadd.f32 %v1115_v44, %v454_v6  ;;  %v494_v57 = vadd.f32 %v1115_v44, %v455_v51  ;;  %v495_v0 = vadd.f32 %v1115_v44, %v456_v2  ;;  %v496_v9 = vadd.f32 %v1115_v44, %v457_v53 }
  0xc3   : > { %v521_v39 = vmax.f32 %v489_v7, 0.0  ;;  %v522_v59 = vmax.f32 %v490_v10, 0.0  ;;  %v523_v1 = vmax.f32 %v491_v35, 0.0  ;;  %v524_v3 = vmax.f32 %v492_v54, 0.0 }
  0xc4   : > { %v525_v11 = vmax.f32 %v493_v56, 0.0  ;;  %v526_v14 = vmax.f32 %v494_v57, 0.0  ;;  %v527_v15 = vmax.f32 %v495_v0, 0.0  ;;  %v528_v18 = vmax.f32 %v496_v9, 0.0 }
  0xc5   : > { %553 = vst.msk [vmem:[%s1142_s24] sm:$0xff] %vm203_vm0, %v521_v39  ;;  %554 = vst.msk [vmem:[%s1142_s24 + $0x8] sm:$0xff] %vm203_vm0, %v522_v59  ;;  %v419_v20 = vmul.f32 %v1097_v32, %v923_v27  ;;  %v420_v23 = vmul.f32 %v1097_v32, %v930_v16  ;;  %v421_v13 = vmul.f32 %v1097_v32, %v937_v19 }
  0xc6   : > { %555 = vst.msk [vmem:[%s1142_s24 + $0x10] sm:$0xff] %vm203_vm0, %v523_v1  ;;  %556 = vst.msk [vmem:[%s1142_s24 + $0x18] sm:$0xff] %vm203_vm0, %v524_v3  ;;  %v422_v24 = vmul.f32 %v1097_v32, %v944_v22  ;;  %v423_v27 = vmul.f32 %v1097_v32, %v951_v25  ;;  %v424_v16 = vmul.f32 %v1097_v32, %v958_v28 }
  0xc7   : > { %557 = vst.msk [vmem:[%s1142_s24 + $0x20] sm:$0xff] %vm203_vm0, %v525_v11  ;;  %558 = vst.msk [vmem:[%s1142_s24 + $0x28] sm:$0xff] %vm203_vm0, %v526_v14  ;;  %v425_v19 = vmul.f32 %v1097_v32, %v965_v31  ;;  %v426_v22 = vmul.f32 %v1097_v32, %v972_v34  ;;  %v458_v29 = vmul.f32 %v1102_v33, %v419_v20 }
  0xc8   : > { %559 = vst.msk [vmem:[%s1142_s24 + $0x30] sm:$0xff] %vm203_vm0, %v527_v15  ;;  %560 = vst.msk [vmem:[%s1142_s24 + $0x38] sm:$0xff] %vm203_vm0, %v528_v18  ;;  %v459_v36 = vmul.f32 %v1102_v33, %v420_v23  ;;  %v460_v38 = vmul.f32 %v1102_v33, %v421_v13  ;;  %v461_v41 = vmul.f32 %v1102_v33, %v422_v24 }
  0xc9   : > { %v462_v42 = vmul.f32 %v1102_v33, %v423_v27  ;;  %v463_v25 = vmul.f32 %v1102_v33, %v424_v16  ;;  %v464_v28 = vmul.f32 %v1102_v33, %v425_v19  ;;  %v465_v45 = vmul.f32 %v1102_v33, %v426_v22 }
  0xca   : > { %v497_v31 = vadd.f32 %v1115_v44, %v458_v29  ;;  %v498_v34 = vadd.f32 %v1115_v44, %v459_v36  ;;  %v499_v60 = vadd.f32 %v1115_v44, %v460_v38  ;;  %v500_v62 = vadd.f32 %v1115_v44, %v461_v41 }
  0xcb   : > { %v501_v63 = vadd.f32 %v1115_v44, %v462_v42  ;;  %v502_v5 = vadd.f32 %v1115_v44, %v463_v25  ;;  %v503_v47 = vadd.f32 %v1115_v44, %v464_v28  ;;  %v504_v48 = vadd.f32 %v1115_v44, %v465_v45 }
  0xcc   : > { %v529_v50 = vmax.f32 %v497_v31, 0.0  ;;  %v530_v6 = vmax.f32 %v498_v34, 0.0  ;;  %v531_v51 = vmax.f32 %v499_v60, 0.0  ;;  %v532_v2 = vmax.f32 %v500_v62, 0.0 }
  0xcd   : > { %v533_v53 = vmax.f32 %v501_v63, 0.0  ;;  %v534_v7 = vmax.f32 %v502_v5, 0.0  ;;  %v535_v10 = vmax.f32 %v503_v47, 0.0  ;;  %v536_v35 = vmax.f32 %v504_v48, 0.0 }
  0xce   : > { %561 = vst.msk [vmem:[%s1142_s24 + $0x40] sm:$0xff] %vm203_vm0, %v529_v50  ;;  %562 = vst.msk [vmem:[%s1142_s24 + $0x48] sm:$0xff] %vm203_vm0, %v530_v6  ;;  %v427_v54 = vmul.f32 %v1097_v32, %v979_v37  ;;  %v428_v56 = vmul.f32 %v1097_v32, %v986_v40  ;;  %v429_v57 = vmul.f32 %v1097_v32, %v993_v43 }
  0xcf   : > { %563 = vst.msk [vmem:[%s1142_s24 + $0x50] sm:$0xff] %vm203_vm0, %v531_v51  ;;  %564 = vst.msk [vmem:[%s1142_s24 + $0x58] sm:$0xff] %vm203_vm0, %v532_v2  ;;  %v430_v0 = vmul.f32 %v1097_v32, %v1000_v46  ;;  %v431_v37 = vmul.f32 %v1097_v32, %v1007_v49  ;;  %v432_v40 = vmul.f32 %v1097_v32, %v1014_v52 }
  0xd0   : > { %565 = vst.msk [vmem:[%s1142_s24 + $0x60] sm:$0xff] %vm203_vm0, %v533_v53  ;;  %566 = vst.msk [vmem:[%s1142_s24 + $0x68] sm:$0xff] %vm203_vm0, %v534_v7  ;;  %v433_v43 = vmul.f32 %v1097_v32, %v1021_v55  ;;  %v434_v46 = vmul.f32 %v1097_v32, %v1028_v58  ;;  %v466_v9 = vmul.f32 %v1102_v33, %v427_v54 }
  0xd1   : > { %567 = vst.msk [vmem:[%s1142_s24 + $0x70] sm:$0xff] %vm203_vm0, %v535_v10  ;;  %568 = vst.msk [vmem:[%s1142_s24 + $0x78] sm:$0xff] %vm203_vm0, %v536_v35  ;;  %v467_v39 = vmul.f32 %v1102_v33, %v428_v56  ;;  %v468_v59 = vmul.f32 %v1102_v33, %v429_v57  ;;  %v469_v1 = vmul.f32 %v1102_v33, %v430_v0 }
  0xd2   : > { %v470_v3 = vmul.f32 %v1102_v33, %v431_v37  ;;  %v471_v49 = vmul.f32 %v1102_v33, %v432_v40  ;;  %v472_v52 = vmul.f32 %v1102_v33, %v433_v43  ;;  %v473_v11 = vmul.f32 %v1102_v33, %v434_v46 }
  0xd3   : > { %v505_v55 = vadd.f32 %v1115_v44, %v466_v9  ;;  %v506_v58 = vadd.f32 %v1115_v44, %v467_v39  ;;  %v507_v14 = vadd.f32 %v1115_v44, %v468_v59  ;;  %v508_v15 = vadd.f32 %v1115_v44, %v469_v1 }
  0xd4   : > { %v509_v18 = vadd.f32 %v1115_v44, %v470_v3  ;;  %v510_v20 = vadd.f32 %v1115_v44, %v471_v49  ;;  %v511_v23 = vadd.f32 %v1115_v44, %v472_v52  ;;  %v512_v13 = vadd.f32 %v1115_v44, %v473_v11 }
  0xd5   : > { %v537_v24 = vmax.f32 %v505_v55, 0.0  ;;  %v538_v27 = vmax.f32 %v506_v58, 0.0  ;;  %v539_v16 = vmax.f32 %v507_v14, 0.0  ;;  %v540_v19 = vmax.f32 %v508_v15, 0.0 }
  0xd6   : > { %v541_v22 = vmax.f32 %v509_v18, 0.0  ;;  %v542_v29 = vmax.f32 %v510_v20, 0.0  ;;  %v543_v36 = vmax.f32 %v511_v23, 0.0  ;;  %v544_v38 = vmax.f32 %v512_v13, 0.0 }
  0xd7   : > { %569 = vst.msk [vmem:[%s1142_s24 + $0x80] sm:$0xff] %vm203_vm0, %v537_v24  ;;  %570 = vst.msk [vmem:[%s1142_s24 + $0x88] sm:$0xff] %vm203_vm0, %v538_v27  ;;  %v435_v41 = vmul.f32 %v1097_v32, %v1035_v61  ;;  %v436_v42 = vmul.f32 %v1097_v32, %v1042_v4  ;;  %v437_v25 = vmul.f32 %v1097_v32, %v1049_v8 }
  0xd8   : > { %571 = vst.msk [vmem:[%s1142_s24 + $0x90] sm:$0xff] %vm203_vm0, %v539_v16  ;;  %572 = vst.msk [vmem:[%s1142_s24 + $0x98] sm:$0xff] %vm203_vm0, %v540_v19  ;;  %v438_v28 = vmul.f32 %v1097_v32, %v1056_v12  ;;  %v439_v61 = vmul.f32 %v1097_v32, %v1063_v17  ;;  %v440_v4 = vmul.f32 %v1097_v32, %v1070_v21 }
  0xd9   : > { %573 = vst.msk [vmem:[%s1142_s24 + $0xa0] sm:$0xff] %vm203_vm0, %v541_v22  ;;  %574 = vst.msk [vmem:[%s1142_s24 + $0xa8] sm:$0xff] %vm203_vm0, %v542_v29  ;;  %v441_v8 = vmul.f32 %v1097_v32, %v1077_v26  ;;  %v442_v12 = vmul.f32 %v1097_v32, %v1084_v30  ;;  %v474_v45 = vmul.f32 %v1102_v33, %v435_v41 }
  0xda   : > { %575 = vst.msk [vmem:[%s1142_s24 + $0xb0] sm:$0xff] %vm203_vm0, %v543_v36  ;;  %576 = vst.msk [vmem:[%s1142_s24 + $0xb8] sm:$0xff] %vm203_vm0, %v544_v38  ;;  %v475_v31 = vmul.f32 %v1102_v33, %v436_v42  ;;  %v476_v34 = vmul.f32 %v1102_v33, %v437_v25  ;;  %v477_v60 = vmul.f32 %v1102_v33, %v438_v28 }
  0xdb   : > { %v478_v62 = vmul.f32 %v1102_v33, %v439_v61  ;;  %v479_v17 = vmul.f32 %v1102_v33, %v440_v4  ;;  %v480_v21 = vmul.f32 %v1102_v33, %v441_v8  ;;  %v481_v63 = vmul.f32 %v1102_v33, %v442_v12 }
  0xdc   : > { %v513_v26 = vadd.f32 %v1115_v44, %v474_v45  ;;  %v514_v30 = vadd.f32 %v1115_v44, %v475_v31  ;;  %v515_v32 = vadd.f32 %v1115_v44, %v476_v34  ;;  %v516_v5 = vadd.f32 %v1115_v44, %v477_v60 }
  0xdd   : > { %v517_v47 = vadd.f32 %v1115_v44, %v478_v62  ;;  %v518_v48 = vadd.f32 %v1115_v44, %v479_v17  ;;  %v519_v33 = vadd.f32 %v1115_v44, %v480_v21  ;;  %v520_v50 = vadd.f32 %v1115_v44, %v481_v63 }
  0xde   : > { %v545_v6 = vmax.f32 %v513_v26, 0.0  ;;  %v546_v51 = vmax.f32 %v514_v30, 0.0  ;;  %v547_v2 = vmax.f32 %v515_v32, 0.0  ;;  %v548_v53 = vmax.f32 %v516_v5, 0.0 }
  0xdf   : > { %v549_v7 = vmax.f32 %v517_v47, 0.0  ;;  %v550_v10 = vmax.f32 %v518_v48, 0.0  ;;  %v551_v35 = vmax.f32 %v519_v33, 0.0  ;;  %v552_v54 = vmax.f32 %v520_v50, 0.0 }
  0xe0   : > { %577 = vst.msk [vmem:[%s1142_s24 + $0xc0] sm:$0xff] %vm203_vm0, %v545_v6  ;;  %578 = vst.msk [vmem:[%s1142_s24 + $0xc8] sm:$0xff] %vm203_vm0, %v546_v51 }
  0xe1   : > { %579 = vst.msk [vmem:[%s1142_s24 + $0xd0] sm:$0xff] %vm203_vm0, %v547_v2  ;;  %580 = vst.msk [vmem:[%s1142_s24 + $0xd8] sm:$0xff] %vm203_vm0, %v548_v53 }
  0xe2   : > { %581 = vst.msk [vmem:[%s1142_s24 + $0xe0] sm:$0xff] %vm203_vm0, %v549_v7  ;;  %582 = vst.msk [vmem:[%s1142_s24 + $0xe8] sm:$0xff] %vm203_vm0, %v550_v10 }
  0xe3   : > { %583 = vst.msk [vmem:[%s1142_s24 + $0xf0] sm:$0xff] %vm203_vm0, %v551_v35  ;;  %584 = vst.msk [vmem:[%s1142_s24 + $0xf8] sm:$0xff] %vm203_vm0, %v552_v54 }
  0xe4 PF: > { %s13_s12 = sadd.s32 1, %s671_s12  }
  0xe5   : > { %p10_p4 = scmp.ge.s32.totalorder %s13_s12, 4  }
  0xe7   :  { %12 = sbr.rel (!%p10_p4) target bundleno = 1 (0x1), region = 62 }

// kernel: _lambda_.8
= control target key start
LH: loop header
LB: loop body
LE: loop exit
PB: predicated region body
PF: predicated region fallthrough
CT: control target
= control target key end

     0   :  { %vm77_vm0 = vcmask 1043456   ;;  %vm28_vm1 = vcmask 31744   ;;  %vm1172_vm2 = vcmask 64512   ;;  %s1960_s1 = inlined_call_operand.vmem [shape: f32[4,8], index: 1, kind: input, shape index: {}]   ;;  %s1961_s0 = inlined_call_operand.vmem [shape: f32[128,4], index: 0, kind: input, shape index: {}]   ;;  %s1962_s2 = inlined_call_operand.vmem [shape: f32[128,8], index: 2, kind: output, shape index: {}]  }
   0x1   :  { %v27_v0 = vld [vmem:[%s1960_s1] sm:$0xf]  ;;  %v12_v2 = vld [vmem:[%s1961_s0 + $0x8] sm:$0xff]  ;;  %v13_v6 = vld [vmem:[%s1961_s0 + $0x10] sm:$0xff] }
   0x2   :  { %v11_v1 = vld [vmem:[%s1961_s0] sm:$0xff]  ;;  %v79_v3 = vsel %vm77_vm0, %v27_v0, 0  ;;  %v33_v5 = vsel %vm28_vm1, %v12_v2, 0  ;;  %v14_v7 = vld [vmem:[%s1961_s0 + $0x18] sm:$0xff]  ;;  %v36_v12 = vsel %vm28_vm1, %v13_v6, 0  ;;  %v16_v13 = vld [vmem:[%s1961_s0 + $0x28] sm:$0xff] }
   0x3   :  { %v30_v4 = vsel %vm28_vm1, %v11_v1, 0  ;;  %v15_v8 = vld [vmem:[%s1961_s0 + $0x20] sm:$0xff]  ;;  %v1486_v9 = vand.u32 4294901760, %v79_v3  ;;  %v1490_v11 = vand.u32 4294901760, %v33_v5  ;;  %v17_v14 = vld [vmem:[%s1961_s0 + $0x30] sm:$0xff]  ;;  %v1499_v15 = vand.u32 4294901760, %v36_v12 }
   0x4   :  { %v1488_v10 = vand.u32 4294901760, %v30_v4  ;;  %v39_v16 = vsel %vm28_vm1, %v14_v7, 0  ;;  %v42_v17 = vsel %vm28_vm1, %v15_v8, 0  ;;  %v45_v18 = vsel %vm28_vm1, %v16_v13, 0  ;;  %v18_v43 = vld [vmem:[%s1961_s0 + $0x38] sm:$0xff]  ;;  %v19_v44 = vld [vmem:[%s1961_s0 + $0x40] sm:$0xff] }
   0x5   :  { %1295 = vmatprep.subr.mxu0 %v1486_v9  ;;  %v339_v20 = vsub.f32 %v79_v3, %v1486_v9  ;;  %v1510_v21 = vsub.f32 %v33_v5, %v1490_v11  ;;  %v1513_v22 = vand.u32 4294901760, %v39_v16  ;;  %v1517_v23 = vsub.f32 %v36_v12, %v1499_v15  ;;  %v20_v45 = vld [vmem:[%s1961_s0 + $0x48] sm:$0xff]  ;;  %v21_v54 = vld [vmem:[%s1961_s0 + $0x50] sm:$0xff]  ;;  %v22_v55 = vld [vmem:[%s1961_s0 + $0x58] sm:$0xff] }
   0x6   :  { %v1506_v19 = vsub.f32 %v30_v4, %v1488_v10  ;;  %1323 = vmatprep.mubr.f32.mxu1 %v1488_v10  ;;  %1296 = vmatpush3.msra.mxu0 %v1486_v9  ;;  %v1519_v24 = vand.u32 4294901760, %v42_v17  ;;  %v1521_v25 = vand.u32 4294901760, %v45_v18  ;;  %v48_v26 = vsel %vm28_vm1, %v17_v14, 0  ;;  %v23_v0 = vld [vmem:[%s1961_s0 + $0x60] sm:$0xff]  ;;  %v24_v1 = vld [vmem:[%s1961_s0 + $0x68] sm:$0xff]  ;;  %v25_v13 = vld [vmem:[%s1961_s0 + $0x70] sm:$0xff] }
   0x7   :  { %v1525_v28 = vand.u32 4294901760, %v339_v20  ;;  %1347 = vmatprep.subr.mxu0 %v339_v20  ;;  %v159_v29 = vand.u32 4294901760, %v1510_v21  ;;  %v1529_v30 = vsub.f32 %v39_v16, %v1513_v22  ;;  %v169_v31 = vand.u32 4294901760, %v1517_v23 }
   0x8   :  { %v149_v27 = vand.u32 4294901760, %v1506_v19  ;;  %v1533_v32 = vsub.f32 %v42_v17, %v1519_v24  ;;  %v1536_v33 = vsub.f32 %v45_v18, %v1521_v25  ;;  %v1538_v34 = vand.u32 4294901760, %v48_v26 }
   0x9   :  { %v341_v36 = vsub.f32 %v339_v20, %v1525_v28  ;;  %v160_v37 = vsub.f32 %v1510_v21, %v159_v29  ;;  %v179_v38 = vand.u32 4294901760, %v1529_v30  ;;  %v170_v39 = vsub.f32 %v1517_v23, %v169_v31 }
   0xa   :  { %v150_v35 = vsub.f32 %v1506_v19, %v149_v27  ;;  %v189_v40 = vand.u32 4294901760, %v1533_v32  ;;  %v199_v41 = vand.u32 4294901760, %v1536_v33  ;;  %v1554_v42 = vsub.f32 %v48_v26, %v1538_v34 }
   0xb   :  { %v342_v47 = vand.u32 4294901760, %v341_v36  ;;  %v161_v48 = vand.u32 4294901760, %v160_v37  ;;  %v180_v49 = vsub.f32 %v1529_v30, %v179_v38  ;;  %v171_v50 = vand.u32 4294901760, %v170_v39 }
   0xc   :  { %v151_v46 = vand.u32 4294901760, %v150_v35  ;;  %v190_v51 = vsub.f32 %v1533_v32, %v189_v40  ;;  %v200_v52 = vsub.f32 %v1536_v33, %v199_v41  ;;  %v209_v53 = vand.u32 4294901760, %v1554_v42 }
   0xd   :  { %1321 = vmatprep.subr.mxu1 %v342_v47  ;;  %v181_v56 = vand.u32 4294901760, %v180_v49  ;;  %v51_v57 = vsel %vm28_vm1, %v18_v43, 0  ;;  %v54_v58 = vsel %vm28_vm1, %v19_v44, 0  ;;  %v57_v59 = vsel %vm28_vm1, %v20_v45, 0 }
   0xe   :  { %1297 = vmatprep.mubr.f32.mxu0 %v151_v46  ;;  %1322 = vmatpush3.msra.mxu1 %v342_v47  ;;  %v191_v60 = vand.u32 4294901760, %v190_v51  ;;  %v201_v61 = vand.u32 4294901760, %v200_v52  ;;  %v210_v62 = vsub.f32 %v1554_v42, %v209_v53  ;;  %v1587_v63 = vand.u32 4294901760, %v51_v57 }
   0xf   :  { %1298 = vmatmul.mubr.f32.vlgmr.msra.gmra.mxu0 %v161_v48  ;;  %1324 = vmatmul.mubr.f32.vlgmr.msra.gmra.mxu1 %v1490_v11  ;;  %v1596_v2 = vand.u32 4294901760, %v54_v58  ;;  %v1598_v3 = vand.u32 4294901760, %v57_v59  ;;  %v60_v4 = vsel %vm28_vm1, %v21_v54, 0  ;;  %v63_v5 = vsel %vm28_vm1, %v22_v55, 0 }
  0x10   :  { %1348 = vmatpush3.msra.mxu0 %v339_v20  ;;  %1373 = vmatprep.subr.mxu1 %v1486_v9  ;;  %v211_v6 = vand.u32 4294901760, %v210_v62  ;;  %v1604_v7 = vsub.f32 %v51_v57, %v1587_v63  ;;  %v1606_v8 = vand.u32 4294901760, %v60_v4  ;;  %v1608_v12 = vand.u32 4294901760, %v63_v5 }
  0x11   :  { %1300 = vmatprep.mubr.f32.mxu0 %v171_v50  ;;  %1374 = vmatpush3.msra.mxu1 %v1486_v9  ;;  %v1616_v14 = vsub.f32 %v54_v58, %v1596_v2  ;;  %v1619_v16 = vsub.f32 %v57_v59, %v1598_v3  ;;  %v66_v17 = vsel %vm28_vm1, %v23_v0, 0  ;;  %v69_v18 = vsel %vm28_vm1, %v24_v1, 0  ;;  %v26_v50 = vld [vmem:[%s1961_s0 + $0x78] sm:$0xff] }
  0x12   :  { %1326 = vmatprep.mubr.f32.mxu1 %v1499_v15  ;;  %v219_v20 = vand.u32 4294901760, %v1604_v7  ;;  %v1625_v26 = vsub.f32 %v60_v4, %v1606_v8  ;;  %v1628_v35 = vsub.f32 %v63_v5, %v1608_v12  ;;  %v1630_v36 = vand.u32 4294901760, %v66_v17  ;;  %1399 = vmatprep.subr.mxu0 %v1525_v28 }
  0x13   :  { %1301 = vmatmul.mubr.f32.gmra.mxu0 %v181_v56  ;;  %1327 = vmatmul.mubr.f32.gmra.mxu1 %v1513_v22  ;;  %v229_v37 = vand.u32 4294901760, %v1616_v14  ;;  %v239_v39 = vand.u32 4294901760, %v1619_v16  ;;  %v1636_v43 = vand.u32 4294901760, %v69_v18  ;;  %v72_v44 = vsel %vm28_vm1, %v25_v13, 0 }
  0x14   :  { %1303 = vmatprep.mubr.f32.mxu0 %v191_v60  ;;  %1329 = vmatprep.mubr.f32.mxu1 %v1519_v24  ;;  %v220_v45 = vsub.f32 %v1604_v7, %v219_v20  ;;  %v249_v46 = vand.u32 4294901760, %v1625_v26  ;;  %v1645_v47 = vsub.f32 %v66_v17, %v1630_v36  ;;  %v1651_v49 = vand.u32 4294901760, %v72_v44 }
  0x15   :  { %1425 = vmatprep.subr.mxu1 %v1486_v9  ;;  %v230_v48 = vsub.f32 %v1616_v14, %v229_v37  ;;  %v240_v52 = vsub.f32 %v1619_v16, %v239_v39  ;;  %v259_v54 = vand.u32 4294901760, %v1628_v35  ;;  %v1661_v55 = vsub.f32 %v69_v18, %v1636_v43 }
  0x16   :  { %v221_v51 = vand.u32 4294901760, %v220_v45  ;;  %v250_v57 = vsub.f32 %v1625_v26, %v249_v46  ;;  %v269_v58 = vand.u32 4294901760, %v1645_v47  ;;  %v1669_v59 = vsub.f32 %v72_v44, %v1651_v49 }
  0x17   :  { %1304 = vmatmul.mubr.f32.gmra.mxu0 %v201_v61  ;;  %1330 = vmatmul.mubr.f32.gmra.mxu1 %v1521_v25  ;;  %v231_v56 = vand.u32 4294901760, %v230_v48  ;;  %v75_v60 = vsel %vm28_vm1, %v26_v50, 0  ;;  %v241_v62 = vand.u32 4294901760, %v240_v52  ;;  %v260_v0 = vsub.f32 %v1628_v35, %v259_v54 }
  0x18   :  { %1306 = vmatprep.mubr.f32.mxu0 %v211_v6  ;;  %1332 = vmatprep.mubr.f32.mxu1 %v1538_v34  ;;  %v1673_v61 = vand.u32 4294901760, %v75_v60  ;;  %v279_v1 = vand.u32 4294901760, %v1661_v55  ;;  %v251_v4 = vand.u32 4294901760, %v250_v57  ;;  %v270_v5 = vsub.f32 %v1645_v47, %v269_v58 }
  0x19   :  { %v289_v6 = vand.u32 4294901760, %v1669_v59  ;;  %v261_v17 = vand.u32 4294901760, %v260_v0 }
  0x1a   :  { %v298_v13 = vsub.f32 %v75_v60, %v1673_v61  ;;  %v280_v18 = vsub.f32 %v1661_v55, %v279_v1  ;;  %v271_v45 = vand.u32 4294901760, %v270_v5 }
  0x1b   :  { %1307 = vmatmul.mubr.f32.gmra.mxu0 %v221_v51  ;;  %1333 = vmatmul.mubr.f32.gmra.mxu1 %v1587_v63  ;;  %v290_v48 = vsub.f32 %v1669_v59, %v289_v6 }
  0x1c   :  { %1309 = vmatprep.mubr.f32.mxu0 %v231_v56  ;;  %1335 = vmatprep.mubr.f32.mxu1 %v1596_v2  ;;  %v299_v44 = vand.u32 4294901760, %v298_v13  ;;  %v281_v50 = vand.u32 4294901760, %v280_v18 }
  0x1d   :  { %v291_v52 = vand.u32 4294901760, %v290_v48 }
  0x1e   :  { %v300_v51 = vsub.f32 %v298_v13, %v299_v44 }
  0x1f   :  { %1310 = vmatmul.mubr.f32.gmra.mxu0 %v241_v62  ;;  %1336 = vmatmul.mubr.f32.gmra.mxu1 %v1598_v3 }
  0x20   :  { %1312 = vmatprep.mubr.f32.mxu0 %v251_v4  ;;  %1338 = vmatprep.mubr.f32.mxu1 %v1606_v8  ;;  %v301_v56 = vand.u32 4294901760, %v300_v51 }
  0x23   :  { %1313 = vmatmul.mubr.f32.gmra.mxu0 %v261_v17  ;;  %1339 = vmatmul.mubr.f32.gmra.mxu1 %v1608_v12 }
  0x24   :  { %1315 = vmatprep.mubr.f32.mxu0 %v271_v45  ;;  %1341 = vmatprep.mubr.f32.mxu1 %v1630_v36 }
  0x27   :  { %1316 = vmatmul.mubr.f32.gmra.mxu0 %v281_v50  ;;  %1342 = vmatmul.mubr.f32.gmra.mxu1 %v1636_v43 }
  0x28   :  { %1318 = vmatprep.mubr.f32.mxu0 %v291_v52  ;;  %1344 = vmatprep.mubr.f32.mxu1 %v1651_v49 }
  0x2b   :  { %1319 = vmatmul.mubr.f32.gmra.mxu0 %v301_v56  ;;  %1345 = vmatmul.mubr.f32.gmra.mxu1 %v1673_v61 }
  0x2c   :  { %1349 = vmatprep.mubr.f32.mxu0 %v1506_v19  ;;  %1375 = vmatprep.mubr.f32.mxu1 %v149_v27 }
  0x2f   :  { %1350 = vmatmul.mubr.f32.vlgmr.msra.gmra.mxu0 %v1510_v21  ;;  %1376 = vmatmul.mubr.f32.vlgmr.msra.gmra.mxu1 %v159_v29 }
  0x30   :  { %1400 = vmatpush3.msra.mxu0 %v1525_v28  ;;  %1426 = vmatpush3.msra.mxu1 %v1486_v9 }
  0x31   :  { %1352 = vmatprep.mubr.f32.mxu0 %v1517_v23  ;;  %1378 = vmatprep.mubr.f32.mxu1 %v169_v31 }
  0x33   :  { %1353 = vmatmul.mubr.f32.gmra.mxu0 %v1529_v30  ;;  %1379 = vmatmul.mubr.f32.gmra.mxu1 %v179_v38 }
  0x34   :  { %1355 = vmatprep.mubr.f32.mxu0 %v1533_v32  ;;  %1381 = vmatprep.mubr.f32.mxu1 %v189_v40 }
  0x37   :  { %1356 = vmatmul.mubr.f32.gmra.mxu0 %v1536_v33  ;;  %1382 = vmatmul.mubr.f32.gmra.mxu1 %v199_v41 }
  0x38   :  { %1358 = vmatprep.mubr.f32.mxu0 %v1554_v42  ;;  %1384 = vmatprep.mubr.f32.mxu1 %v209_v53 }
  0x3b   :  { %1359 = vmatmul.mubr.f32.gmra.mxu0 %v1604_v7  ;;  %1385 = vmatmul.mubr.f32.gmra.mxu1 %v219_v20 }
  0x3c   :  { %1361 = vmatprep.mubr.f32.mxu0 %v1616_v14  ;;  %1387 = vmatprep.mubr.f32.mxu1 %v229_v37 }
  0x3f   :  { %1362 = vmatmul.mubr.f32.gmra.mxu0 %v1619_v16  ;;  %1388 = vmatmul.mubr.f32.gmra.mxu1 %v239_v39 }
  0x40   :  { %1364 = vmatprep.mubr.f32.mxu0 %v1625_v26  ;;  %1390 = vmatprep.mubr.f32.mxu1 %v249_v46 }
  0x43   :  { %1365 = vmatmul.mubr.f32.gmra.mxu0 %v1628_v35  ;;  %1391 = vmatmul.mubr.f32.gmra.mxu1 %v259_v54 }
  0x44   :  { %1367 = vmatprep.mubr.f32.mxu0 %v1645_v47  ;;  %1393 = vmatprep.mubr.f32.mxu1 %v269_v58 }
  0x47   :  { %1368 = vmatmul.mubr.f32.gmra.mxu0 %v1661_v55  ;;  %1394 = vmatmul.mubr.f32.gmra.mxu1 %v279_v1 }
  0x48   :  { %1370 = vmatprep.mubr.f32.mxu0 %v1669_v59  ;;  %1396 = vmatprep.mubr.f32.mxu1 %v289_v6 }
  0x4b   :  { %1371 = vmatmul.mubr.f32.gmra.mxu0 %v298_v13  ;;  %1397 = vmatmul.mubr.f32.gmra.mxu1 %v299_v44 }
  0x4c   :  { %1401 = vmatprep.mubr.f32.mxu0 %v1488_v10  ;;  %1427 = vmatprep.mubr.f32.mxu1 %v1488_v10 }
  0x4f   :  { %1402 = vmatmul.mubr.f32.vlgmr.msra.gmra.mxu0 %v1490_v11  ;;  %1428 = vmatmul.mubr.f32.vlgmr.msra.gmra.mxu1 %v1490_v11 }
  0x50   :  { %1404 = vmatprep.mubr.f32.mxu0 %v1499_v15  ;;  %1430 = vmatprep.mubr.f32.mxu1 %v1499_v15 }
  0x53   :  { %1405 = vmatmul.mubr.f32.gmra.mxu0 %v1513_v22  ;;  %1431 = vmatmul.mubr.f32.gmra.mxu1 %v1513_v22 }
  0x54   :  { %1407 = vmatprep.mubr.f32.mxu0 %v1519_v24  ;;  %1433 = vmatprep.mubr.f32.mxu1 %v1519_v24 }
  0x57   :  { %1408 = vmatmul.mubr.f32.gmra.mxu0 %v1521_v25  ;;  %1434 = vmatmul.mubr.f32.gmra.mxu1 %v1521_v25 }
  0x58   :  { %1410 = vmatprep.mubr.f32.mxu0 %v1538_v34  ;;  %1436 = vmatprep.mubr.f32.mxu1 %v1538_v34 }
  0x5b   :  { %1411 = vmatmul.mubr.f32.gmra.mxu0 %v1587_v63  ;;  %1437 = vmatmul.mubr.f32.gmra.mxu1 %v1587_v63 }
  0x5c   :  { %1413 = vmatprep.mubr.f32.mxu0 %v1596_v2  ;;  %1439 = vmatprep.mubr.f32.mxu1 %v1596_v2 }
  0x5f   :  { %1414 = vmatmul.mubr.f32.gmra.mxu0 %v1598_v3  ;;  %1440 = vmatmul.mubr.f32.gmra.mxu1 %v1598_v3 }
  0x60   :  { %1416 = vmatprep.mubr.f32.mxu0 %v1606_v8  ;;  %1442 = vmatprep.mubr.f32.mxu1 %v1606_v8 }
  0x63   :  { %1417 = vmatmul.mubr.f32.gmra.mxu0 %v1608_v12  ;;  %1443 = vmatmul.mubr.f32.gmra.mxu1 %v1608_v12 }
  0x64   :  { %1419 = vmatprep.mubr.f32.mxu0 %v1630_v36  ;;  %1445 = vmatprep.mubr.f32.mxu1 %v1630_v36 }
  0x67   :  { %1420 = vmatmul.mubr.f32.gmra.mxu0 %v1636_v43  ;;  %1446 = vmatmul.mubr.f32.gmra.mxu1 %v1636_v43 }
  0x68   :  { %1422 = vmatprep.mubr.f32.mxu0 %v1651_v49  ;;  %1448 = vmatprep.mubr.f32.mxu1 %v1651_v49 }
  0x6b   :  { %1423 = vmatmul.mubr.f32.gmra.mxu0 %v1673_v61  ;;  %1449 = vmatmul.mubr.f32.gmra.mxu1 %v1673_v61 }
  0xcf   :  { %v1299_v9 = vpop.f32.mrf.mxu0  ;;  %v1325_v10 = vpop.f32.mrf.mxu1 }
  0xd0   :  { %v386_v44 = vadd.f32 %v1325_v10, %v1299_v9 }
  0xd1   :  { %v153_v11 = vpop.f32.mrf.mxu0  ;;  %v379_v15 = vpop.f32.mrf.mxu1 }
  0xd2   :  { %v380_v50 = vadd.f32 %v379_v15, %v153_v11 }
  0xd3   :  { %v1302_v19 = vpop.f32.mrf.mxu0  ;;  %v1328_v21 = vpop.f32.mrf.mxu1 }
  0xd5   :  { %v173_v22 = vpop.f32.mrf.mxu0  ;;  %v391_v23 = vpop.f32.mrf.mxu1 }
  0xd7   :  { %v1770_v24 = vpop.f32.mrf.mxu0  ;;  %v1772_v25 = vpop.f32.mrf.mxu1 }
  0xd8   :  { %v410_v11 = vadd.f32 %v1772_v25, %v1770_v24 }
  0xd9   :  { %v1774_v27 = vpop.f32.mrf.mxu0  ;;  %v1776_v28 = vpop.f32.mrf.mxu1 }
  0xdb   :  { %v1778_v29 = vpop.f32.mrf.mxu0  ;;  %v1780_v30 = vpop.f32.mrf.mxu1 }
  0xdd   :  { %v1782_v31 = vpop.f32.mrf.mxu0  ;;  %v1784_v32 = vpop.f32.mrf.mxu1 }
  0xdf   :  { %v1786_v33 = vpop.f32.mrf.mxu0  ;;  %v1788_v34 = vpop.f32.mrf.mxu1 }
  0xe1   :  { %v1790_v38 = vpop.f32.mrf.mxu0  ;;  %v1792_v40 = vpop.f32.mrf.mxu1 }
  0xe3   :  { %v1794_v41 = vpop.f32.mrf.mxu0  ;;  %v1796_v42 = vpop.f32.mrf.mxu1 }
  0xe5   :  { %v1798_v53 = vpop.f32.mrf.mxu0  ;;  %v1800_v63 = vpop.f32.mrf.mxu1 }
  0xe7   :  { %v1802_v2 = vpop.f32.mrf.mxu0  ;;  %v1804_v3 = vpop.f32.mrf.mxu1 }
  0xe9   :  { %v1806_v7 = vpop.f32.mrf.mxu0  ;;  %v1808_v8 = vpop.f32.mrf.mxu1 }
  0xeb   :  { %v1810_v12 = vpop.f32.mrf.mxu0  ;;  %v1812_v14 = vpop.f32.mrf.mxu1 }
  0xec   :  { %1963 = vst [vmem:[#allocation2_spill] sm:$0xff] %v1810_v12  ;;  %1964 = vst [vmem:[#allocation3_spill] sm:$0xff] %v1812_v14 }
  0xed   :  { %v1814_v16 = vpop.f32.mrf.mxu0  ;;  %v1816_v20 = vpop.f32.mrf.mxu1 }
  0xee   :  { %1965 = vst [vmem:[#allocation4_spill] sm:$0xff] %v1814_v16  ;;  %1966 = vst [vmem:[#allocation5_spill] sm:$0xff] %v1816_v20  ;;  %v398_v20 = vadd.f32 %v1328_v21, %v1302_v19  ;;  %v404_v19 = vadd.f32 %v1776_v28, %v1774_v27 }
  0xef   :  { %v1351_v26 = vpop.f32.mrf.mxu0  ;;  %v1377_v35 = vpop.f32.mrf.mxu1 }
  0xf0   :  { %v551_v51 = vadd.f32 %v1351_v26, %v386_v44 }
  0xf1   :  { %v543_v36 = vpop.f32.mrf.mxu0  ;;  %v722_v37 = vpop.f32.mrf.mxu1 }
  0xf2   :  { %v544_v16 = vadd.f32 %v543_v36, %v380_v50 }
  0xf3   :  { %v1354_v39 = vpop.f32.mrf.mxu0  ;;  %v1380_v43 = vpop.f32.mrf.mxu1 }
  0xf4   :  { %v723_v15 = vadd.f32 %v722_v37, %v544_v16  ;;  %v416_v16 = vadd.f32 %v1784_v32, %v1782_v31 }
  0xf5   :  { %v557_v46 = vpop.f32.mrf.mxu0  ;;  %v738_v47 = vpop.f32.mrf.mxu1 }
  0xf7   :  { %v1357_v49 = vpop.f32.mrf.mxu0  ;;  %v1383_v54 = vpop.f32.mrf.mxu1 }
  0xf8   :  { %v579_v50 = vadd.f32 %v1357_v49, %v410_v11  ;;  %v434_v49 = vadd.f32 %v1788_v34, %v1786_v33 }
  0xf9   :  { %v571_v55 = vpop.f32.mrf.mxu0  ;;  %v754_v57 = vpop.f32.mrf.mxu1 }
  0xfa   :  { %v572_v24 = vadd.f32 %v571_v55, %v404_v19 }
  0xfb   :  { %v1360_v58 = vpop.f32.mrf.mxu0  ;;  %v1818_v59 = vpop.f32.mrf.mxu1 }
  0xfd   :  { %v585_v60 = vpop.f32.mrf.mxu0  ;;  %v1820_v61 = vpop.f32.mrf.mxu1 }
  0xff   :  { %v1822_v62 = vpop.f32.mrf.mxu0  ;;  %v1824_v0 = vpop.f32.mrf.mxu1 }
 0x101   :  { %v1826_v1 = vpop.f32.mrf.mxu0  ;;  %v1828_v4 = vpop.f32.mrf.mxu1 }
 0x103   :  { %v1830_v5 = vpop.f32.mrf.mxu0  ;;  %v1832_v6 = vpop.f32.mrf.mxu1 }
 0x104   :  { %1967 = vst [vmem:[#allocation6_spill] sm:$0xff] %v1832_v6  ;;  %v731_v6 = vadd.f32 %v1377_v35, %v551_v51  ;;  %v422_v35 = vadd.f32 %v1780_v30, %v1778_v29 }
 0x105   :  { %v1834_v13 = vpop.f32.mrf.mxu0  ;;  %v1836_v17 = vpop.f32.mrf.mxu1 }
 0x106   :  { %1968 = vst [vmem:[#allocation7_spill] sm:$0xff] %v1836_v17  ;;  %v392_v17 = vadd.f32 %v391_v23, %v173_v22 }
 0x107   :  { %v1838_v18 = vpop.f32.mrf.mxu0  ;;  %v1840_v45 = vpop.f32.mrf.mxu1 }
 0x108   :  { %1969 = vst [vmem:[#allocation8_spill] sm:$0xff] %v1838_v18  ;;  %v565_v18 = vadd.f32 %v1354_v39, %v398_v20  ;;  %v558_v26 = vadd.f32 %v557_v46, %v392_v17  ;;  %v593_v46 = vadd.f32 %v1360_v58, %v422_v35  ;;  %v586_v17 = vadd.f32 %v585_v60, %v416_v16 }
 0x109   :  { %v1842_v48 = vpop.f32.mrf.mxu0  ;;  %v1844_v52 = vpop.f32.mrf.mxu1  ;;  %v428_v58 = vadd.f32 %v1792_v40, %v1790_v38  ;;  %v446_v60 = vadd.f32 %v1796_v42, %v1794_v41 }
 0x10a   :  { %1970 = vst [vmem:[#allocation9_spill] sm:$0xff] %v1844_v52  ;;  %v747_v36 = vadd.f32 %v1380_v43, %v565_v18  ;;  %v739_v51 = vadd.f32 %v738_v47, %v558_v26  ;;  %v763_v43 = vadd.f32 %v1383_v54, %v579_v50  ;;  %v440_v26 = vadd.f32 %v1800_v63, %v1798_v53 }
 0x10b   :  { %v1846_v56 = vpop.f32.mrf.mxu0  ;;  %v1848_v14 = vpop.f32.mrf.mxu1  ;;  %v600_v38 = vadd.f32 %v1826_v1, %v428_v58  ;;  %v621_v41 = vadd.f32 %v1830_v5, %v446_v60 }
 0x10c   :  { %v614_v53 = vadd.f32 %v1834_v13, %v440_v26 }
 0x10d   :  { %v1850_v12 = vpop.f32.mrf.mxu0  ;;  %v1852_v9 = vpop.f32.mrf.mxu1  ;;  %v787_v50 = vadd.f32 %v1828_v4, %v600_v38 }
 0x10f   :  { %v1403_v10 = vpop.f32.mrf.mxu0  ;;  %v1429_v52 = vpop.f32.mrf.mxu1 }
 0x110   :  { %v923_v44 = vadd.f32 %v1403_v10, %v731_v6  ;;  %v755_v6 = vadd.f32 %v754_v57, %v572_v24  ;;  %v607_v10 = vadd.f32 %v1822_v62, %v434_v49  ;;  %v1974_v24 = vld [vmem:[#allocation3_spill] sm:$0xff] }
 0x111   :  { %v916_v21 = vpop.f32.mrf.mxu0  ;;  %v1078_v20 = vpop.f32.mrf.mxu1 }
 0x112   :  { %v1085_v22 = vadd.f32 %v1429_v52, %v923_v44  ;;  %v917_v23 = vadd.f32 %v916_v21, %v723_v15  ;;  %v779_v52 = vadd.f32 %v1818_v59, %v593_v46  ;;  %v771_v15 = vadd.f32 %v1820_v61, %v586_v17  ;;  %v1976_v46 = vld [vmem:[#allocation4_spill] sm:$0xff] }
 0x113   :  { %v1406_v39 = vpop.f32.mrf.mxu0  ;;  %v1432_v28 = vpop.f32.mrf.mxu1  ;;  %v795_v19 = vadd.f32 %v1824_v0, %v607_v10  ;;  %v458_v21 = vadd.f32 %v1804_v3, %v1802_v2  ;;  %v1972_v2 = vld [vmem:[#allocation8_spill] sm:$0xff] }
 0x114   :  { %1174 = vst.msk [vmem:[%s1962_s2 + $0x8] sm:$0xff] %vm1172_vm2, %v1085_v22  ;;  %v1079_v25 = vadd.f32 %v1078_v20, %v917_v23  ;;  %v935_v27 = vadd.f32 %v1406_v39, %v747_v36  ;;  %v452_v22 = vadd.f32 %v1808_v8, %v1806_v7  ;;  %v1971_v20 = vld [vmem:[#allocation6_spill] sm:$0xff] }
 0x115   :  { %v928_v37 = vpop.f32.mrf.mxu0  ;;  %v1090_v47 = vpop.f32.mrf.mxu1  ;;  %v811_v35 = vadd.f32 %v1971_v20, %v621_v41  ;;  %v635_v3 = vadd.f32 %v1972_v2, %v458_v21 }
 0x116   :  { %1173 = vst.msk [vmem:[%s1962_s2] sm:$0xff] %vm1172_vm2, %v1079_v25  ;;  %v1097_v29 = vadd.f32 %v1432_v28, %v935_v27  ;;  %v929_v30 = vadd.f32 %v928_v37, %v739_v51  ;;  %v1973_v51 = vld [vmem:[#allocation2_spill] sm:$0xff]  ;;  %v1975_v28 = vld [vmem:[#allocation7_spill] sm:$0xff]  ;;  %v628_v7 = vadd.f32 %v1842_v48, %v452_v22 }
 0x117   :  { %v1409_v55 = vpop.f32.mrf.mxu0  ;;  %v1435_v54 = vpop.f32.mrf.mxu1  ;;  %v470_v25 = vadd.f32 %v1974_v24, %v1973_v51  ;;  %v803_v16 = vadd.f32 %v1975_v28, %v614_v53  ;;  %v827_v49 = vadd.f32 %v1840_v45, %v635_v3 }
 0x118   :  { %1176 = vst.msk [vmem:[%s1962_s2 + $0x18] sm:$0xff] %vm1172_vm2, %v1097_v29  ;;  %v1091_v31 = vadd.f32 %v1090_v47, %v929_v30  ;;  %v947_v32 = vadd.f32 %v1409_v55, %v763_v43  ;;  %v1977_v29 = vld [vmem:[#allocation5_spill] sm:$0xff] }
 0x119   :  { %v940_v18 = vpop.f32.mrf.mxu0  ;;  %v1102_v57 = vpop.f32.mrf.mxu1  ;;  %v464_v30 = vadd.f32 %v1977_v29, %v1976_v46  ;;  %v649_v55 = vadd.f32 %v1846_v56, %v470_v25 }
 0x11a   :  { %1175 = vst.msk [vmem:[%s1962_s2 + $0x10] sm:$0xff] %vm1172_vm2, %v1091_v31  ;;  %v1109_v33 = vadd.f32 %v1435_v54, %v947_v32  ;;  %v941_v34 = vadd.f32 %v940_v18, %v755_v6  ;;  %v1978_v32 = vld [vmem:[#allocation9_spill] sm:$0xff] }
 0x11b   :  { %v1412_v11 = vpop.f32.mrf.mxu0  ;;  %v1438_v62 = vpop.f32.mrf.mxu1  ;;  %v819_v54 = vadd.f32 %v1978_v32, %v628_v7  ;;  %v642_v58 = vadd.f32 %v1850_v12, %v464_v30  ;;  %v843_v10 = vadd.f32 %v1848_v14, %v649_v55 }
 0x11c   :  { %1178 = vst.msk [vmem:[%s1962_s2 + $0x28] sm:$0xff] %vm1172_vm2, %v1109_v33  ;;  %v1103_v40 = vadd.f32 %v1102_v57, %v941_v34  ;;  %v959_v59 = vadd.f32 %v1412_v11, %v779_v52 }
 0x11d   :  { %v952_v44 = vpop.f32.mrf.mxu0  ;;  %v1114_v1 = vpop.f32.mrf.mxu1  ;;  %v835_v60 = vadd.f32 %v1852_v9, %v642_v58 }
 0x11e   :  { %1177 = vst.msk [vmem:[%s1962_s2 + $0x20] sm:$0xff] %vm1172_vm2, %v1103_v40  ;;  %v1121_v42 = vadd.f32 %v1438_v62, %v959_v59  ;;  %v953_v61 = vadd.f32 %v952_v44, %v771_v15 }
 0x11f   :  { %v1415_v36 = vpop.f32.mrf.mxu0  ;;  %v1441_v5 = vpop.f32.mrf.mxu1 }
 0x120   :  { %1180 = vst.msk [vmem:[%s1962_s2 + $0x38] sm:$0xff] %vm1172_vm2, %v1121_v42  ;;  %v1115_v63 = vadd.f32 %v1114_v1, %v953_v61  ;;  %v971_v0 = vadd.f32 %v1415_v36, %v795_v19 }
 0x121   :  { %v964_v23 = vpop.f32.mrf.mxu0  ;;  %v1126_v39 = vpop.f32.mrf.mxu1 }
 0x122   :  { %1179 = vst.msk [vmem:[%s1962_s2 + $0x30] sm:$0xff] %vm1172_vm2, %v1115_v63  ;;  %v1133_v4 = vadd.f32 %v1441_v5, %v971_v0  ;;  %v965_v13 = vadd.f32 %v964_v23, %v787_v50 }
 0x123   :  { %v1418_v27 = vpop.f32.mrf.mxu0  ;;  %v1444_v43 = vpop.f32.mrf.mxu1 }
 0x124   :  { %1182 = vst.msk [vmem:[%s1962_s2 + $0x48] sm:$0xff] %vm1172_vm2, %v1133_v4  ;;  %v1127_v8 = vadd.f32 %v1126_v39, %v965_v13  ;;  %v983_v37 = vadd.f32 %v1418_v27, %v811_v35 }
 0x125   :  { %v976_v47 = vpop.f32.mrf.mxu0  ;;  %v1138_v17 = vpop.f32.mrf.mxu1 }
 0x126   :  { %1181 = vst.msk [vmem:[%s1962_s2 + $0x40] sm:$0xff] %vm1172_vm2, %v1127_v8  ;;  %v1145_v48 = vadd.f32 %v1444_v43, %v983_v37  ;;  %v977_v6 = vadd.f32 %v976_v47, %v803_v16 }
 0x127   :  { %v1421_v31 = vpop.f32.mrf.mxu0  ;;  %v1447_v18 = vpop.f32.mrf.mxu1 }
 0x128   :  { %1184 = vst.msk [vmem:[%s1962_s2 + $0x58] sm:$0xff] %vm1172_vm2, %v1145_v48  ;;  %v1139_v45 = vadd.f32 %v1138_v17, %v977_v6  ;;  %v995_v56 = vadd.f32 %v1421_v31, %v827_v49 }
 0x129   :  { %v988_v52 = vpop.f32.mrf.mxu0  ;;  %v1150_v57 = vpop.f32.mrf.mxu1 }
 0x12a   :  { %1183 = vst.msk [vmem:[%s1962_s2 + $0x50] sm:$0xff] %vm1172_vm2, %v1139_v45  ;;  %v1157_v33 = vadd.f32 %v1447_v18, %v995_v56  ;;  %v989_v34 = vadd.f32 %v988_v52, %v819_v54 }
 0x12b   :  { %v1424_v12 = vpop.f32.mrf.mxu0  ;;  %v1450_v38 = vpop.f32.mrf.mxu1 }
 0x12c   :  { %1186 = vst.msk [vmem:[%s1962_s2 + $0x68] sm:$0xff] %vm1172_vm2, %v1157_v33  ;;  %v1151_v11 = vadd.f32 %v1150_v57, %v989_v34  ;;  %v1007_v15 = vadd.f32 %v1424_v12, %v843_v10 }
 0x12d   :  { %v1000_v14 = vpop.f32.mrf.mxu0  ;;  %v1162_v62 = vpop.f32.mrf.mxu1 }
 0x12e   :  { %1185 = vst.msk [vmem:[%s1962_s2 + $0x60] sm:$0xff] %vm1172_vm2, %v1151_v11  ;;  %v1169_v40 = vadd.f32 %v1450_v38, %v1007_v15  ;;  %v1001_v59 = vadd.f32 %v1000_v14, %v835_v60 }
 0x130   :  { %1188 = vst.msk [vmem:[%s1962_s2 + $0x78] sm:$0xff] %vm1172_vm2, %v1169_v40  ;;  %v1163_v9 = vadd.f32 %v1162_v62, %v1001_v59 }
 0x132   :  { %1187 = vst.msk [vmem:[%s1962_s2 + $0x70] sm:$0xff] %vm1172_vm2, %v1163_v9 }

// kernel: _lambda_.9
= control target key start
LH: loop header
LB: loop body
LE: loop exit
PB: predicated region body
PF: predicated region fallthrough
CT: control target
= control target key end

     0   :  { %s1480_s15 = smov 0   ;;  %s1787_s0 = inlined_call_operand.vmem [shape: f32[2,64,36], index: 0, kind: input, shape index: {}]   ;;  %s1788_s1 = inlined_call_operand.vmem [shape: f32[36,8], index: 1, kind: input, shape index: {}]   ;;  %s1789_s2 = inlined_call_operand.vmem [shape: f32[1,8], index: 2, kind: input, shape index: {}]   ;;  %s1790_s3 = inlined_call_operand.vmem [shape: f32[1,8], index: 3, kind: input, shape index: {}]   ;;  %s1791_s4 = inlined_call_operand.vmem [shape: f32[2,64,8], index: 4, kind: output, shape index: {}]  }
   0x1 LB: > { %s1212_s16 = sadd.s32 4294967295, %s1453_s15   ;;  %p1216_p0 = scmp.ge.s32.totalorder %s1453_s15, 1  ;;  %s1453_s15 = sphi %s1480_s15, %s14_s15  }
   0x2   : > { %p162_p1 = scmp.lt.s32.totalorder %s1453_s15, 3 }
   0x4   : > { %p163_p2 = pnand %p1216_p0, %p162_p1 }
   0x5   : > { %p188_p3 = scmp.lt.s32.totalorder (!%p163_p2), %s1212_s16, 1 }
   0x6   : > { %166 = sbr.rel (%p163_p2) target bundleno = 357 (0x165), region = 36 }
   0xb   : > { %v210_v0 = vld [vmem:[%s1788_s1 + $0x20] sm:$0xf]  ;;  %vm236_vm0 = vcmask 1043456   ;;  %v209_v1 = vld [vmem:[%s1788_s1 + $0x18] sm:$0xff]  ;;  %v208_v2 = vld [vmem:[%s1788_s1 + $0x10] sm:$0xff]  ;;  %s1793_s16 = smov (!%p188_p3, %s1212_s16), 1 }
   0xc   : > { %v238_v3 = vsel %vm236_vm0, %v210_v0, 0  ;;  %v1497_v4 = vand.u32 4294901760, %v209_v1  ;;  %v1499_v5 = vand.u32 4294901760, %v208_v2  ;;  %v207_v6 = vld [vmem:[%s1788_s1 + $0x8] sm:$0xff]  ;;  %v206_v7 = vld [vmem:[%s1788_s1] sm:$0xff]  ;;  %s1225_s27 = sshll.u32 %s1793_s16, 6 }
   0xd   : > { %v1507_v8 = vand.u32 4294901760, %v238_v3  ;;  %v1509_v9 = vand.u32 4294901760, %v207_v6  ;;  %v1511_v10 = vand.u32 4294901760, %v206_v7  ;;  %vm211_vm1 = vcmask 293888   ;;  %s1544_s30 = scalar_lea.vmem %s1787_s0, %s1225_s27  ;;  %s197_s11 = scalar_lea.vmem %s1791_s4, %s1225_s27 }
   0xe   : > { %v1516_v11 = vsub.f32 %v209_v1, %v1497_v4  ;;  %v1519_v12 = vsub.f32 %v208_v2, %v1499_v5  ;;  %v198_v19 = vld [vmem:[%s1544_s30] sm:$0xff]  ;;  %v199_v21 = vld [vmem:[%s1544_s30 + $0x8] sm:$0xff]  ;;  %v200_v23 = vld [vmem:[%s1544_s30 + $0x10] sm:$0xff]  ;;  %vm1039_vm2 = vcmask 64512  }
   0xf   : > { %1305 = vmatprep.subr.mxu0 %v1507_v8  ;;  %v1523_v13 = vsub.f32 %v238_v3, %v1507_v8  ;;  %v1527_v14 = vsub.f32 %v207_v6, %v1509_v9  ;;  %v1530_v15 = vsub.f32 %v206_v7, %v1511_v10  ;;  %v213_v26 = vsel %vm211_vm1, %v198_v19, 0  ;;  %v201_v32 = vld [vmem:[%s1544_s30 + $0x18] sm:$0xff]  ;;  %v202_v33 = vld [vmem:[%s1544_s30 + $0x20] sm:$0xff]  ;;  %v203_v42 = vld [vmem:[%s1544_s30 + $0x28] sm:$0xff] }
  0x10   : > { %1306 = vmatpush3.msra.mxu0 %v1507_v8  ;;  %v1534_v16 = vand.u32 4294901760, %v1516_v11  ;;  %v1537_v17 = vand.u32 4294901760, %v1519_v12  ;;  %v216_v27 = vsel %vm211_vm1, %v199_v21, 0  ;;  %v1569_v29 = vand.u32 4294901760, %v213_v26  ;;  %v204_v43 = vld [vmem:[%s1544_s30 + $0x30] sm:$0xff]  ;;  %v205_v44 = vld [vmem:[%s1544_s30 + $0x38] sm:$0xff] }
  0x11   : > { %1307 = vmatprep.subr.mxu0 %v1497_v4  ;;  %v1548_v18 = vand.u32 4294901760, %v1523_v13  ;;  %v1552_v20 = vand.u32 4294901760, %v1527_v14  ;;  %v1556_v22 = vand.u32 4294901760, %v1530_v15  ;;  %v1573_v31 = vand.u32 4294901760, %v216_v27 }
  0x12   : > { %1308 = vmatpush3.msra.mxu0 %v1497_v4  ;;  %v423_v24 = vsub.f32 %v1516_v11, %v1534_v16  ;;  %v430_v25 = vsub.f32 %v1519_v12, %v1537_v17  ;;  %v219_v37 = vsel %vm211_vm1, %v200_v23, 0  ;;  %v1583_v39 = vsub.f32 %v213_v26, %v1569_v29  ;;  %1337 = vmatprep.mubr.f32.mxu1 %v1569_v29 }
  0x13   : > { %v416_v28 = vsub.f32 %v1523_v13, %v1548_v18  ;;  %1309 = vmatprep.subr.mxu0 %v1499_v5  ;;  %v437_v30 = vsub.f32 %v1527_v14, %v1552_v20  ;;  %v444_v36 = vsub.f32 %v1530_v15, %v1556_v22  ;;  %v1586_v41 = vsub.f32 %v216_v27, %v1573_v31 }
  0x14   : > { %1310 = vmatpush3.msra.mxu0 %v1499_v5  ;;  %v424_v34 = vand.u32 4294901760, %v423_v24  ;;  %v431_v35 = vand.u32 4294901760, %v430_v25  ;;  %v1593_v46 = vand.u32 4294901760, %v219_v37  ;;  %v222_v47 = vsel %vm211_vm1, %v201_v32, 0 }
  0x15   : > { %v417_v38 = vand.u32 4294901760, %v416_v28  ;;  %1311 = vmatprep.subr.mxu0 %v1509_v9  ;;  %v438_v40 = vand.u32 4294901760, %v437_v30  ;;  %v445_v45 = vand.u32 4294901760, %v444_v36  ;;  %v225_v48 = vsel %vm211_vm1, %v202_v33, 0 }
  0x16   : > { %1312 = vmatpush3.msra.mxu0 %v1509_v9  ;;  %v312_v49 = vand.u32 4294901760, %v1583_v39  ;;  %v322_v50 = vand.u32 4294901760, %v1586_v41  ;;  %v1600_v51 = vand.u32 4294901760, %v222_v47  ;;  %v1602_v52 = vand.u32 4294901760, %v225_v48 }
  0x17   : > { %1327 = vmatprep.subr.mxu1 %v417_v38  ;;  %1313 = vmatprep.subr.mxu0 %v1511_v10  ;;  %v1606_v53 = vsub.f32 %v219_v37, %v1593_v46  ;;  %v228_v54 = vsel %vm211_vm1, %v203_v42, 0  ;;  %v231_v55 = vsel %vm211_vm1, %v204_v43, 0  ;;  %v234_v56 = vsel %vm211_vm1, %v205_v44, 0 }
  0x18   : > { %1328 = vmatpush3.msra.mxu1 %v417_v38  ;;  %1314 = vmatpush3.msra.mxu0 %v1511_v10  ;;  %v313_v57 = vsub.f32 %v1583_v39, %v312_v49  ;;  %v323_v58 = vsub.f32 %v1586_v41, %v322_v50  ;;  %v1619_v59 = vsub.f32 %v222_v47, %v1600_v51  ;;  %v1621_v60 = vand.u32 4294901760, %v228_v54 }
  0x19   : > { %1329 = vmatprep.subr.mxu1 %v424_v34  ;;  %1349 = vmatprep.subr.mxu0 %v1523_v13  ;;  %v332_v61 = vand.u32 4294901760, %v1606_v53  ;;  %v1625_v62 = vsub.f32 %v225_v48, %v1602_v52  ;;  %v1627_v63 = vand.u32 4294901760, %v231_v55  ;;  %v1629_v0 = vand.u32 4294901760, %v234_v56 }
  0x1a   : > { %1330 = vmatpush3.msra.mxu1 %v424_v34  ;;  %v314_v1 = vand.u32 4294901760, %v313_v57  ;;  %v324_v2 = vand.u32 4294901760, %v323_v58  ;;  %v342_v3 = vand.u32 4294901760, %v1619_v59  ;;  %v1633_v6 = vsub.f32 %v228_v54, %v1621_v60 }
  0x1b   : > { %1331 = vmatprep.subr.mxu1 %v431_v35  ;;  %v333_v7 = vsub.f32 %v1606_v53, %v332_v61  ;;  %v352_v19 = vand.u32 4294901760, %v1625_v62  ;;  %v1640_v21 = vsub.f32 %v231_v55, %v1627_v63  ;;  %v1643_v23 = vsub.f32 %v234_v56, %v1629_v0 }
  0x1c   : > { %1332 = vmatpush3.msra.mxu1 %v431_v35  ;;  %1315 = vmatprep.mubr.f32.mxu0 %v314_v1  ;;  %v343_v24 = vsub.f32 %v1619_v59, %v342_v3  ;;  %v362_v25 = vand.u32 4294901760, %v1633_v6 }
  0x1d   : > { %1333 = vmatprep.subr.mxu1 %v438_v40  ;;  %1316 = vmatmul.mubr.f32.vlgmr.msra.gmra.mxu0 %v324_v2  ;;  %v334_v26 = vand.u32 4294901760, %v333_v7  ;;  %v353_v27 = vsub.f32 %v1625_v62, %v352_v19  ;;  %v372_v28 = vand.u32 4294901760, %v1640_v21  ;;  %v382_v33 = vand.u32 4294901760, %v1643_v23 }
  0x1e   : > { %1334 = vmatpush3.msra.mxu1 %v438_v40  ;;  %1350 = vmatpush3.msra.mxu0 %v1523_v13  ;;  %v344_v30 = vand.u32 4294901760, %v343_v24  ;;  %v363_v32 = vsub.f32 %v1633_v6, %v362_v25 }
  0x1f   : > { %1335 = vmatprep.subr.mxu1 %v445_v45  ;;  %1318 = vmatprep.mubr.f32.mxu0 %v334_v26  ;;  %v354_v34 = vand.u32 4294901760, %v353_v27  ;;  %v373_v35 = vsub.f32 %v1640_v21, %v372_v28  ;;  %v383_v36 = vsub.f32 %v1643_v23, %v382_v33 }
  0x20   : > { %1336 = vmatpush3.msra.mxu1 %v445_v45  ;;  %v364_v13 = vand.u32 4294901760, %v363_v32  ;;  %1351 = vmatprep.subr.mxu0 %v1516_v11 }
  0x21   : > { %1338 = vmatmul.mubr.f32.vlgmr.msra.gmra.mxu1 %v1573_v31  ;;  %1371 = vmatprep.subr.mxu1 %v1507_v8  ;;  %v374_v37 = vand.u32 4294901760, %v373_v35  ;;  %v384_v38 = vand.u32 4294901760, %v383_v36 }
  0x22   : > { %1319 = vmatmul.mubr.f32.gmra.mxu0 %v344_v30  ;;  %1372 = vmatpush3.msra.mxu1 %v1507_v8 }
  0x23   : > { %1340 = vmatprep.mubr.f32.mxu1 %v1593_v46  ;;  %1352 = vmatpush3.msra.mxu0 %v1516_v11 }
  0x24   : > { %1321 = vmatprep.mubr.f32.mxu0 %v354_v34  ;;  %1373 = vmatprep.subr.mxu1 %v1497_v4 }
  0x25   : > { %1341 = vmatmul.mubr.f32.gmra.mxu1 %v1600_v51  ;;  %1353 = vmatprep.subr.mxu0 %v1519_v12 }
  0x26   : > { %1322 = vmatmul.mubr.f32.gmra.mxu0 %v364_v13  ;;  %1374 = vmatpush3.msra.mxu1 %v1497_v4 }
  0x27   : > { %1354 = vmatpush3.msra.mxu0 %v1519_v12  ;;  %1343 = vmatprep.mubr.f32.mxu1 %v1602_v52 }
  0x28   : > { %1375 = vmatprep.subr.mxu1 %v1499_v5  ;;  %1324 = vmatprep.mubr.f32.mxu0 %v374_v37 }
  0x29   : > { %1344 = vmatmul.mubr.f32.gmra.mxu1 %v1621_v60  ;;  %1355 = vmatprep.subr.mxu0 %v1527_v14 }
  0x2a   : > { %1376 = vmatpush3.msra.mxu1 %v1499_v5  ;;  %1325 = vmatmul.mubr.f32.gmra.mxu0 %v384_v38 }
  0x2b   : > { %1377 = vmatprep.subr.mxu1 %v1509_v9  ;;  %1356 = vmatpush3.msra.mxu0 %v1527_v14 }
  0x2c   : > { %1346 = vmatprep.mubr.f32.mxu1 %v1627_v63  ;;  %1357 = vmatprep.subr.mxu0 %v1530_v15 }
  0x2d   : > { %1378 = vmatpush3.msra.mxu1 %v1509_v9  ;;  %1358 = vmatpush3.msra.mxu0 %v1530_v15 }
  0x2e   : > { %1347 = vmatmul.mubr.f32.gmra.mxu1 %v1629_v0  ;;  %1359 = vmatprep.mubr.f32.mxu0 %v1583_v39 }
  0x2f   : > { %1379 = vmatprep.subr.mxu1 %v1511_v10  ;;  %1360 = vmatmul.mubr.f32.vlgmr.msra.gmra.mxu0 %v1586_v41 }
  0x30   : > { %1380 = vmatpush3.msra.mxu1 %v1511_v10  ;;  %1393 = vmatprep.subr.mxu0 %v1548_v18 }
  0x31   : > { %1381 = vmatprep.mubr.f32.mxu1 %v312_v49  ;;  %1394 = vmatpush3.msra.mxu0 %v1548_v18 }
  0x32   : > { %1362 = vmatprep.mubr.f32.mxu0 %v1606_v53  ;;  %1382 = vmatmul.mubr.f32.vlgmr.msra.gmra.mxu1 %v322_v50 }
  0x33   : > { %1415 = vmatprep.subr.mxu1 %v1507_v8  ;;  %1363 = vmatmul.mubr.f32.gmra.mxu0 %v1619_v59 }
  0x34   : > { %1416 = vmatpush3.msra.mxu1 %v1507_v8  ;;  %1395 = vmatprep.subr.mxu0 %v1534_v16 }
  0x35   : > { %1384 = vmatprep.mubr.f32.mxu1 %v332_v61  ;;  %1396 = vmatpush3.msra.mxu0 %v1534_v16 }
  0x36   : > { %1365 = vmatprep.mubr.f32.mxu0 %v1625_v62  ;;  %1385 = vmatmul.mubr.f32.gmra.mxu1 %v342_v3 }
  0x37   : > { %1417 = vmatprep.subr.mxu1 %v1497_v4  ;;  %1366 = vmatmul.mubr.f32.gmra.mxu0 %v1633_v6 }
  0x38   : > { %1397 = vmatprep.subr.mxu0 %v1537_v17  ;;  %1418 = vmatpush3.msra.mxu1 %v1497_v4 }
  0x39   : > { %1398 = vmatpush3.msra.mxu0 %v1537_v17  ;;  %1387 = vmatprep.mubr.f32.mxu1 %v352_v19 }
  0x3a   : > { %1419 = vmatprep.subr.mxu1 %v1499_v5  ;;  %1368 = vmatprep.mubr.f32.mxu0 %v1640_v21 }
  0x3b   : > { %1388 = vmatmul.mubr.f32.gmra.mxu1 %v362_v25  ;;  %1399 = vmatprep.subr.mxu0 %v1552_v20 }
  0x3c   : > { %1420 = vmatpush3.msra.mxu1 %v1499_v5  ;;  %1369 = vmatmul.mubr.f32.gmra.mxu0 %v1643_v23 }
  0x3d   : > { %1421 = vmatprep.subr.mxu1 %v1509_v9  ;;  %1400 = vmatpush3.msra.mxu0 %v1552_v20 }
  0x3e   : > { %1390 = vmatprep.mubr.f32.mxu1 %v372_v28  ;;  %1401 = vmatprep.subr.mxu0 %v1556_v22 }
  0x3f   : > { %1422 = vmatpush3.msra.mxu1 %v1509_v9  ;;  %1402 = vmatpush3.msra.mxu0 %v1556_v22 }
  0x40   : > { %1391 = vmatmul.mubr.f32.gmra.mxu1 %v382_v33  ;;  %1403 = vmatprep.mubr.f32.mxu0 %v1569_v29 }
  0x41   : > { %1423 = vmatprep.subr.mxu1 %v1511_v10  ;;  %1404 = vmatmul.mubr.f32.vlgmr.msra.gmra.mxu0 %v1573_v31 }
  0x42   : > { %1424 = vmatpush3.msra.mxu1 %v1511_v10  ;;  %1425 = vmatprep.mubr.f32.mxu1 %v1569_v29 }
  0x43   : > { %1406 = vmatprep.mubr.f32.mxu0 %v1593_v46 }
  0x44   : > { %1426 = vmatmul.mubr.f32.vlgmr.msra.gmra.mxu1 %v1573_v31 }
  0x45   : > { %1428 = vmatprep.mubr.f32.mxu1 %v1593_v46  ;;  %1407 = vmatmul.mubr.f32.gmra.mxu0 %v1600_v51 }
  0x46   : > { %1409 = vmatprep.mubr.f32.mxu0 %v1602_v52 }
  0x48   : > { %1429 = vmatmul.mubr.f32.gmra.mxu1 %v1600_v51 }
  0x49   : > { %1431 = vmatprep.mubr.f32.mxu1 %v1602_v52  ;;  %1410 = vmatmul.mubr.f32.gmra.mxu0 %v1621_v60 }
  0x4a   : > { %1412 = vmatprep.mubr.f32.mxu0 %v1627_v63 }
  0x4c   : > { %1432 = vmatmul.mubr.f32.gmra.mxu1 %v1621_v60 }
  0x4d   : > { %1434 = vmatprep.mubr.f32.mxu1 %v1627_v63  ;;  %1413 = vmatmul.mubr.f32.gmra.mxu0 %v1629_v0 }
  0x50   : > { %1435 = vmatmul.mubr.f32.gmra.mxu1 %v1629_v0 }
  0xdd   : > { %v1317_v4 = vpop.f32.mrf.mxu0 }
  0xdf   : > { %v316_v5 = vpop.f32.mrf.mxu0 }
  0xe1   : > { %v1339_v8 = vpop.f32.mrf.mxu1 }
  0xe2   : > { %v1320_v9 = vpop.f32.mrf.mxu0  ;;  %v489_v49 = vadd.f32 %v1339_v8, %v1317_v4 }
  0xe3   : > { %v482_v10 = vpop.f32.mrf.mxu1 }
  0xe4   : > { %v336_v11 = vpop.f32.mrf.mxu0  ;;  %v483_v51 = vadd.f32 %v482_v10, %v316_v5 }
  0xe5   : > { %v1342_v12 = vpop.f32.mrf.mxu1 }
  0xe6   : > { %v1323_v14 = vpop.f32.mrf.mxu0  ;;  %v501_v55 = vadd.f32 %v1342_v12, %v1320_v9 }
  0xe7   : > { %v494_v15 = vpop.f32.mrf.mxu1 }
  0xe8   : > { %v356_v16 = vpop.f32.mrf.mxu0  ;;  %v495_v59 = vadd.f32 %v494_v15, %v336_v11 }
  0xe9   : > { %v1345_v17 = vpop.f32.mrf.mxu1 }
  0xea   : > { %v1326_v18 = vpop.f32.mrf.mxu0  ;;  %v513_v0 = vadd.f32 %v1345_v17, %v1323_v14 }
  0xeb   : > { %v506_v20 = vpop.f32.mrf.mxu1 }
  0xec   : > { %v376_v22 = vpop.f32.mrf.mxu0  ;;  %v507_v6 = vadd.f32 %v506_v20, %v356_v16 }
  0xee   : > { %v1348_v29 = vpop.f32.mrf.mxu1 }
  0xef   : > { %v1361_v31 = vpop.f32.mrf.mxu0  ;;  %v525_v25 = vadd.f32 %v1348_v29, %v1326_v18 }
  0xf0   : > { %v518_v39 = vpop.f32.mrf.mxu1  ;;  %v614_v52 = vadd.f32 %v1361_v31, %v489_v49 }
  0xf1   : > { %v606_v40 = vpop.f32.mrf.mxu0  ;;  %v519_v35 = vadd.f32 %v518_v39, %v376_v22 }
  0xf2   : > { %v1383_v41 = vpop.f32.mrf.mxu1  ;;  %v607_v56 = vadd.f32 %v606_v40, %v483_v51 }
  0xf3   : > { %v1364_v42 = vpop.f32.mrf.mxu0  ;;  %v742_v60 = vadd.f32 %v1383_v41, %v614_v52 }
  0xf4   : > { %v733_v43 = vpop.f32.mrf.mxu1  ;;  %v628_v61 = vadd.f32 %v1364_v42, %v501_v55 }
  0xf5   : > { %v620_v44 = vpop.f32.mrf.mxu0  ;;  %v734_v1 = vadd.f32 %v733_v43, %v607_v56 }
  0xf6   : > { %v1386_v45 = vpop.f32.mrf.mxu1  ;;  %v621_v2 = vadd.f32 %v620_v44, %v495_v59 }
  0xf7   : > { %v1367_v46 = vpop.f32.mrf.mxu0  ;;  %v758_v21 = vadd.f32 %v1386_v45, %v628_v61 }
  0xf8   : > { %v749_v47 = vpop.f32.mrf.mxu1  ;;  %v642_v23 = vadd.f32 %v1367_v46, %v513_v0 }
  0xf9   : > { %v634_v48 = vpop.f32.mrf.mxu0  ;;  %v750_v30 = vadd.f32 %v749_v47, %v621_v2 }
  0xfa   : > { %v635_v26 = vadd.f32 %v634_v48, %v507_v6 }
  0xfb   : > { %v1389_v50 = vpop.f32.mrf.mxu1 }
  0xfc   : > { %v1370_v53 = vpop.f32.mrf.mxu0  ;;  %v774_v37 = vadd.f32 %v1389_v50, %v642_v23 }
  0xfd   : > { %v765_v54 = vpop.f32.mrf.mxu1  ;;  %v656_v38 = vadd.f32 %v1370_v53, %v525_v25 }
  0xfe   : > { %v648_v57 = vpop.f32.mrf.mxu0  ;;  %v766_v8 = vadd.f32 %v765_v54, %v635_v26 }
  0xff   : > { %v649_v9 = vadd.f32 %v648_v57, %v519_v35 }
 0x100   : > { %v1392_v58 = vpop.f32.mrf.mxu1 }
 0x101   : > { %v1405_v62 = vpop.f32.mrf.mxu0  ;;  %v790_v22 = vadd.f32 %v1392_v58, %v656_v38 }
 0x102   : > { %v781_v63 = vpop.f32.mrf.mxu1  ;;  %v882_v3 = vadd.f32 %v1405_v62, %v742_v60 }
 0x103   : > { %v875_v7 = vpop.f32.mrf.mxu0  ;;  %v782_v39 = vadd.f32 %v781_v63, %v649_v9 }
 0x104   : > { %v1427_v19 = vpop.f32.mrf.mxu1  ;;  %v876_v24 = vadd.f32 %v875_v7, %v734_v1 }
 0x105   : > { %v1408_v27 = vpop.f32.mrf.mxu0  ;;  %v1000_v32 = vadd.f32 %v1427_v19, %v882_v3 }
 0x106   : > { %v993_v28 = vpop.f32.mrf.mxu1  ;;  %v894_v33 = vadd.f32 %v1408_v27, %v758_v21 }
 0x107   : > { %v994_v34 = vadd.f32 %v993_v28, %v876_v24  ;;  %v887_v13 = vpop.f32.mrf.mxu0  ;;  %v1041_v12 = vsel %vm1039_vm2, %v1000_v32, 0.0 }
 0x108   : > { %v1430_v36 = vpop.f32.mrf.mxu1  ;;  %v888_v5 = vadd.f32 %v887_v13, %v750_v30 }
 0x109   : > { %v1040_v4 = vsel %vm1039_vm2, %v994_v34, 0.0  ;;  %v1411_v10 = vpop.f32.mrf.mxu0  ;;  %v1012_v14 = vadd.f32 %v1430_v36, %v894_v33 }
 0x10a   : > { %v1005_v11 = vpop.f32.mrf.mxu1  ;;  %v906_v15 = vadd.f32 %v1411_v10, %v774_v37  ;;  %v1042_v17 = vadd.f32 %v1041_v12, %v1040_v4 }
 0x10b   : > { %v1006_v16 = vadd.f32 %v1005_v11, %v888_v5  ;;  %v899_v18 = vpop.f32.mrf.mxu0  ;;  %v1045_v43 = vsel %vm1039_vm2, %v1012_v14, 0.0 }
 0x10c   : > { %v1433_v20 = vpop.f32.mrf.mxu1  ;;  %v900_v31 = vadd.f32 %v899_v18, %v766_v8 }
 0x10d   : > { %v1043_v29 = vsel %vm1039_vm2, %v1006_v16, 0.0  ;;  %v1414_v41 = vpop.f32.mrf.mxu0  ;;  %v1024_v44 = vadd.f32 %v1433_v20, %v906_v15 }
 0x10e   : > { %v1044_v40 = vadd.f32 %v1043_v29, %v1042_v17  ;;  %v1017_v42 = vpop.f32.mrf.mxu1  ;;  %v918_v45 = vadd.f32 %v1414_v41, %v790_v22 }
 0x10f   : > { %v1018_v46 = vadd.f32 %v1017_v42, %v900_v31  ;;  %v911_v48 = vpop.f32.mrf.mxu0  ;;  %v1049_v54 = vsel %vm1039_vm2, %v1024_v44, 0.0 }
 0x110   : > { %v1046_v47 = vadd.f32 %v1045_v43, %v1044_v40  ;;  %v1436_v49 = vpop.f32.mrf.mxu1  ;;  %v912_v51 = vadd.f32 %v911_v48, %v782_v39 }
 0x111   : > { %v1047_v50 = vsel %vm1039_vm2, %v1018_v46, 0.0  ;;  %v1036_v55 = vadd.f32 %v1436_v49, %v918_v45  ;;  %v1221_v45 = vld [vmem:[%s1789_s2] ss:$0 sm:$0xff] }
 0x112   : > { %v1048_v52 = vadd.f32 %v1047_v50, %v1046_v47  ;;  %v1029_v53 = vpop.f32.mrf.mxu1 }
 0x113   : > { %v1030_v56 = vadd.f32 %v1029_v53, %v912_v51  ;;  %v1053_v60 = vsel %vm1039_vm2, %v1036_v55, 0.0 }
 0x114   : > { %v1050_v57 = vadd.f32 %v1049_v54, %v1048_v52  ;;  %v1222_v54 = vld [vmem:[%s1790_s3] ss:$0 sm:$0xff] }
 0x115   : > { %v1051_v58 = vsel %vm1039_vm2, %v1030_v56, 0.0 }
 0x116   : > { %v1052_v59 = vadd.f32 %v1051_v58, %v1050_v57 }
 0x118   : > { %v1054_v61 = vadd.f32 %v1053_v60, %v1052_v59 }
 0x11a   : > { %v1055_v62 = vrot.slane %v1054_v61, 4 }
 0x11c   : > { %v1056_v63 = vadd.f32 %v1055_v62, %v1054_v61 }
 0x11e   : > { %v1057_v0 = vrot.slane %v1056_v63, 2 }
 0x120   : > { %v1058_v1 = vadd.f32 %v1057_v0, %v1056_v63 }
 0x122   : > { %v1059_v2 = vrot.slane %v1058_v1, 1 }
 0x124   : > { %v1060_v3 = vadd.f32 %v1059_v2, %v1058_v1 }
 0x126   : > { %v1062_v6 = vmul.f32 0.015625, %v1060_v3 }
 0x128   : > { %v1063_v7 = vsub.f32 %v994_v34, %v1062_v6  ;;  %v1064_v19 = vsub.f32 %v1000_v32, %v1062_v6  ;;  %v1065_v21 = vsub.f32 %v1006_v16, %v1062_v6  ;;  %v1066_v23 = vsub.f32 %v1012_v14, %v1062_v6 }
 0x129   : > { %v1067_v24 = vsub.f32 %v1018_v46, %v1062_v6  ;;  %v1068_v28 = vsub.f32 %v1024_v44, %v1062_v6  ;;  %v1069_v36 = vsub.f32 %v1030_v56, %v1062_v6  ;;  %v1070_v34 = vsub.f32 %v1036_v55, %v1062_v6 }
 0x12a   : > { %v1071_v25 = vmul.f32 %v1063_v7, %v1063_v7  ;;  %v1072_v26 = vmul.f32 %v1064_v19, %v1064_v19  ;;  %v1073_v27 = vmul.f32 %v1065_v21, %v1065_v21  ;;  %v1074_v30 = vmul.f32 %v1066_v23, %v1066_v23 }
 0x12b   : > { %v1075_v37 = vmul.f32 %v1067_v24, %v1067_v24  ;;  %v1076_v32 = vmul.f32 %v1068_v28, %v1068_v28  ;;  %v1077_v9 = vmul.f32 %v1069_v36, %v1069_v36  ;;  %v1078_v12 = vmul.f32 %v1070_v34, %v1070_v34 }
 0x12c   : > { %v1079_v33 = vsel %vm1039_vm2, %v1071_v25, 0.0  ;;  %v1080_v35 = vsel %vm1039_vm2, %v1072_v26, 0.0  ;;  %v1082_v38 = vsel %vm1039_vm2, %v1073_v27, 0.0  ;;  %v1084_v5 = vsel %vm1039_vm2, %v1074_v30, 0.0 }
 0x12d   : > { %v1081_v13 = vadd.f32 %v1080_v35, %v1079_v33  ;;  %v1086_v10 = vsel %vm1039_vm2, %v1075_v37, 0.0  ;;  %v1088_v14 = vsel %vm1039_vm2, %v1076_v32, 0.0  ;;  %v1090_v16 = vsel %vm1039_vm2, %v1077_v9, 0.0 }
 0x12e   : > { %v1092_v18 = vsel %vm1039_vm2, %v1078_v12, 0.0 }
 0x12f   : > { %v1083_v4 = vadd.f32 %v1082_v38, %v1081_v13 }
 0x131   : > { %v1085_v8 = vadd.f32 %v1084_v5, %v1083_v4 }
 0x133   : > { %v1087_v11 = vadd.f32 %v1086_v10, %v1085_v8 }
 0x135   : > { %v1089_v15 = vadd.f32 %v1088_v14, %v1087_v11 }
 0x137   : > { %v1091_v17 = vadd.f32 %v1090_v16, %v1089_v15 }
 0x139   : > { %v1093_v20 = vadd.f32 %v1092_v18, %v1091_v17 }
 0x13b   : > { %v1094_v22 = vrot.slane %v1093_v20, 4 }
 0x13d   : > { %v1095_v29 = vadd.f32 %v1094_v22, %v1093_v20 }
 0x13f   : > { %v1096_v31 = vrot.slane %v1095_v29, 2 }
 0x141   : > { %v1097_v39 = vadd.f32 %v1096_v31, %v1095_v29 }
 0x143   : > { %v1098_v40 = vrot.slane %v1097_v39, 1 }
 0x145   : > { %v1099_v41 = vadd.f32 %v1098_v40, %v1097_v39 }
 0x147   : > { %v1100_v42 = vmul.f32 0.015625, %v1099_v41 }
 0x149   : > { %v1101_v43 = vadd.f32 1e-05, %v1100_v42 }
 0x14b   : > { %1445 = vrsqrt.f32 %v1101_v43 }
 0x158   : > { %v1446_v44 = vpop.eup %1445 }
 0x159   : > { %v1103_v46 = vmul.f32 %v1446_v44, %v1063_v7  ;;  %v1104_v47 = vmul.f32 %v1446_v44, %v1064_v19  ;;  %v1105_v48 = vmul.f32 %v1446_v44, %v1065_v21  ;;  %v1106_v49 = vmul.f32 %v1446_v44, %v1066_v23 }
 0x15a   : > { %v1107_v50 = vmul.f32 %v1446_v44, %v1067_v24  ;;  %v1108_v51 = vmul.f32 %v1446_v44, %v1068_v28  ;;  %v1109_v52 = vmul.f32 %v1446_v44, %v1069_v36  ;;  %v1110_v53 = vmul.f32 %v1446_v44, %v1070_v34 }
 0x15b   : > { %v1118_v55 = vmul.f32 %v1221_v45, %v1103_v46  ;;  %v1119_v56 = vmul.f32 %v1221_v45, %v1104_v47  ;;  %v1120_v57 = vmul.f32 %v1221_v45, %v1105_v48  ;;  %v1121_v58 = vmul.f32 %v1221_v45, %v1106_v49 }
 0x15c   : > { %v1122_v59 = vmul.f32 %v1221_v45, %v1107_v50  ;;  %v1123_v60 = vmul.f32 %v1221_v45, %v1108_v51  ;;  %v1124_v61 = vmul.f32 %v1221_v45, %v1109_v52  ;;  %v1125_v62 = vmul.f32 %v1221_v45, %v1110_v53 }
 0x15d   : > { %v1133_v63 = vadd.f32 %v1222_v54, %v1118_v55  ;;  %v1134_v0 = vadd.f32 %v1222_v54, %v1119_v56  ;;  %v1135_v1 = vadd.f32 %v1222_v54, %v1120_v57  ;;  %v1136_v2 = vadd.f32 %v1222_v54, %v1121_v58 }
 0x15e   : > { %v1137_v3 = vadd.f32 %v1222_v54, %v1122_v59  ;;  %v1138_v6 = vadd.f32 %v1222_v54, %v1123_v60  ;;  %v1139_v7 = vadd.f32 %v1222_v54, %v1124_v61  ;;  %v1140_v19 = vadd.f32 %v1222_v54, %v1125_v62 }
 0x15f   : > { %v1141_v21 = vmax.f32 %v1133_v63, 0.0  ;;  %v1142_v23 = vmax.f32 %v1134_v0, 0.0  ;;  %v1143_v24 = vmax.f32 %v1135_v1, 0.0  ;;  %v1144_v25 = vmax.f32 %v1136_v2, 0.0 }
 0x160   : > { %v1145_v26 = vmax.f32 %v1137_v3, 0.0  ;;  %v1146_v27 = vmax.f32 %v1138_v6, 0.0  ;;  %v1147_v28 = vmax.f32 %v1139_v7, 0.0  ;;  %v1148_v30 = vmax.f32 %v1140_v19, 0.0 }
 0x161   : > { %1149 = vst.msk [vmem:[%s197_s11] sm:$0xff] %vm1039_vm2, %v1141_v21  ;;  %1150 = vst.msk [vmem:[%s197_s11 + $0x8] sm:$0xff] %vm1039_vm2, %v1142_v23 }
 0x162   : > { %1151 = vst.msk [vmem:[%s197_s11 + $0x10] sm:$0xff] %vm1039_vm2, %v1143_v24  ;;  %1152 = vst.msk [vmem:[%s197_s11 + $0x18] sm:$0xff] %vm1039_vm2, %v1144_v25 }
 0x163   : > { %1153 = vst.msk [vmem:[%s197_s11 + $0x20] sm:$0xff] %vm1039_vm2, %v1145_v26  ;;  %1154 = vst.msk [vmem:[%s197_s11 + $0x28] sm:$0xff] %vm1039_vm2, %v1146_v27 }
 0x164   : > { %1155 = vst.msk [vmem:[%s197_s11 + $0x30] sm:$0xff] %vm1039_vm2, %v1147_v28  ;;  %1156 = vst.msk [vmem:[%s197_s11 + $0x38] sm:$0xff] %vm1039_vm2, %v1148_v30 }
 0x165 PF: > { %s14_s15 = sadd.s32 1, %s1453_s15  }
 0x166   : > { %p11_p4 = scmp.ge.s32.totalorder %s14_s15, 4  }
 0x168   :  { %13 = sbr.rel (!%p11_p4) target bundleno = 1 (0x1), region = 66 }

// kernel: _lambda_.11
= control target key start
LH: loop header
LB: loop body
LE: loop exit
PB: predicated region body
PF: predicated region fallthrough
CT: control target
= control target key end

     0   :  { %s405_s12 = smov 0   ;;  %s459_s0 = inlined_call_operand.vmem [shape: f32[2,64,8], index: 0, kind: input, shape index: {}]   ;;  %s460_s1 = inlined_call_operand.vmem [shape: f32[1,8], index: 1, kind: input, shape index: {}]   ;;  %s461_s2 = inlined_call_operand.vmem [shape: f32[1,8], index: 2, kind: input, shape index: {}]   ;;  %s462_s3 = inlined_call_operand.vmem [shape: f32[2,64,8], index: 3, kind: output, shape index: {}]  }
   0x1 LB: > { %s352_s13 = sadd.s32 4294967295, %s383_s12   ;;  %p356_p0 = scmp.ge.s32.totalorder %s383_s12, 1  ;;  %s383_s12 = sphi %s405_s12, %s13_s12  }
   0x2   : > { %p137_p1 = scmp.lt.s32.totalorder %s383_s12, 3 }
   0x4   : > { %p138_p2 = pnand %p356_p0, %p137_p1 }
   0x5   : > { %p161_p3 = scmp.lt.s32.totalorder (!%p138_p2), %s352_s13, 1 }
   0x6   : > { %141 = sbr.rel (%p138_p2) target bundleno = 105 (0x69), region = 32 }
   0xb   : > { %s464_s13 = smov (!%p161_p3, %s352_s13), 1  ;;  %vm179_vm0 = vcmask 64512  }
   0xc   : > { %s365_s14 = sshll.u32 %s464_s13, 6 }
   0xd   : > { %s165_s17 = scalar_lea.vmem %s459_s0, %s365_s14  ;;  %s170_s24 = scalar_lea.vmem %s462_s3, %s365_s14 }
   0xe   : > { %v171_v0 = vld [vmem:[%s165_s17] sm:$0xff]  ;;  %v172_v1 = vld [vmem:[%s165_s17 + $0x8] sm:$0xff]  ;;  %v173_v2 = vld [vmem:[%s165_s17 + $0x10] sm:$0xff] }
   0xf   : > { %v174_v3 = vld [vmem:[%s165_s17 + $0x18] sm:$0xff]  ;;  %v180_v4 = vsel %vm179_vm0, %v171_v0, 0.0  ;;  %v181_v5 = vsel %vm179_vm0, %v172_v1, 0.0  ;;  %v183_v6 = vsel %vm179_vm0, %v173_v2, 0.0  ;;  %v175_v7 = vld [vmem:[%s165_s17 + $0x20] sm:$0xff]  ;;  %v176_v10 = vld [vmem:[%s165_s17 + $0x28] sm:$0xff] }
  0x10   : > { %v182_v8 = vadd.f32 %v181_v5, %v180_v4  ;;  %v185_v9 = vsel %vm179_vm0, %v174_v3, 0.0  ;;  %v187_v12 = vsel %vm179_vm0, %v175_v7, 0.0  ;;  %v177_v13 = vld [vmem:[%s165_s17 + $0x30] sm:$0xff]  ;;  %v189_v15 = vsel %vm179_vm0, %v176_v10, 0.0  ;;  %v178_v16 = vld [vmem:[%s165_s17 + $0x38] sm:$0xff] }
  0x11   : > { %v191_v18 = vsel %vm179_vm0, %v177_v13, 0.0  ;;  %v193_v20 = vsel %vm179_vm0, %v178_v16, 0.0 }
  0x12   : > { %v184_v11 = vadd.f32 %v183_v6, %v182_v8  ;;  %v361_v6 = vld [vmem:[%s460_s1] ss:$0 sm:$0xff] }
  0x14   : > { %v186_v14 = vadd.f32 %v185_v9, %v184_v11  ;;  %v362_v11 = vld [vmem:[%s461_s2] ss:$0 sm:$0xff] }
  0x16   : > { %v188_v17 = vadd.f32 %v187_v12, %v186_v14 }
  0x18   : > { %v190_v19 = vadd.f32 %v189_v15, %v188_v17 }
  0x1a   : > { %v192_v21 = vadd.f32 %v191_v18, %v190_v19 }
  0x1c   : > { %v194_v22 = vadd.f32 %v193_v20, %v192_v21 }
  0x1e   : > { %v195_v23 = vrot.slane %v194_v22, 4 }
  0x20   : > { %v196_v24 = vadd.f32 %v195_v23, %v194_v22 }
  0x22   : > { %v197_v25 = vrot.slane %v196_v24, 2 }
  0x24   : > { %v198_v26 = vadd.f32 %v197_v25, %v196_v24 }
  0x26   : > { %v199_v27 = vrot.slane %v198_v26, 1 }
  0x28   : > { %v200_v28 = vadd.f32 %v199_v27, %v198_v26 }
  0x2a   : > { %v202_v29 = vmul.f32 0.015625, %v200_v28 }
  0x2c   : > { %v203_v30 = vsub.f32 %v171_v0, %v202_v29  ;;  %v204_v31 = vsub.f32 %v172_v1, %v202_v29  ;;  %v205_v32 = vsub.f32 %v173_v2, %v202_v29  ;;  %v206_v33 = vsub.f32 %v174_v3, %v202_v29 }
  0x2d   : > { %v207_v34 = vsub.f32 %v175_v7, %v202_v29  ;;  %v208_v35 = vsub.f32 %v176_v10, %v202_v29  ;;  %v209_v40 = vsub.f32 %v177_v13, %v202_v29  ;;  %v210_v46 = vsub.f32 %v178_v16, %v202_v29 }
  0x2e   : > { %v211_v36 = vmul.f32 %v203_v30, %v203_v30  ;;  %v212_v37 = vmul.f32 %v204_v31, %v204_v31  ;;  %v213_v38 = vmul.f32 %v205_v32, %v205_v32  ;;  %v214_v39 = vmul.f32 %v206_v33, %v206_v33 }
  0x2f   : > { %v215_v41 = vmul.f32 %v207_v34, %v207_v34  ;;  %v216_v47 = vmul.f32 %v208_v35, %v208_v35  ;;  %v217_v50 = vmul.f32 %v209_v40, %v209_v40  ;;  %v218_v53 = vmul.f32 %v210_v46, %v210_v46 }
  0x30   : > { %v219_v42 = vsel %vm179_vm0, %v211_v36, 0.0  ;;  %v220_v43 = vsel %vm179_vm0, %v212_v37, 0.0  ;;  %v222_v44 = vsel %vm179_vm0, %v213_v38, 0.0  ;;  %v224_v48 = vsel %vm179_vm0, %v214_v39, 0.0 }
  0x31   : > { %v221_v45 = vadd.f32 %v220_v43, %v219_v42  ;;  %v226_v51 = vsel %vm179_vm0, %v215_v41, 0.0  ;;  %v228_v54 = vsel %vm179_vm0, %v216_v47, 0.0  ;;  %v230_v56 = vsel %vm179_vm0, %v217_v50, 0.0 }
  0x32   : > { %v232_v58 = vsel %vm179_vm0, %v218_v53, 0.0 }
  0x33   : > { %v223_v49 = vadd.f32 %v222_v44, %v221_v45 }
  0x35   : > { %v225_v52 = vadd.f32 %v224_v48, %v223_v49 }
  0x37   : > { %v227_v55 = vadd.f32 %v226_v51, %v225_v52 }
  0x39   : > { %v229_v57 = vadd.f32 %v228_v54, %v227_v55 }
  0x3b   : > { %v231_v59 = vadd.f32 %v230_v56, %v229_v57 }
  0x3d   : > { %v233_v60 = vadd.f32 %v232_v58, %v231_v59 }
  0x3f   : > { %v234_v61 = vrot.slane %v233_v60, 4 }
  0x41   : > { %v235_v62 = vadd.f32 %v234_v61, %v233_v60 }
  0x43   : > { %v236_v63 = vrot.slane %v235_v62, 2 }
  0x45   : > { %v237_v0 = vadd.f32 %v236_v63, %v235_v62 }
  0x47   : > { %v238_v1 = vrot.slane %v237_v0, 1 }
  0x49   : > { %v239_v2 = vadd.f32 %v238_v1, %v237_v0 }
  0x4b   : > { %v240_v3 = vmul.f32 0.015625, %v239_v2 }
  0x4d   : > { %v241_v4 = vadd.f32 1e-05, %v240_v3 }
  0x4f   : > { %375 = vrsqrt.f32 %v241_v4 }
  0x5c   : > { %v376_v5 = vpop.eup %375 }
  0x5d   : > { %v243_v7 = vmul.f32 %v376_v5, %v203_v30  ;;  %v244_v8 = vmul.f32 %v376_v5, %v204_v31  ;;  %v245_v9 = vmul.f32 %v376_v5, %v205_v32  ;;  %v246_v10 = vmul.f32 %v376_v5, %v206_v33 }
  0x5e   : > { %v247_v12 = vmul.f32 %v376_v5, %v207_v34  ;;  %v248_v13 = vmul.f32 %v376_v5, %v208_v35  ;;  %v249_v14 = vmul.f32 %v376_v5, %v209_v40  ;;  %v250_v15 = vmul.f32 %v376_v5, %v210_v46 }
  0x5f   : > { %v258_v16 = vmul.f32 %v361_v6, %v243_v7  ;;  %v259_v17 = vmul.f32 %v361_v6, %v244_v8  ;;  %v260_v18 = vmul.f32 %v361_v6, %v245_v9  ;;  %v261_v19 = vmul.f32 %v361_v6, %v246_v10 }
  0x60   : > { %v262_v20 = vmul.f32 %v361_v6, %v247_v12  ;;  %v263_v21 = vmul.f32 %v361_v6, %v248_v13  ;;  %v264_v22 = vmul.f32 %v361_v6, %v249_v14  ;;  %v265_v23 = vmul.f32 %v361_v6, %v250_v15 }
  0x61   : > { %v273_v24 = vadd.f32 %v362_v11, %v258_v16  ;;  %v274_v25 = vadd.f32 %v362_v11, %v259_v17  ;;  %v275_v26 = vadd.f32 %v362_v11, %v260_v18  ;;  %v276_v27 = vadd.f32 %v362_v11, %v261_v19 }
  0x62   : > { %v277_v28 = vadd.f32 %v362_v11, %v262_v20  ;;  %v278_v29 = vadd.f32 %v362_v11, %v263_v21  ;;  %v279_v30 = vadd.f32 %v362_v11, %v264_v22  ;;  %v280_v31 = vadd.f32 %v362_v11, %v265_v23 }
  0x63   : > { %v281_v32 = vmax.f32 %v273_v24, 0.0  ;;  %v282_v33 = vmax.f32 %v274_v25, 0.0  ;;  %v283_v34 = vmax.f32 %v275_v26, 0.0  ;;  %v284_v35 = vmax.f32 %v276_v27, 0.0 }
  0x64   : > { %v285_v36 = vmax.f32 %v277_v28, 0.0  ;;  %v286_v37 = vmax.f32 %v278_v29, 0.0  ;;  %v287_v38 = vmax.f32 %v279_v30, 0.0  ;;  %v288_v39 = vmax.f32 %v280_v31, 0.0 }
  0x65   : > { %289 = vst.msk [vmem:[%s170_s24] sm:$0xff] %vm179_vm0, %v281_v32  ;;  %290 = vst.msk [vmem:[%s170_s24 + $0x8] sm:$0xff] %vm179_vm0, %v282_v33 }
  0x66   : > { %291 = vst.msk [vmem:[%s170_s24 + $0x10] sm:$0xff] %vm179_vm0, %v283_v34  ;;  %292 = vst.msk [vmem:[%s170_s24 + $0x18] sm:$0xff] %vm179_vm0, %v284_v35 }
  0x67   : > { %293 = vst.msk [vmem:[%s170_s24 + $0x20] sm:$0xff] %vm179_vm0, %v285_v36  ;;  %294 = vst.msk [vmem:[%s170_s24 + $0x28] sm:$0xff] %vm179_vm0, %v286_v37 }
  0x68   : > { %295 = vst.msk [vmem:[%s170_s24 + $0x30] sm:$0xff] %vm179_vm0, %v287_v38  ;;  %296 = vst.msk [vmem:[%s170_s24 + $0x38] sm:$0xff] %vm179_vm0, %v288_v39 }
  0x69 PF: > { %s13_s12 = sadd.s32 1, %s383_s12  }
  0x6a   : > { %p10_p4 = scmp.ge.s32.totalorder %s13_s12, 4  }
  0x6c   :  { %12 = sbr.rel (!%p10_p4) target bundleno = 1 (0x1), region = 62 }

// kernel: _lambda_.10
= control target key start
LH: loop header
LB: loop body
LE: loop exit
PB: predicated region body
PF: predicated region fallthrough
CT: control target
= control target key end

     0   :  { %vm55_vm0 = vcmask 588800   ;;  %vm1299_vm1 = vcmask 64512   ;;  %s2552_s1 = inlined_call_operand.vmem [shape: f32[72,8], index: 1, kind: input, shape index: {}]   ;;  %s2553_s0 = inlined_call_operand.vmem [shape: f32[128,72], index: 0, kind: input, shape index: {}]   ;;  %s2554_s2 = inlined_call_operand.vmem [shape: f32[128,8], index: 2, kind: input, shape index: {}]   ;;  %s2555_s3 = inlined_call_operand.vmem [shape: f32[128,8], index: 3, kind: output, shape index: {}]  }
   0x1   :  { %v38_v0 = vld [vmem:[%s2552_s1 + $0x40] sm:$0xff]  ;;  %v37_v1 = vld [vmem:[%s2552_s1 + $0x38] sm:$0xff]  ;;  %v36_v2 = vld [vmem:[%s2552_s1 + $0x30] sm:$0xff] }
   0x2   :  { %v1751_v3 = vand.u32 4294901760, %v38_v0  ;;  %v1753_v4 = vand.u32 4294901760, %v37_v1  ;;  %v1755_v5 = vand.u32 4294901760, %v36_v2  ;;  %v35_v6 = vld [vmem:[%s2552_s1 + $0x28] sm:$0xff]  ;;  %v34_v7 = vld [vmem:[%s2552_s1 + $0x20] sm:$0xff]  ;;  %v33_v8 = vld [vmem:[%s2552_s1 + $0x18] sm:$0xff] }
   0x3   :  { %v1766_v9 = vand.u32 4294901760, %v35_v6  ;;  %v1768_v10 = vand.u32 4294901760, %v34_v7  ;;  %v1770_v11 = vand.u32 4294901760, %v33_v8  ;;  %v32_v12 = vld [vmem:[%s2552_s1 + $0x10] sm:$0xff]  ;;  %v1778_v13 = vld [vmem:[%s2552_s1 + $0x8] sm:$0xff]  ;;  %v1783_v14 = vld [vmem:[%s2552_s1] sm:$0xff] }
   0x4   :  { %1470 = vmatprep.subr.mxu0 %v1751_v3  ;;  %v1787_v15 = vsub.f32 %v38_v0, %v1751_v3  ;;  %v1790_v16 = vsub.f32 %v37_v1, %v1753_v4  ;;  %v1792_v17 = vand.u32 4294901760, %v32_v12  ;;  %v1795_v18 = vsub.f32 %v36_v2, %v1755_v5  ;;  %v14_v19 = vld [vmem:[%s2553_s0] sm:$0xff]  ;;  %v15_v20 = vld [vmem:[%s2553_s0 + $0x8] sm:$0xff]  ;;  %v16_v41 = vld [vmem:[%s2553_s0 + $0x10] sm:$0xff] }
   0x5   :  { %1471 = vmatpush3.msra.mxu0 %v1751_v3  ;;  %v1805_v21 = vand.u32 4294901760, %v1778_v13  ;;  %v1808_v22 = vsub.f32 %v35_v6, %v1766_v9  ;;  %v1811_v23 = vand.u32 4294901760, %v1783_v14  ;;  %v1814_v24 = vsub.f32 %v34_v7, %v1768_v10  ;;  %v17_v42 = vld [vmem:[%s2553_s0 + $0x18] sm:$0xff]  ;;  %v18_v63 = vld [vmem:[%s2553_s0 + $0x20] sm:$0xff]  ;;  %v19_v0 = vld [vmem:[%s2553_s0 + $0x28] sm:$0xff] }
   0x6   :  { %1472 = vmatprep.subr.mxu0 %v1753_v4  ;;  %v1818_v25 = vand.u32 4294901760, %v1787_v15  ;;  %v1821_v26 = vand.u32 4294901760, %v1790_v16  ;;  %v1824_v27 = vand.u32 4294901760, %v1795_v18  ;;  %v57_v28 = vsel %vm55_vm0, %v14_v19, 0  ;;  %v20_v19 = vld [vmem:[%s2553_s0 + $0x30] sm:$0xff] }
   0x7   :  { %1473 = vmatpush3.msra.mxu0 %v1753_v4  ;;  %v1829_v29 = vand.u32 4294901760, %v1808_v22  ;;  %v1832_v30 = vand.u32 4294901760, %v1814_v24  ;;  %v1834_v31 = vand.u32 4294901760, %v57_v28  ;;  %v60_v32 = vsel %vm55_vm0, %v15_v20, 0 }
   0x8   :  { %1474 = vmatprep.subr.mxu0 %v1755_v5  ;;  %v356_v33 = vsub.f32 %v1787_v15, %v1818_v25  ;;  %v363_v34 = vsub.f32 %v1790_v16, %v1821_v26  ;;  %v370_v35 = vsub.f32 %v1795_v18, %v1824_v27  ;;  %v1844_v36 = vand.u32 4294901760, %v60_v32 }
   0x9   :  { %2573 = vst [vmem:[#allocation2_spill] sm:$0xff] %v1834_v31  ;;  %1475 = vmatpush3.msra.mxu0 %v1755_v5  ;;  %v377_v37 = vsub.f32 %v1808_v22, %v1829_v29  ;;  %v384_v38 = vsub.f32 %v1814_v24, %v1832_v30  ;;  %v1852_v39 = vsub.f32 %v57_v28, %v1834_v31  ;;  %v63_v53 = vsel %vm55_vm0, %v16_v41, 0  ;;  %v21_v41 = vld [vmem:[%s2553_s0 + $0x38] sm:$0xff] }
   0xa   :  { %v1855_v40 = vsub.f32 %v33_v8, %v1770_v11  ;;  %1476 = vmatprep.subr.mxu0 %v1766_v9  ;;  %v357_v43 = vand.u32 4294901760, %v356_v33  ;;  %v364_v44 = vand.u32 4294901760, %v363_v34  ;;  %v371_v45 = vand.u32 4294901760, %v370_v35  ;;  %1530 = vmatprep.mubr.f32.mxu1 %v1834_v31 }
   0xb   :  { %v1865_v46 = vsub.f32 %v60_v32, %v1844_v36  ;;  %1477 = vmatpush3.msra.mxu0 %v1766_v9  ;;  %v378_v47 = vand.u32 4294901760, %v377_v37  ;;  %v1869_v48 = vand.u32 4294901760, %v384_v38  ;;  %v2561_v49 = vand.u32 4294901760, %v1852_v39 }
   0xc   :  { %v1873_v50 = vand.u32 4294901760, %v1855_v40  ;;  %1478 = vmatprep.subr.mxu0 %v1768_v10  ;;  %1512 = vmatprep.subr.mxu1 %v357_v43  ;;  %v1878_v52 = vsub.f32 %v32_v12, %v1792_v17  ;;  %v66_v54 = vsel %vm55_vm0, %v17_v42, 0  ;;  %v1888_v57 = vand.u32 4294901760, %v63_v53 }
   0xd   :  { %v2560_v51 = vand.u32 4294901760, %v1865_v46  ;;  %1479 = vmatpush3.msra.mxu0 %v1768_v10  ;;  %1513 = vmatpush3.msra.mxu1 %v357_v43  ;;  %v181_v55 = vsub.f32 %v1852_v39, %v2561_v49  ;;  %v1890_v58 = vand.u32 4294901760, %v66_v54  ;;  %v1901_v61 = vsub.f32 %v1778_v13, %v1805_v21 }
   0xe   :  { %v391_v56 = vsub.f32 %v1855_v40, %v1873_v50  ;;  %1480 = vmatprep.subr.mxu0 %v1770_v11  ;;  %1514 = vmatprep.subr.mxu1 %v364_v44  ;;  %v1897_v60 = vand.u32 4294901760, %v1878_v52  ;;  %v1905_v62 = vsub.f32 %v1783_v14, %v1811_v23  ;;  %v1915_v6 = vsub.f32 %v63_v53, %v1888_v57  ;;  %v22_v53 = vld [vmem:[%s2553_s0 + $0x40] sm:$0xff] }
   0xf   :  { %v191_v59 = vsub.f32 %v1865_v46, %v2560_v51  ;;  %1481 = vmatpush3.msra.mxu0 %v1770_v11  ;;  %1515 = vmatpush3.msra.mxu1 %v364_v44  ;;  %v182_v1 = vand.u32 4294901760, %v181_v55  ;;  %v1918_v7 = vsub.f32 %v66_v54, %v1890_v58  ;;  %v1924_v13 = vand.u32 4294901760, %v1901_v61 }
  0x10   :  { %v392_v2 = vand.u32 4294901760, %v391_v56  ;;  %1482 = vmatprep.subr.mxu0 %v1792_v17  ;;  %1516 = vmatprep.subr.mxu1 %v371_v45  ;;  %v398_v12 = vsub.f32 %v1878_v52, %v1897_v60  ;;  %v1927_v14 = vand.u32 4294901760, %v1905_v62  ;;  %v2557_v20 = vand.u32 4294901760, %v1915_v6 }
  0x11   :  { %v192_v8 = vand.u32 4294901760, %v191_v59  ;;  %2574 = vst [vmem:[#allocation3_spill] sm:$0xff] %v1924_v13  ;;  %1483 = vmatpush3.msra.mxu0 %v1792_v17  ;;  %1517 = vmatpush3.msra.mxu1 %v371_v45  ;;  %v2556_v28 = vand.u32 4294901760, %v1918_v7  ;;  %v69_v32 = vsel %vm55_vm0, %v18_v63, 0  ;;  %v72_v33 = vsel %vm55_vm0, %v19_v0, 0  ;;  %v23_v59 = vld [vmem:[%s2553_s0 + $0x48] sm:$0xff] }
  0x12   :  { %2575 = vst [vmem:[#allocation4_spill] sm:$0xff] %v1927_v14  ;;  %1484 = vmatprep.subr.mxu0 %v1805_v21  ;;  %1518 = vmatprep.subr.mxu1 %v378_v47  ;;  %v399_v34 = vand.u32 4294901760, %v398_v12  ;;  %v405_v35 = vsub.f32 %v1901_v61, %v1924_v13  ;;  %v412_v37 = vsub.f32 %v1905_v62, %v1927_v14  ;;  %v1942_v38 = vand.u32 4294901760, %v69_v32  ;;  %v24_v63 = vld [vmem:[%s2553_s0 + $0x50] sm:$0xff] }
  0x13   :  { %1485 = vmatpush3.msra.mxu0 %v1805_v21  ;;  %1519 = vmatpush3.msra.mxu1 %v378_v47  ;;  %v201_v42 = vsub.f32 %v1915_v6, %v2557_v20  ;;  %v211_v43 = vsub.f32 %v1918_v7, %v2556_v28  ;;  %v1954_v44 = vand.u32 4294901760, %v72_v33  ;;  %v75_v45 = vsel %vm55_vm0, %v20_v19, 0 }
  0x14   :  { %1486 = vmatprep.subr.mxu0 %v1811_v23  ;;  %1520 = vmatprep.subr.mxu1 %v1869_v48  ;;  %v406_v47 = vand.u32 4294901760, %v405_v35  ;;  %v1962_v54 = vand.u32 4294901760, %v412_v37  ;;  %v1965_v55 = vsub.f32 %v69_v32, %v1942_v38  ;;  %v1967_v56 = vand.u32 4294901760, %v75_v45 }
  0x15   :  { %1487 = vmatpush3.msra.mxu0 %v1811_v23  ;;  %1488 = vmatprep.mubr.f32.mxu0 %v182_v1  ;;  %v202_v0 = vand.u32 4294901760, %v201_v42  ;;  %v212_v12 = vand.u32 4294901760, %v211_v43  ;;  %v1977_v19 = vsub.f32 %v72_v33, %v1954_v44  ;;  %v78_v32 = vsel %vm55_vm0, %v21_v41, 0  ;;  %v25_v1 = vld [vmem:[%s2553_s0 + $0x58] sm:$0xff] }
  0x16   :  { %1521 = vmatpush3.msra.mxu1 %v1869_v48  ;;  %1489 = vmatmul.mubr.f32.vlgmr.msra.gmra.mxu0 %v192_v8  ;;  %v2558_v35 = vand.u32 4294901760, %v1965_v55  ;;  %v1983_v37 = vsub.f32 %v75_v45, %v1967_v56  ;;  %v1985_v28 = vand.u32 4294901760, %v78_v32  ;;  %v81_v20 = vsel %vm55_vm0, %v22_v53, 0 }
  0x17   :  { %1522 = vmatprep.subr.mxu1 %v392_v2  ;;  %1491 = vmatprep.mubr.f32.mxu0 %v202_v0  ;;  %v2559_v33 = vand.u32 4294901760, %v1977_v19  ;;  %v1992_v41 = vand.u32 4294901760, %v81_v20  ;;  %v84_v48 = vsel %vm55_vm0, %v23_v59, 0  ;;  %v87_v8 = vsel %vm55_vm0, %v24_v63, 0 }
  0x18   :  { %1523 = vmatpush3.msra.mxu1 %v392_v2  ;;  %1554 = vmatprep.subr.mxu0 %v1787_v15  ;;  %v221_v42 = vsub.f32 %v1965_v55, %v2558_v35  ;;  %v2562_v43 = vand.u32 4294901760, %v1983_v37  ;;  %v2002_v45 = vsub.f32 %v78_v32, %v1985_v28  ;;  %v2004_v53 = vand.u32 4294901760, %v84_v48  ;;  %v26_v32 = vld [vmem:[%s2553_s0 + $0x60] sm:$0xff] }
  0x19   :  { %1524 = vmatprep.subr.mxu1 %v399_v34  ;;  %1555 = vmatpush3.msra.mxu0 %v1787_v15  ;;  %v231_v2 = vsub.f32 %v1977_v19, %v2559_v33  ;;  %v2011_v59 = vsub.f32 %v81_v20, %v1992_v41  ;;  %v2013_v63 = vand.u32 4294901760, %v87_v8  ;;  %v90_v0 = vsel %vm55_vm0, %v25_v1, 0 }
  0x1a   :  { %1525 = vmatpush3.msra.mxu1 %v399_v34  ;;  %1492 = vmatmul.mubr.f32.gmra.mxu0 %v212_v12  ;;  %v222_v35 = vand.u32 4294901760, %v221_v42  ;;  %v241_v15 = vsub.f32 %v1983_v37, %v2562_v43  ;;  %v2565_v33 = vand.u32 4294901760, %v2002_v45  ;;  %v2024_v20 = vsub.f32 %v84_v48, %v2004_v53  ;;  %v27_v12 = vld [vmem:[%s2553_s0 + $0x68] sm:$0xff]  ;;  %v28_v48 = vld [vmem:[%s2553_s0 + $0x70] sm:$0xff] }
  0x1b   :  { %1526 = vmatprep.subr.mxu1 %v406_v47  ;;  %v232_v51 = vand.u32 4294901760, %v231_v2  ;;  %1556 = vmatprep.subr.mxu0 %v1790_v16  ;;  %v2566_v1 = vand.u32 4294901760, %v2011_v59  ;;  %v2029_v49 = vsub.f32 %v87_v8, %v2013_v63  ;;  %v2031_v34 = vand.u32 4294901760, %v90_v0 }
  0x1c   :  { %1527 = vmatpush3.msra.mxu1 %v406_v47  ;;  %1494 = vmatprep.mubr.f32.mxu0 %v222_v35  ;;  %v242_v42 = vand.u32 4294901760, %v241_v15  ;;  %v251_v2 = vsub.f32 %v2002_v45, %v2565_v33  ;;  %v2571_v8 = vand.u32 4294901760, %v2024_v20  ;;  %v93_v43 = vsel %vm55_vm0, %v26_v32, 0  ;;  %v29_v33 = vld [vmem:[%s2553_s0 + $0x78] sm:$0xff] }
  0x1d   :  { %1528 = vmatprep.subr.mxu1 %v1962_v54  ;;  %1557 = vmatpush3.msra.mxu0 %v1790_v16  ;;  %v261_v31 = vsub.f32 %v2011_v59, %v2566_v1  ;;  %v2051_v35 = vsub.f32 %v90_v0, %v2031_v34  ;;  %v2053_v15 = vand.u32 4294901760, %v93_v43  ;;  %v96_v1 = vsel %vm55_vm0, %v27_v12, 0 }
  0x1e   :  { %1529 = vmatpush3.msra.mxu1 %v1962_v54  ;;  %1495 = vmatmul.mubr.f32.gmra.mxu0 %v232_v51  ;;  %v252_v32 = vand.u32 4294901760, %v251_v2  ;;  %v271_v16 = vsub.f32 %v2024_v20, %v2571_v8  ;;  %v99_v47 = vsel %vm55_vm0, %v28_v48, 0  ;;  %v2576_v51 = vand.u32 4294901760, %v2029_v49 }
  0x1f   :  { %1531 = vmatmul.mubr.f32.vlgmr.msra.gmra.mxu1 %v1844_v36  ;;  %1596 = vmatprep.subr.mxu1 %v1751_v3  ;;  %v262_v0 = vand.u32 4294901760, %v261_v31  ;;  %v2572_v14 = vand.u32 4294901760, %v2051_v35  ;;  %v2068_v13 = vsub.f32 %v93_v43, %v2053_v15  ;;  %v2074_v12 = vand.u32 4294901760, %v96_v1 }
  0x20   :  { %1597 = vmatpush3.msra.mxu1 %v1751_v3  ;;  %1497 = vmatprep.mubr.f32.mxu0 %v242_v42  ;;  %v281_v54 = vsub.f32 %v2029_v49, %v2576_v51  ;;  %v2076_v48 = vand.u32 4294901760, %v99_v47  ;;  %v102_v2 = vsel %vm55_vm0, %v29_v33, 0  ;;  %v272_v42 = vand.u32 4294901760, %v271_v16 }
  0x21   :  { %1533 = vmatprep.mubr.f32.mxu1 %v1888_v57  ;;  %1598 = vmatprep.subr.mxu1 %v1753_v4  ;;  %v2082_v43 = vand.u32 4294901760, %v102_v2  ;;  %v291_v51 = vsub.f32 %v2051_v35, %v2572_v14  ;;  %v2089_v8 = vsub.f32 %v96_v1, %v2074_v12  ;;  %v2577_v16 = vand.u32 4294901760, %v2068_v13 }
  0x22   :  { %1498 = vmatmul.mubr.f32.gmra.mxu0 %v252_v32  ;;  %1599 = vmatpush3.msra.mxu1 %v1753_v4  ;;  %v2092_v33 = vsub.f32 %v99_v47, %v2076_v48  ;;  %v282_v32 = vand.u32 4294901760, %v281_v54 }
  0x23   :  { %1534 = vmatmul.mubr.f32.gmra.mxu1 %v1890_v58  ;;  %1558 = vmatprep.subr.mxu0 %v1795_v18  ;;  %v2097_v31 = vsub.f32 %v102_v2, %v2082_v43  ;;  %v301_v14 = vsub.f32 %v2068_v13, %v2577_v16  ;;  %v310_v1 = vand.u32 4294901760, %v2089_v8  ;;  %v292_v2 = vand.u32 4294901760, %v291_v51 }
  0x24   :  { %1500 = vmatprep.mubr.f32.mxu0 %v262_v0  ;;  %1536 = vmatprep.mubr.f32.mxu1 %v1942_v38  ;;  %v320_v47 = vand.u32 4294901760, %v2092_v33 }
  0x25   :  { %1559 = vmatpush3.msra.mxu0 %v1795_v18  ;;  %1600 = vmatprep.subr.mxu1 %v1755_v5  ;;  %v311_v0 = vsub.f32 %v2089_v8, %v310_v1  ;;  %v330_v54 = vand.u32 4294901760, %v2097_v31  ;;  %v302_v18 = vand.u32 4294901760, %v301_v14 }
  0x26   :  { %1501 = vmatmul.mubr.f32.gmra.mxu0 %v272_v42  ;;  %1560 = vmatprep.subr.mxu0 %v1808_v22  ;;  %v321_v42 = vsub.f32 %v2092_v33, %v320_v47 }
  0x27   :  { %1537 = vmatmul.mubr.f32.gmra.mxu1 %v1954_v44  ;;  %1561 = vmatpush3.msra.mxu0 %v1808_v22  ;;  %v312_v51 = vand.u32 4294901760, %v311_v0  ;;  %v331_v22 = vsub.f32 %v2097_v31, %v330_v54 }
  0x28   :  { %1601 = vmatpush3.msra.mxu1 %v1755_v5  ;;  %1503 = vmatprep.mubr.f32.mxu0 %v282_v32  ;;  %v322_v14 = vand.u32 4294901760, %v321_v42 }
  0x29   :  { %1539 = vmatprep.mubr.f32.mxu1 %v1967_v56  ;;  %1602 = vmatprep.subr.mxu1 %v1766_v9  ;;  %v332_v32 = vand.u32 4294901760, %v331_v22 }
  0x2a   :  { %1504 = vmatmul.mubr.f32.gmra.mxu0 %v292_v2  ;;  %1603 = vmatpush3.msra.mxu1 %v1766_v9 }
  0x2b   :  { %1540 = vmatmul.mubr.f32.gmra.mxu1 %v1985_v28  ;;  %1562 = vmatprep.subr.mxu0 %v1814_v24 }
  0x2c   :  { %1563 = vmatpush3.msra.mxu0 %v1814_v24  ;;  %1506 = vmatprep.mubr.f32.mxu0 %v302_v18  ;;  %v2578_v24 = vand.u32 4294901760, %v1852_v39 }
  0x2d   :  { %1542 = vmatprep.mubr.f32.mxu1 %v1992_v41  ;;  %1604 = vmatprep.subr.mxu1 %v1768_v10 }
  0x2e   :  { %1507 = vmatmul.mubr.f32.gmra.mxu0 %v312_v51  ;;  %1564 = vmatprep.subr.mxu0 %v1855_v40 }
  0x2f   :  { %1543 = vmatmul.mubr.f32.gmra.mxu1 %v2004_v53  ;;  %1565 = vmatpush3.msra.mxu0 %v1855_v40  ;;  %v2579_v40 = vand.u32 4294901760, %v1865_v46 }
  0x30   :  { %1605 = vmatpush3.msra.mxu1 %v1768_v10  ;;  %1566 = vmatprep.subr.mxu0 %v1878_v52 }
  0x31   :  { %1606 = vmatprep.subr.mxu1 %v1770_v11  ;;  %1509 = vmatprep.mubr.f32.mxu0 %v322_v14 }
  0x32   :  { %1545 = vmatprep.mubr.f32.mxu1 %v2013_v63  ;;  %1567 = vmatpush3.msra.mxu0 %v1878_v52  ;;  %v2580_v52 = vand.u32 4294901760, %v1915_v6 }
  0x33   :  { %1607 = vmatpush3.msra.mxu1 %v1770_v11  ;;  %1510 = vmatmul.mubr.f32.gmra.mxu0 %v332_v32 }
  0x34   :  { %1546 = vmatmul.mubr.f32.gmra.mxu1 %v2031_v34  ;;  %1568 = vmatprep.subr.mxu0 %v1901_v61 }
  0x35   :  { %1569 = vmatpush3.msra.mxu0 %v1901_v61  ;;  %1608 = vmatprep.subr.mxu1 %v1792_v17 }
  0x36   :  { %1570 = vmatprep.subr.mxu0 %v1905_v62  ;;  %1548 = vmatprep.mubr.f32.mxu1 %v2053_v15 }
  0x37   :  { %1571 = vmatpush3.msra.mxu0 %v1905_v62  ;;  %1572 = vmatprep.mubr.f32.mxu0 %v1852_v39  ;;  %v2590_v39 = vld [vmem:[#allocation3_spill] sm:$0xff] }
  0x38   :  { %1609 = vmatpush3.msra.mxu1 %v1792_v17  ;;  %1573 = vmatmul.mubr.f32.vlgmr.msra.gmra.mxu0 %v1865_v46  ;;  %v2592_v46 = vmov %v2577_v16 }
  0x39   :  { %1549 = vmatmul.mubr.f32.gmra.mxu1 %v2074_v12  ;;  %1610 = vmatprep.subr.mxu1 %v1805_v21 }
  0x3a   :  { %1611 = vmatpush3.msra.mxu1 %v1805_v21  ;;  %1551 = vmatprep.mubr.f32.mxu1 %v2076_v48 }
  0x3b   :  { %1575 = vmatprep.mubr.f32.mxu0 %v1915_v6  ;;  %1612 = vmatprep.subr.mxu1 %v1811_v23 }
  0x3c   :  { %1576 = vmatmul.mubr.f32.gmra.mxu0 %v1918_v7  ;;  %1613 = vmatpush3.msra.mxu1 %v1811_v23 }
  0x3d   :  { %1552 = vmatmul.mubr.f32.gmra.mxu1 %v2082_v43  ;;  %1638 = vmatprep.subr.mxu0 %v1818_v25 }
  0x3e   :  { %1578 = vmatprep.mubr.f32.mxu0 %v1965_v55  ;;  %1614 = vmatprep.mubr.f32.mxu1 %v2578_v24 }
  0x3f   :  { %1639 = vmatpush3.msra.mxu0 %v1818_v25  ;;  %1680 = vmatprep.subr.mxu1 %v1751_v3  ;;  %v2581_v25 = vand.u32 4294901760, %v1918_v7 }
  0x40   :  { %1579 = vmatmul.mubr.f32.gmra.mxu0 %v1977_v19  ;;  %1640 = vmatprep.subr.mxu0 %v1821_v26 }
  0x41   :  { %1615 = vmatmul.mubr.f32.vlgmr.msra.gmra.mxu1 %v2579_v40  ;;  %1581 = vmatprep.mubr.f32.mxu0 %v1983_v37 }
  0x42   :  { %1681 = vmatpush3.msra.mxu1 %v1751_v3  ;;  %1617 = vmatprep.mubr.f32.mxu1 %v2580_v52  ;;  %v2582_v3 = vand.u32 4294901760, %v1965_v55 }
  0x43   :  { %1641 = vmatpush3.msra.mxu0 %v1821_v26  ;;  %1682 = vmatprep.subr.mxu1 %v1753_v4  ;;  %v2584_v26 = vand.u32 4294901760, %v1983_v37 }
  0x44   :  { %1582 = vmatmul.mubr.f32.gmra.mxu0 %v2002_v45  ;;  %1683 = vmatpush3.msra.mxu1 %v1753_v4  ;;  %v2583_v4 = vand.u32 4294901760, %v1977_v19 }
  0x45   :  { %1618 = vmatmul.mubr.f32.gmra.mxu1 %v2581_v25  ;;  %1642 = vmatprep.subr.mxu0 %v1824_v27 }
  0x46   :  { %1584 = vmatprep.mubr.f32.mxu0 %v2011_v59  ;;  %1620 = vmatprep.mubr.f32.mxu1 %v2582_v3 }
  0x47   :  { %1643 = vmatpush3.msra.mxu0 %v1824_v27  ;;  %1684 = vmatprep.subr.mxu1 %v1755_v5  ;;  %v2585_v27 = vand.u32 4294901760, %v2002_v45 }
  0x48   :  { %1585 = vmatmul.mubr.f32.gmra.mxu0 %v2024_v20  ;;  %1644 = vmatprep.subr.mxu0 %v1829_v29 }
  0x49   :  { %1621 = vmatmul.mubr.f32.gmra.mxu1 %v2583_v4  ;;  %1645 = vmatpush3.msra.mxu0 %v1829_v29  ;;  %v2588_v29 = vand.u32 4294901760, %v2029_v49 }
  0x4a   :  { %1685 = vmatpush3.msra.mxu1 %v1755_v5  ;;  %1587 = vmatprep.mubr.f32.mxu0 %v2029_v49  ;;  %v2586_v5 = vand.u32 4294901760, %v2011_v59  ;;  %v2593_v49 = vld [vmem:[#allocation2_spill] sm:$0xff] }
  0x4b   :  { %1623 = vmatprep.mubr.f32.mxu1 %v2584_v26  ;;  %1686 = vmatprep.subr.mxu1 %v1766_v9 }
  0x4c   :  { %1588 = vmatmul.mubr.f32.gmra.mxu0 %v2051_v35  ;;  %1687 = vmatpush3.msra.mxu1 %v1766_v9  ;;  %v2587_v9 = vand.u32 4294901760, %v2024_v20 }
  0x4d   :  { %1624 = vmatmul.mubr.f32.gmra.mxu1 %v2585_v27  ;;  %1646 = vmatprep.subr.mxu0 %v1832_v30 }
  0x4e   :  { %1647 = vmatpush3.msra.mxu0 %v1832_v30  ;;  %1590 = vmatprep.mubr.f32.mxu0 %v2068_v13  ;;  %v2589_v30 = vand.u32 4294901760, %v2051_v35 }
  0x4f   :  { %1626 = vmatprep.mubr.f32.mxu1 %v2586_v5  ;;  %1688 = vmatprep.subr.mxu1 %v1768_v10  ;;  %v40_v5 = vld [vmem:[%s2554_s2 + $0x8] sm:$0xff] }
  0x50   :  { %1591 = vmatmul.mubr.f32.gmra.mxu0 %v2089_v8  ;;  %1648 = vmatprep.subr.mxu0 %v1873_v50 }
  0x51   :  { %1627 = vmatmul.mubr.f32.gmra.mxu1 %v2587_v9  ;;  %1649 = vmatpush3.msra.mxu0 %v1873_v50 }
  0x52   :  { %1689 = vmatpush3.msra.mxu1 %v1768_v10  ;;  %1650 = vmatprep.subr.mxu0 %v1897_v60  ;;  %v2591_v10 = vld [vmem:[#allocation4_spill] sm:$0xff] }
  0x53   :  { %1690 = vmatprep.subr.mxu1 %v1770_v11  ;;  %1593 = vmatprep.mubr.f32.mxu0 %v2092_v33 }
  0x54   :  { %1629 = vmatprep.mubr.f32.mxu1 %v2588_v29  ;;  %1651 = vmatpush3.msra.mxu0 %v1897_v60 }
  0x55   :  { %1691 = vmatpush3.msra.mxu1 %v1770_v11  ;;  %1594 = vmatmul.mubr.f32.gmra.mxu0 %v2097_v31 }
  0x56   :  { %1630 = vmatmul.mubr.f32.gmra.mxu1 %v2589_v30  ;;  %1652 = vmatprep.subr.mxu0 %v2590_v39 }
  0x57   :  { %1653 = vmatpush3.msra.mxu0 %v2590_v39  ;;  %1692 = vmatprep.subr.mxu1 %v1792_v17 }
  0x58   :  { %1654 = vmatprep.subr.mxu0 %v2591_v10  ;;  %1632 = vmatprep.mubr.f32.mxu1 %v2592_v46  ;;  %v39_v46 = vld [vmem:[%s2554_s2] sm:$0xff] }
  0x59   :  { %1655 = vmatpush3.msra.mxu0 %v2591_v10  ;;  %1656 = vmatprep.mubr.f32.mxu0 %v2593_v49 }
  0x5a   :  { %1693 = vmatpush3.msra.mxu1 %v1792_v17  ;;  %1657 = vmatmul.mubr.f32.vlgmr.msra.gmra.mxu0 %v1844_v36 }
  0x5b   :  { %1633 = vmatmul.mubr.f32.gmra.mxu1 %v310_v1  ;;  %1694 = vmatprep.subr.mxu1 %v1805_v21 }
  0x5c   :  { %1695 = vmatpush3.msra.mxu1 %v1805_v21  ;;  %1635 = vmatprep.mubr.f32.mxu1 %v320_v47 }
  0x5d   :  { %1659 = vmatprep.mubr.f32.mxu0 %v1888_v57  ;;  %1696 = vmatprep.subr.mxu1 %v1811_v23 }
  0x5e   :  { %1660 = vmatmul.mubr.f32.gmra.mxu0 %v1890_v58  ;;  %1697 = vmatpush3.msra.mxu1 %v1811_v23 }
  0x5f   :  { %1636 = vmatmul.mubr.f32.gmra.mxu1 %v330_v54  ;;  %1662 = vmatprep.mubr.f32.mxu0 %v1942_v38 }
  0x60   :  { %1698 = vmatprep.mubr.f32.mxu1 %v2593_v49  ;;  %v42_v49 = vld [vmem:[%s2554_s2 + $0x18] sm:$0xff] }
  0x62   :  { %1663 = vmatmul.mubr.f32.gmra.mxu0 %v1954_v44 }
  0x63   :  { %1699 = vmatmul.mubr.f32.vlgmr.msra.gmra.mxu1 %v1844_v36  ;;  %1665 = vmatprep.mubr.f32.mxu0 %v1967_v56 }
  0x64   :  { %1701 = vmatprep.mubr.f32.mxu1 %v1888_v57 }
  0x66   :  { %1666 = vmatmul.mubr.f32.gmra.mxu0 %v1985_v28 }
  0x67   :  { %1702 = vmatmul.mubr.f32.gmra.mxu1 %v1890_v58  ;;  %1668 = vmatprep.mubr.f32.mxu0 %v1992_v41 }
  0x68   :  { %1704 = vmatprep.mubr.f32.mxu1 %v1942_v38 }
  0x6a   :  { %1669 = vmatmul.mubr.f32.gmra.mxu0 %v2004_v53 }
  0x6b   :  { %1705 = vmatmul.mubr.f32.gmra.mxu1 %v1954_v44  ;;  %1671 = vmatprep.mubr.f32.mxu0 %v2013_v63 }
  0x6c   :  { %1707 = vmatprep.mubr.f32.mxu1 %v1967_v56 }
  0x6e   :  { %1672 = vmatmul.mubr.f32.gmra.mxu0 %v2031_v34 }
  0x6f   :  { %1708 = vmatmul.mubr.f32.gmra.mxu1 %v1985_v28  ;;  %1674 = vmatprep.mubr.f32.mxu0 %v2053_v15 }
  0x70   :  { %1710 = vmatprep.mubr.f32.mxu1 %v1992_v41 }
  0x72   :  { %1675 = vmatmul.mubr.f32.gmra.mxu0 %v2074_v12 }
  0x73   :  { %1711 = vmatmul.mubr.f32.gmra.mxu1 %v2004_v53  ;;  %1677 = vmatprep.mubr.f32.mxu0 %v2076_v48 }
  0x74   :  { %1713 = vmatprep.mubr.f32.mxu1 %v2013_v63 }
  0x76   :  { %1678 = vmatmul.mubr.f32.gmra.mxu0 %v2082_v43 }
  0x77   :  { %1714 = vmatmul.mubr.f32.gmra.mxu1 %v2031_v34 }
  0x78   :  { %1716 = vmatprep.mubr.f32.mxu1 %v2053_v15 }
  0x7b   :  { %1717 = vmatmul.mubr.f32.gmra.mxu1 %v2074_v12 }
  0x7c   :  { %1719 = vmatprep.mubr.f32.mxu1 %v2076_v48 }
  0x7f   :  { %1720 = vmatmul.mubr.f32.gmra.mxu1 %v2082_v43 }
  0xd6   :  { %v1490_v11 = vpop.f32.mrf.mxu0 }
  0xd7   :  { %v195_v39 = vadd.f32 %v1490_v11, %v40_v5  ;;  %v44_v11 = vld [vmem:[%s2554_s2 + $0x28] sm:$0xff] }
  0xd8   :  { %v2269_v17 = vpop.f32.mrf.mxu0 }
  0xda   :  { %v2271_v21 = vpop.f32.mrf.mxu0 }
  0xdc   :  { %v2273_v23 = vpop.f32.mrf.mxu0 }
  0xde   :  { %v2275_v36 = vpop.f32.mrf.mxu0 }
  0xdf   :  { %v2277_v50 = vpop.f32.mrf.mxu1 }
  0xe0   :  { %v2279_v57 = vpop.f32.mrf.mxu0  ;;  %v457_v5 = vadd.f32 %v2277_v50, %v195_v39  ;;  %v43_v50 = vld [vmem:[%s2554_s2 + $0x20] sm:$0xff]  ;;  %v46_v39 = vld [vmem:[%s2554_s2 + $0x38] sm:$0xff] }
  0xe1   :  { %v2281_v58 = vpop.f32.mrf.mxu1 }
  0xe2   :  { %v2283_v60 = vpop.f32.mrf.mxu0 }
  0xe3   :  { %v2285_v61 = vpop.f32.mrf.mxu1 }
  0xe4   :  { %v2287_v62 = vpop.f32.mrf.mxu0 }
  0xe5   :  { %v2289_v6 = vpop.f32.mrf.mxu1 }
  0xe6   :  { %v2291_v7 = vpop.f32.mrf.mxu0 }
  0xe7   :  { %v2293_v13 = vpop.f32.mrf.mxu1 }
  0xe8   :  { %v2295_v28 = vpop.f32.mrf.mxu0 }
  0xe9   :  { %v2297_v38 = vpop.f32.mrf.mxu1 }
  0xea   :  { %v2299_v44 = vpop.f32.mrf.mxu0 }
  0xeb   :  { %v2301_v55 = vpop.f32.mrf.mxu1 }
  0xec   :  { %v2303_v56 = vpop.f32.mrf.mxu0 }
  0xed   :  { %v2305_v19 = vpop.f32.mrf.mxu1 }
  0xee   :  { %v2307_v37 = vpop.f32.mrf.mxu0 }
  0xef   :  { %v2309_v41 = vpop.f32.mrf.mxu1 }
  0xf0   :  { %v2311_v45 = vpop.f32.mrf.mxu0 }
  0xf1   :  { %v2313_v53 = vpop.f32.mrf.mxu1 }
  0xf3   :  { %v2315_v59 = vpop.f32.mrf.mxu0 }
  0xf4   :  { %v2317_v63 = vpop.f32.mrf.mxu1 }
  0xf5   :  { %v2319_v20 = vpop.f32.mrf.mxu0 }
  0xf6   :  { %2594 = vst [vmem:[#allocation3_spill] sm:$0xff] %v2319_v20  ;;  %v2321_v34 = vpop.f32.mrf.mxu1  ;;  %v41_v20 = vld [vmem:[%s2554_s2 + $0x10] sm:$0xff] }
  0xf8   :  { %v1574_v8 = vpop.f32.mrf.mxu0 }
  0xf9   :  { %v2323_v35 = vpop.f32.mrf.mxu1 }
  0xfa   :  { %2595 = vst [vmem:[#allocation4_spill] sm:$0xff] %v2323_v35  ;;  %v630_v15 = vpop.f32.mrf.mxu0 }
  0xfb   :  { %v2325_v12 = vpop.f32.mrf.mxu1 }
  0xfc   :  { %2596 = vst [vmem:[#allocation2_spill] sm:$0xff] %v2325_v12  ;;  %v1577_v48 = vpop.f32.mrf.mxu0 }
  0xfd   :  { %v2327_v31 = vpop.f32.mrf.mxu1 }
  0xfe   :  { %2597 = vst [vmem:[#allocation5_spill] sm:$0xff] %v2327_v31  ;;  %v2329_v43 = vpop.f32.mrf.mxu0  ;;  %v215_v31 = vadd.f32 %v2271_v21, %v42_v49 }
  0xff   :  { %v2331_v33 = vpop.f32.mrf.mxu1 }
 0x100   :  { %2598 = vst [vmem:[#allocation6_spill] sm:$0xff] %v2331_v33  ;;  %v2333_v16 = vpop.f32.mrf.mxu0  ;;  %v469_v49 = vadd.f32 %v2285_v61, %v215_v31  ;;  %v45_v61 = vld [vmem:[%s2554_s2 + $0x30] sm:$0xff] }
 0x101   :  { %v1616_v1 = vpop.f32.mrf.mxu1 }
 0x102   :  { %v2335_v47 = vpop.f32.mrf.mxu0 }
 0x103   :  { %v817_v2 = vpop.f32.mrf.mxu1 }
 0x104   :  { %v2337_v0 = vpop.f32.mrf.mxu0 }
 0x105   :  { %v1619_v54 = vpop.f32.mrf.mxu1 }
 0x106   :  { %v2339_v18 = vpop.f32.mrf.mxu0 }
 0x107   :  { %v2341_v42 = vpop.f32.mrf.mxu1 }
 0x108   :  { %v2343_v51 = vpop.f32.mrf.mxu0 }
 0x109   :  { %v2345_v22 = vpop.f32.mrf.mxu1 }
 0x10a   :  { %v2347_v14 = vpop.f32.mrf.mxu0 }
 0x10b   :  { %v2349_v32 = vpop.f32.mrf.mxu1 }
 0x10c   :  { %v2351_v24 = vpop.f32.mrf.mxu0 }
 0x10d   :  { %v2353_v40 = vpop.f32.mrf.mxu1 }
 0x10e   :  { %v2355_v52 = vpop.f32.mrf.mxu0 }
 0x10f   :  { %2599 = vst [vmem:[#allocation7_spill] sm:$0xff] %v2355_v52  ;;  %v2357_v25 = vpop.f32.mrf.mxu1 }
 0x110   :  { %v2359_v3 = vpop.f32.mrf.mxu0 }
 0x111   :  { %2600 = vst [vmem:[#allocation8_spill] sm:$0xff] %v2359_v3  ;;  %v2361_v4 = vpop.f32.mrf.mxu1 }
 0x112   :  { %v2363_v26 = vpop.f32.mrf.mxu0 }
 0x113   :  { %2601 = vst [vmem:[#allocation9_spill] sm:$0xff] %v2363_v26  ;;  %v2365_v27 = vpop.f32.mrf.mxu1 }
 0x115   :  { %v2370_v9 = vpop.f32.mrf.mxu0 }
 0x116   :  { %2602 = vst [vmem:[#allocation10_spill] sm:$0xff] %v2370_v9  ;;  %v2372_v29 = vpop.f32.mrf.mxu1  ;;  %v185_v9 = vadd.f32 %v2269_v17, %v39_v46  ;;  %v235_v17 = vadd.f32 %v2275_v36, %v44_v11  ;;  %v205_v46 = vadd.f32 %v2273_v23, %v41_v20  ;;  %v652_v11 = vadd.f32 %v1577_v48, %v469_v49 }
 0x117   :  { %2603 = vst [vmem:[#allocation11_spill] sm:$0xff] %v2372_v29  ;;  %v2374_v30 = vpop.f32.mrf.mxu0  ;;  %v255_v29 = vadd.f32 %v2283_v60, %v46_v39 }
 0x118   :  { %2604 = vst [vmem:[#allocation12_spill] sm:$0xff] %v2374_v30  ;;  %v2376_v10 = vpop.f32.mrf.mxu1  ;;  %v451_v3 = vadd.f32 %v2281_v58, %v185_v9  ;;  %v463_v36 = vadd.f32 %v2289_v6, %v205_v46  ;;  %v481_v52 = vadd.f32 %v2293_v13, %v235_v17  ;;  %v48_v6 = vld [vmem:[%s2554_s2 + $0x48] sm:$0xff]  ;;  %v842_v48 = vadd.f32 %v1619_v54, %v652_v11 }
 0x119   :  { %2605 = vst [vmem:[#allocation13_spill] sm:$0xff] %v2376_v10  ;;  %v493_v54 = vadd.f32 %v2301_v55, %v255_v29 }
 0x11a   :  { %v1658_v33 = vpop.f32.mrf.mxu0  ;;  %v666_v13 = vadd.f32 %v2333_v16, %v481_v52  ;;  %v47_v16 = vld [vmem:[%s2554_s2 + $0x40] sm:$0xff] }
 0x11b   :  { %v2384_v26 = vpop.f32.mrf.mxu1  ;;  %v680_v17 = vadd.f32 %v2337_v0, %v493_v54  ;;  %v49_v0 = vld [vmem:[%s2554_s2 + $0x50] sm:$0xff] }
 0x11c   :  { %2606 = vst [vmem:[#allocation14_spill] sm:$0xff] %v2384_v26  ;;  %v1035_v30 = vpop.f32.mrf.mxu0  ;;  %v638_v26 = vadd.f32 %v1574_v8, %v457_v5  ;;  %v858_v52 = vadd.f32 %v2345_v22, %v666_v13 }
 0x11d   :  { %v2395_v10 = vpop.f32.mrf.mxu1 }
 0x11e   :  { %2607 = vst [vmem:[#allocation15_spill] sm:$0xff] %v2395_v10  ;;  %v1661_v12 = vpop.f32.mrf.mxu0  ;;  %v631_v10 = vadd.f32 %v630_v15, %v451_v3  ;;  %v826_v58 = vadd.f32 %v1616_v1, %v638_v26  ;;  %v645_v15 = vadd.f32 %v2329_v43, %v463_v36  ;;  %v245_v43 = vadd.f32 %v2287_v62, %v45_v61 }
 0x11f   :  { %v2399_v21 = vpop.f32.mrf.mxu1  ;;  %v1054_v3 = vadd.f32 %v1661_v12, %v842_v48  ;;  %v50_v12 = vld [vmem:[%s2554_s2 + $0x58] sm:$0xff]  ;;  %v285_v61 = vadd.f32 %v2303_v56, %v49_v0 }
 0x120   :  { %2608 = vst [vmem:[#allocation16_spill] sm:$0xff] %v2399_v21  ;;  %v1047_v8 = vpop.f32.mrf.mxu0  ;;  %v818_v5 = vadd.f32 %v817_v2, %v631_v10  ;;  %v1042_v23 = vadd.f32 %v1658_v33, %v826_v58  ;;  %v225_v21 = vadd.f32 %v2279_v57, %v43_v50  ;;  %v834_v2 = vadd.f32 %v2341_v42, %v645_v15 }
 0x121   :  { %v2409_v9 = vpop.f32.mrf.mxu1  ;;  %v487_v55 = vadd.f32 %v2305_v19, %v245_v43  ;;  %v265_v50 = vadd.f32 %v2295_v28, %v47_v16  ;;  %v295_v39 = vadd.f32 %v2299_v44, %v50_v12  ;;  %v2612_v16 = vld [vmem:[#allocation2_spill] sm:$0xff] }
 0x122   :  { %v1664_v20 = vpop.f32.mrf.mxu0  ;;  %v1036_v31 = vadd.f32 %v1035_v30, %v818_v5  ;;  %v475_v60 = vadd.f32 %v2297_v38, %v225_v21  ;;  %v1048_v30 = vadd.f32 %v1047_v8, %v834_v2  ;;  %v874_v8 = vadd.f32 %v2353_v40, %v680_v17  ;;  %v2615_v17 = vld [vmem:[#allocation3_spill] sm:$0xff] }
 0x123   :  { %v1700_v35 = vpop.f32.mrf.mxu1  ;;  %v1066_v46 = vadd.f32 %v1664_v20, %v858_v52  ;;  %v673_v58 = vadd.f32 %v2339_v18, %v487_v55  ;;  %v517_v15 = vadd.f32 %v2317_v63, %v295_v39  ;;  %v511_v63 = vadd.f32 %v2321_v34, %v285_v61  ;;  %v2613_v52 = vld [vmem:[#allocation8_spill] sm:$0xff] }
 0x124   :  { %v1212_v33 = vadd.f32 %v1700_v35, %v1042_v23  ;;  %v1059_v57 = vpop.f32.mrf.mxu0  ;;  %v275_v35 = vadd.f32 %v2291_v7, %v48_v6  ;;  %v659_v42 = vadd.f32 %v2335_v47, %v475_v60 }
 0x125   :  { %v1205_v1 = vpop.f32.mrf.mxu1  ;;  %v866_v23 = vadd.f32 %v2357_v25, %v673_v58  ;;  %v54_v25 = vld [vmem:[%s2554_s2 + $0x78] sm:$0xff]  ;;  %v708_v60 = vadd.f32 %v2351_v24, %v517_v15  ;;  %v53_v24 = vld [vmem:[%s2554_s2 + $0x70] sm:$0xff]  ;;  %v2619_v58 = vld [vmem:[#allocation6_spill] sm:$0xff] }
 0x126   :  { %1301 = vst.msk [vmem:[%s2555_s3 + $0x8] sm:$0xff] %vm1299_vm1, %v1212_v33  ;;  %v1206_v26 = vadd.f32 %v1205_v1, %v1036_v31  ;;  %v1667_v10 = vpop.f32.mrf.mxu0  ;;  %v850_v21 = vadd.f32 %v2349_v32, %v659_v42  ;;  %v505_v49 = vadd.f32 %v2309_v41, %v275_v35  ;;  %v52_v32 = vld [vmem:[%s2554_s2 + $0x68] sm:$0xff]  ;;  %v499_v41 = vadd.f32 %v2313_v53, %v265_v50  ;;  %v2617_v50 = vld [vmem:[#allocation9_spill] sm:$0xff] }
 0x127   :  { %v1703_v38 = vpop.f32.mrf.mxu1  ;;  %v1078_v20 = vadd.f32 %v1667_v10, %v874_v8  ;;  %v315_v6 = vadd.f32 %v2307_v37, %v52_v32  ;;  %v2611_v35 = vld [vmem:[#allocation11_spill] sm:$0xff] }
 0x128   :  { %1300 = vst.msk [vmem:[%s2555_s3] sm:$0xff] %vm1299_vm1, %v1206_v26  ;;  %v1224_v62 = vadd.f32 %v1703_v38, %v1054_v3  ;;  %v1071_v7 = vpop.f32.mrf.mxu0  ;;  %v1060_v36 = vadd.f32 %v1059_v57, %v850_v21  ;;  %v694_v5 = vadd.f32 %v2343_v51, %v505_v49  ;;  %v51_v51 = vld [vmem:[%s2554_s2 + $0x60] sm:$0xff]  ;;  %v687_v48 = vadd.f32 %v2347_v14, %v499_v41  ;;  %v2609_v26 = vld [vmem:[#allocation4_spill] sm:$0xff] }
 0x129   :  { %v1217_v29 = vpop.f32.mrf.mxu1  ;;  %v1072_v33 = vadd.f32 %v1071_v7, %v866_v23  ;;  %v305_v2 = vadd.f32 %v2311_v45, %v51_v51  ;;  %v335_v3 = vadd.f32 %v2315_v59, %v54_v25  ;;  %v529_v10 = vadd.f32 %v2609_v26, %v315_v6  ;;  %v2618_v49 = vld [vmem:[#allocation14_spill] sm:$0xff]  ;;  %v2623_v6 = vld [vmem:[#allocation16_spill] sm:$0xff] }
 0x12a   :  { %1303 = vst.msk [vmem:[%s2555_s3 + $0x18] sm:$0xff] %vm1299_vm1, %v1224_v62  ;;  %v1218_v47 = vadd.f32 %v1217_v29, %v1048_v30  ;;  %v1670_v22 = vpop.f32.mrf.mxu0  ;;  %v890_v31 = vadd.f32 %v2361_v4, %v694_v5  ;;  %v882_v1 = vadd.f32 %v2365_v27, %v687_v48  ;;  %v2610_v27 = vld [vmem:[#allocation7_spill] sm:$0xff]  ;;  %v906_v54 = vadd.f32 %v2611_v35, %v708_v60  ;;  %v2614_v62 = vld [vmem:[#allocation13_spill] sm:$0xff] }
 0x12b   :  { %v1706_v19 = vpop.f32.mrf.mxu1  ;;  %v701_v43 = vadd.f32 %v2610_v27, %v511_v63  ;;  %v523_v59 = vadd.f32 %v2612_v16, %v305_v2  ;;  %v722_v30 = vadd.f32 %v2613_v52, %v529_v10  ;;  %v325_v21 = vadd.f32 %v2615_v17, %v53_v24 }
 0x12c   :  { %1302 = vst.msk [vmem:[%s2555_s3 + $0x10] sm:$0xff] %vm1299_vm1, %v1218_v47  ;;  %v1236_v28 = vadd.f32 %v1706_v19, %v1066_v46  ;;  %v1083_v44 = vpop.f32.mrf.mxu0  ;;  %v1090_v13 = vadd.f32 %v1670_v22, %v890_v31  ;;  %v2616_v46 = vld [vmem:[#allocation5_spill] sm:$0xff] }
 0x12d   :  { %v1229_v11 = vpop.f32.mrf.mxu1  ;;  %v1084_v38 = vadd.f32 %v1083_v44, %v882_v1  ;;  %v898_v7 = vadd.f32 %v2614_v62, %v701_v43  ;;  %v541_v47 = vadd.f32 %v2616_v46, %v335_v3  ;;  %v715_v39 = vadd.f32 %v2617_v50, %v523_v59  ;;  %v2620_v44 = vld [vmem:[#allocation10_spill] sm:$0xff] }
 0x12e   :  { %1305 = vst.msk [vmem:[%s2555_s3 + $0x28] sm:$0xff] %vm1299_vm1, %v1236_v28  ;;  %v1230_v18 = vadd.f32 %v1229_v11, %v1060_v36  ;;  %v1673_v40 = vpop.f32.mrf.mxu0  ;;  %v922_v19 = vadd.f32 %v2618_v49, %v722_v30  ;;  %v535_v8 = vadd.f32 %v2619_v58, %v325_v21  ;;  %v2621_v11 = vld [vmem:[#allocation15_spill] sm:$0xff] }
 0x12f   :  { %v1709_v53 = vpop.f32.mrf.mxu1  ;;  %v1102_v55 = vadd.f32 %v1673_v40, %v906_v54  ;;  %v736_v41 = vadd.f32 %v2620_v44, %v541_v47  ;;  %v914_v5 = vadd.f32 %v2621_v11, %v715_v39  ;;  %v2622_v40 = vld [vmem:[#allocation12_spill] sm:$0xff] }
 0x130   :  { %1304 = vst.msk [vmem:[%s2555_s3 + $0x20] sm:$0xff] %vm1299_vm1, %v1230_v18  ;;  %v1248_v56 = vadd.f32 %v1709_v53, %v1078_v20  ;;  %v1095_v37 = vpop.f32.mrf.mxu0  ;;  %v729_v61 = vadd.f32 %v2622_v40, %v535_v8 }
 0x131   :  { %v1241_v57 = vpop.f32.mrf.mxu1  ;;  %v1096_v0 = vadd.f32 %v1095_v37, %v898_v7  ;;  %v938_v15 = vadd.f32 %v2623_v6, %v736_v41 }
 0x132   :  { %1307 = vst.msk [vmem:[%s2555_s3 + $0x38] sm:$0xff] %vm1299_vm1, %v1248_v56  ;;  %v1242_v14 = vadd.f32 %v1241_v57, %v1072_v33  ;;  %v1676_v4 = vpop.f32.mrf.mxu0  ;;  %v930_v31 = vadd.f32 %v2409_v9, %v729_v61 }
 0x133   :  { %v1712_v34 = vpop.f32.mrf.mxu1  ;;  %v1114_v23 = vadd.f32 %v1676_v4, %v922_v19 }
 0x134   :  { %1306 = vst.msk [vmem:[%s2555_s3 + $0x30] sm:$0xff] %vm1299_vm1, %v1242_v14  ;;  %v1260_v45 = vadd.f32 %v1712_v34, %v1090_v13  ;;  %v1107_v12 = vpop.f32.mrf.mxu0 }
 0x135   :  { %v1253_v42 = vpop.f32.mrf.mxu1  ;;  %v1108_v53 = vadd.f32 %v1107_v12, %v914_v5 }
 0x136   :  { %1309 = vst.msk [vmem:[%s2555_s3 + $0x48] sm:$0xff] %vm1299_vm1, %v1260_v45  ;;  %v1254_v29 = vadd.f32 %v1253_v42, %v1084_v38  ;;  %v1679_v36 = vpop.f32.mrf.mxu0 }
 0x137   :  { %v1715_v22 = vpop.f32.mrf.mxu1  ;;  %v1126_v33 = vadd.f32 %v1679_v36, %v938_v15 }
 0x138   :  { %1308 = vst.msk [vmem:[%s2555_s3 + $0x40] sm:$0xff] %vm1299_vm1, %v1254_v29  ;;  %v1272_v32 = vadd.f32 %v1715_v22, %v1102_v55  ;;  %v1119_v25 = vpop.f32.mrf.mxu0 }
 0x139   :  { %v1265_v28 = vpop.f32.mrf.mxu1  ;;  %v1120_v63 = vadd.f32 %v1119_v25, %v930_v31 }
 0x13a   :  { %1311 = vst.msk [vmem:[%s2555_s3 + $0x58] sm:$0xff] %vm1299_vm1, %v1272_v32  ;;  %v1266_v20 = vadd.f32 %v1265_v28, %v1096_v0 }
 0x13b   :  { %v1718_v18 = vpop.f32.mrf.mxu1 }
 0x13c   :  { %1310 = vst.msk [vmem:[%s2555_s3 + $0x50] sm:$0xff] %vm1299_vm1, %v1266_v20  ;;  %v1284_v51 = vadd.f32 %v1718_v18, %v1114_v23 }
 0x13d   :  { %v1277_v48 = vpop.f32.mrf.mxu1 }
 0x13e   :  { %1313 = vst.msk [vmem:[%s2555_s3 + $0x68] sm:$0xff] %vm1299_vm1, %v1284_v51  ;;  %v1278_v56 = vadd.f32 %v1277_v48, %v1108_v53 }
 0x13f   :  { %v1721_v37 = vpop.f32.mrf.mxu1 }
 0x140   :  { %1312 = vst.msk [vmem:[%s2555_s3 + $0x60] sm:$0xff] %vm1299_vm1, %v1278_v56  ;;  %v1296_v57 = vadd.f32 %v1721_v37, %v1126_v33 }
 0x141   :  { %v1289_v60 = vpop.f32.mrf.mxu1 }
 0x142   :  { %1315 = vst.msk [vmem:[%s2555_s3 + $0x78] sm:$0xff] %vm1299_vm1, %v1296_v57  ;;  %v1290_v9 = vadd.f32 %v1289_v60, %v1120_v63 }
 0x144   :  { %1314 = vst.msk [vmem:[%s2555_s3 + $0x70] sm:$0xff] %vm1299_vm1, %v1290_v9 }

// kernel: _lambda_.12
= control target key start
LH: loop header
LB: loop body
LE: loop exit
PB: predicated region body
PF: predicated region fallthrough
CT: control target
= control target key end

     0   :  { %s1604_s15 = smov 0   ;;  %s2009_s0 = inlined_call_operand.vmem [shape: f32[2,64,72], index: 0, kind: input, shape index: {}]   ;;  %s2010_s1 = inlined_call_operand.vmem [shape: f32[72,8], index: 1, kind: input, shape index: {}]   ;;  %s2011_s2 = inlined_call_operand.vmem [shape: f32[1,8], index: 2, kind: input, shape index: {}]   ;;  %s2012_s3 = inlined_call_operand.vmem [shape: f32[1,8], index: 3, kind: input, shape index: {}]   ;;  %s2013_s4 = inlined_call_operand.vmem [shape: f32[2,64,8], index: 4, kind: output, shape index: {}]  }
   0x1 LB: > { %s1264_s16 = sadd.s32 4294967295, %s1577_s15   ;;  %p1268_p0 = scmp.ge.s32.totalorder %s1577_s15, 1  ;;  %s1577_s15 = sphi %s1604_s15, %s14_s15  }
   0x2   : > { %p162_p1 = scmp.lt.s32.totalorder %s1577_s15, 3 }
   0x4   : > { %p163_p2 = pnand %p1268_p0, %p162_p1 }
   0x5   : > { %p1621_p3 = scmp.lt.s32.totalorder (!%p163_p2), %s1264_s16, 1 }
   0x6   : > { %166 = sbr.rel (%p163_p2) target bundleno = 381 (0x17d), region = 36 }
   0xb   : > { %v214_v0 = vld [vmem:[%s2010_s1 + $0x40] sm:$0xff]  ;;  %v213_v1 = vld [vmem:[%s2010_s1 + $0x38] sm:$0xff]  ;;  %v212_v2 = vld [vmem:[%s2010_s1 + $0x30] sm:$0xff]  ;;  %s2016_s16 = smov (!%p1621_p3, %s1264_s16), 1  ;;  %vm215_vm0 = vcmask 588800   ;;  %vm1091_vm1 = vcmask 64512  }
   0xc   : > { %v1625_v3 = vand.u32 4294901760, %v214_v0  ;;  %v1627_v4 = vand.u32 4294901760, %v213_v1  ;;  %v1629_v5 = vand.u32 4294901760, %v212_v2  ;;  %v211_v6 = vld [vmem:[%s2010_s1 + $0x28] sm:$0xff]  ;;  %v210_v7 = vld [vmem:[%s2010_s1 + $0x20] sm:$0xff]  ;;  %v209_v8 = vld [vmem:[%s2010_s1 + $0x18] sm:$0xff] }
   0xd   : > { %v1640_v9 = vand.u32 4294901760, %v211_v6  ;;  %v1642_v10 = vand.u32 4294901760, %v210_v7  ;;  %v1644_v11 = vand.u32 4294901760, %v209_v8  ;;  %v208_v12 = vld [vmem:[%s2010_s1 + $0x10] sm:$0xff]  ;;  %v207_v13 = vld [vmem:[%s2010_s1 + $0x8] sm:$0xff]  ;;  %s1277_s8 = sshll.u32 %s2016_s16, 6 }
   0xe   : > { %1381 = vmatprep.subr.mxu0 %v1625_v3  ;;  %v1654_v14 = vsub.f32 %v214_v0, %v1625_v3  ;;  %v1657_v15 = vsub.f32 %v213_v1, %v1627_v4  ;;  %v1659_v16 = vand.u32 4294901760, %v208_v12  ;;  %v1662_v17 = vsub.f32 %v212_v2, %v1629_v5  ;;  %s1703_s11 = scalar_lea.vmem %s2009_s0, %s1277_s8  ;;  %v206_v31 = vld [vmem:[%s2010_s1] sm:$0xff]  ;;  %s197_s22 = scalar_lea.vmem %s2013_s4, %s1277_s8 }
   0xf   : > { %1382 = vmatpush3.msra.mxu0 %v1625_v3  ;;  %v1669_v18 = vand.u32 4294901760, %v207_v13  ;;  %v1672_v19 = vsub.f32 %v211_v6, %v1640_v9  ;;  %v1675_v20 = vsub.f32 %v210_v7, %v1642_v10  ;;  %v1689_v24 = vsub.f32 %v209_v8, %v1644_v11  ;;  %v198_v32 = vld [vmem:[%s1703_s11] sm:$0xff]  ;;  %v199_v34 = vld [vmem:[%s1703_s11 + $0x8] sm:$0xff]  ;;  %v200_v39 = vld [vmem:[%s1703_s11 + $0x10] sm:$0xff] }
  0x10   : > { %1383 = vmatprep.subr.mxu0 %v1627_v4  ;;  %v1679_v21 = vand.u32 4294901760, %v1654_v14  ;;  %v1682_v22 = vand.u32 4294901760, %v1657_v15  ;;  %v1685_v23 = vand.u32 4294901760, %v1662_v17  ;;  %v1706_v27 = vsub.f32 %v208_v12, %v1659_v16  ;;  %v201_v44 = vld [vmem:[%s1703_s11 + $0x18] sm:$0xff]  ;;  %v202_v52 = vld [vmem:[%s1703_s11 + $0x20] sm:$0xff]  ;;  %v203_v1 = vld [vmem:[%s1703_s11 + $0x28] sm:$0xff] }
  0x11   : > { %1384 = vmatpush3.msra.mxu0 %v1627_v4  ;;  %v1693_v25 = vand.u32 4294901760, %v1672_v19  ;;  %v1696_v26 = vand.u32 4294901760, %v1675_v20  ;;  %v1720_v33 = vand.u32 4294901760, %v1689_v24  ;;  %v217_v36 = vsel %vm215_vm0, %v198_v32, 0  ;;  %v204_v2 = vld [vmem:[%s1703_s11 + $0x30] sm:$0xff] }
  0x12   : > { %1385 = vmatprep.subr.mxu0 %v1629_v5  ;;  %v412_v28 = vsub.f32 %v1654_v14, %v1679_v21  ;;  %v419_v29 = vsub.f32 %v1657_v15, %v1682_v22  ;;  %v426_v30 = vsub.f32 %v1662_v17, %v1685_v23  ;;  %v220_v37 = vsel %vm215_vm0, %v199_v34, 0 }
  0x13   : > { %1386 = vmatpush3.msra.mxu0 %v1629_v5  ;;  %v433_v35 = vsub.f32 %v1672_v19, %v1693_v25  ;;  %v1729_v38 = vsub.f32 %v207_v13, %v1669_v18  ;;  %v440_v42 = vsub.f32 %v1675_v20, %v1696_v26  ;;  %v1735_v43 = vand.u32 4294901760, %v217_v36 }
  0x14   : > { %1387 = vmatprep.subr.mxu0 %v1640_v9  ;;  %v413_v40 = vand.u32 4294901760, %v412_v28  ;;  %v420_v41 = vand.u32 4294901760, %v419_v29  ;;  %v427_v45 = vand.u32 4294901760, %v426_v30  ;;  %v1739_v46 = vand.u32 4294901760, %v206_v31 }
  0x15   : > { %1388 = vmatpush3.msra.mxu0 %v1640_v9  ;;  %v1741_v47 = vand.u32 4294901760, %v220_v37  ;;  %v1745_v48 = vsub.f32 %v217_v36, %v1735_v43  ;;  %v447_v49 = vsub.f32 %v1689_v24, %v1720_v33  ;;  %v1750_v50 = vand.u32 4294901760, %v1706_v27  ;;  %1429 = vmatprep.mubr.f32.mxu1 %v1735_v43 }
  0x16   : > { %1389 = vmatprep.subr.mxu0 %v1642_v10  ;;  %1411 = vmatprep.subr.mxu1 %v413_v40  ;;  %v223_v51 = vsel %vm215_vm0, %v200_v39, 0  ;;  %v434_v53 = vand.u32 4294901760, %v433_v35  ;;  %v226_v56 = vsel %vm215_vm0, %v201_v44, 0  ;;  %v441_v57 = vand.u32 4294901760, %v440_v42 }
  0x17   : > { %1390 = vmatpush3.msra.mxu0 %v1642_v10  ;;  %1412 = vmatpush3.msra.mxu1 %v413_v40  ;;  %v1756_v54 = vsub.f32 %v220_v37, %v1741_v47  ;;  %v1758_v55 = vand.u32 4294901760, %v223_v51  ;;  %v316_v58 = vand.u32 4294901760, %v1745_v48  ;;  %v1764_v59 = vand.u32 4294901760, %v1729_v38 }
  0x18   : > { %1391 = vmatprep.subr.mxu0 %v1644_v11  ;;  %1413 = vmatprep.subr.mxu1 %v420_v41  ;;  %v1766_v60 = vand.u32 4294901760, %v226_v56  ;;  %v1774_v63 = vsub.f32 %v206_v31, %v1739_v46  ;;  %v229_v0 = vsel %vm215_vm0, %v202_v52, 0  ;;  %v448_v7 = vand.u32 4294901760, %v447_v49  ;;  %v205_v31 = vld [vmem:[%s1703_s11 + $0x38] sm:$0xff] }
  0x19   : > { %1392 = vmatpush3.msra.mxu0 %v1644_v11  ;;  %1414 = vmatpush3.msra.mxu1 %v420_v41  ;;  %v326_v61 = vand.u32 4294901760, %v1756_v54  ;;  %v1771_v62 = vsub.f32 %v223_v51, %v1758_v55  ;;  %v317_v6 = vsub.f32 %v1745_v48, %v316_v58  ;;  %v454_v8 = vsub.f32 %v1706_v27, %v1750_v50 }
  0x1a   : > { %1393 = vmatprep.subr.mxu0 %v1659_v16  ;;  %1415 = vmatprep.subr.mxu1 %v427_v45  ;;  %v1786_v12 = vsub.f32 %v226_v56, %v1766_v60  ;;  %v1794_v29 = vand.u32 4294901760, %v1774_v63  ;;  %v1796_v30 = vand.u32 4294901760, %v229_v0  ;;  %v232_v35 = vsel %vm215_vm0, %v203_v1, 0 }
  0x1b   : > { %1394 = vmatpush3.msra.mxu0 %v1659_v16  ;;  %1416 = vmatpush3.msra.mxu1 %v427_v45  ;;  %v327_v13 = vsub.f32 %v1756_v54, %v326_v61  ;;  %v336_v28 = vand.u32 4294901760, %v1771_v62  ;;  %v318_v32 = vand.u32 4294901760, %v317_v6  ;;  %v235_v36 = vsel %vm215_vm0, %v204_v2, 0 }
  0x1c   : > { %1395 = vmatprep.subr.mxu0 %v1669_v18  ;;  %1417 = vmatprep.subr.mxu1 %v434_v53  ;;  %v346_v34 = vand.u32 4294901760, %v1786_v12  ;;  %v461_v39 = vsub.f32 %v1729_v38, %v1764_v59  ;;  %v1807_v40 = vsub.f32 %v229_v0, %v1796_v30  ;;  %v1813_v42 = vand.u32 4294901760, %v232_v35 }
  0x1d   : > { %1396 = vmatpush3.msra.mxu0 %v1669_v18  ;;  %1418 = vmatpush3.msra.mxu1 %v434_v53  ;;  %v328_v37 = vand.u32 4294901760, %v327_v13  ;;  %v337_v41 = vsub.f32 %v1771_v62, %v336_v28  ;;  %v1815_v44 = vand.u32 4294901760, %v235_v36  ;;  %v238_v45 = vsel %vm215_vm0, %v205_v31, 0 }
  0x1e   : > { %1397 = vmatprep.subr.mxu0 %v1739_v46  ;;  %1419 = vmatprep.subr.mxu1 %v441_v57  ;;  %v455_v49 = vand.u32 4294901760, %v454_v8  ;;  %v468_v51 = vsub.f32 %v1774_v63, %v1794_v29  ;;  %v1821_v52 = vand.u32 4294901760, %v238_v45  ;;  %v347_v53 = vsub.f32 %v1786_v12, %v346_v34 }
  0x1f   : > { %1398 = vmatpush3.msra.mxu0 %v1739_v46  ;;  %1420 = vmatpush3.msra.mxu1 %v441_v57  ;;  %v356_v56 = vand.u32 4294901760, %v1807_v40  ;;  %v1828_v0 = vsub.f32 %v232_v35, %v1813_v42  ;;  %v462_v57 = vand.u32 4294901760, %v461_v39  ;;  %v338_v1 = vand.u32 4294901760, %v337_v41 }
  0x20   : > { %1399 = vmatprep.mubr.f32.mxu0 %v318_v32  ;;  %1421 = vmatprep.subr.mxu1 %v448_v7  ;;  %v1834_v6 = vsub.f32 %v235_v36, %v1815_v44  ;;  %v469_v8 = vand.u32 4294901760, %v468_v51  ;;  %v1838_v13 = vsub.f32 %v238_v45, %v1821_v52  ;;  %v348_v31 = vand.u32 4294901760, %v347_v53 }
  0x21   : > { %1441 = vmatprep.subr.mxu0 %v1654_v14  ;;  %1400 = vmatmul.mubr.f32.vlgmr.msra.gmra.mxu0 %v328_v37  ;;  %v366_v2 = vand.u32 4294901760, %v1828_v0 }
  0x22   : > { %1422 = vmatpush3.msra.mxu1 %v448_v7  ;;  %1442 = vmatpush3.msra.mxu0 %v1654_v14  ;;  %v357_v14 = vsub.f32 %v1807_v40, %v356_v56  ;;  %v376_v32 = vand.u32 4294901760, %v1834_v6 }
  0x23   : > { %1423 = vmatprep.subr.mxu1 %v455_v49  ;;  %1443 = vmatprep.subr.mxu0 %v1657_v15  ;;  %v367_v7 = vsub.f32 %v1828_v0, %v366_v2 }
  0x24   : > { %1424 = vmatpush3.msra.mxu1 %v455_v49  ;;  %1444 = vmatpush3.msra.mxu0 %v1657_v15  ;;  %v386_v15 = vand.u32 4294901760, %v1838_v13  ;;  %v358_v35 = vand.u32 4294901760, %v357_v14  ;;  %v377_v37 = vsub.f32 %v1834_v6, %v376_v32 }
  0x25   : > { %1425 = vmatprep.subr.mxu1 %v462_v57  ;;  %1445 = vmatprep.subr.mxu0 %v1662_v17  ;;  %v368_v36 = vand.u32 4294901760, %v367_v7 }
  0x26   : > { %1402 = vmatprep.mubr.f32.mxu0 %v338_v1  ;;  %1426 = vmatpush3.msra.mxu1 %v462_v57 }
  0x27   : > { %1446 = vmatpush3.msra.mxu0 %v1662_v17  ;;  %1427 = vmatprep.subr.mxu1 %v469_v8  ;;  %v387_v17 = vsub.f32 %v1838_v13, %v386_v15 }
  0x28   : > { %1403 = vmatmul.mubr.f32.gmra.mxu0 %v348_v31  ;;  %1447 = vmatprep.subr.mxu0 %v1672_v19 }
  0x29   : > { %1428 = vmatpush3.msra.mxu1 %v469_v8  ;;  %1448 = vmatpush3.msra.mxu0 %v1672_v19  ;;  %v378_v19 = vand.u32 4294901760, %v377_v37  ;;  %v388_v39 = vand.u32 4294901760, %v387_v17 }
  0x2a   : > { %1430 = vmatmul.mubr.f32.vlgmr.msra.gmra.mxu1 %v1741_v47  ;;  %1449 = vmatprep.subr.mxu0 %v1675_v20 }
  0x2b   : > { %1471 = vmatprep.subr.mxu1 %v1625_v3  ;;  %1405 = vmatprep.mubr.f32.mxu0 %v358_v35 }
  0x2c   : > { %1450 = vmatpush3.msra.mxu0 %v1675_v20  ;;  %1472 = vmatpush3.msra.mxu1 %v1625_v3 }
  0x2d   : > { %1406 = vmatmul.mubr.f32.gmra.mxu0 %v368_v36  ;;  %1451 = vmatprep.subr.mxu0 %v1689_v24 }
  0x2e   : > { %1473 = vmatprep.subr.mxu1 %v1627_v4  ;;  %1432 = vmatprep.mubr.f32.mxu1 %v1758_v55 }
  0x2f   : > { %1452 = vmatpush3.msra.mxu0 %v1689_v24  ;;  %1474 = vmatpush3.msra.mxu1 %v1627_v4 }
  0x30   : > { %1453 = vmatprep.subr.mxu0 %v1706_v27  ;;  %1433 = vmatmul.mubr.f32.gmra.mxu1 %v1766_v60 }
  0x31   : > { %1475 = vmatprep.subr.mxu1 %v1629_v5  ;;  %1408 = vmatprep.mubr.f32.mxu0 %v378_v19 }
  0x32   : > { %1454 = vmatpush3.msra.mxu0 %v1706_v27  ;;  %1476 = vmatpush3.msra.mxu1 %v1629_v5 }
  0x33   : > { %1409 = vmatmul.mubr.f32.gmra.mxu0 %v388_v39  ;;  %1455 = vmatprep.subr.mxu0 %v1729_v38 }
  0x34   : > { %1477 = vmatprep.subr.mxu1 %v1640_v9  ;;  %1435 = vmatprep.mubr.f32.mxu1 %v1796_v30 }
  0x35   : > { %1456 = vmatpush3.msra.mxu0 %v1729_v38  ;;  %1478 = vmatpush3.msra.mxu1 %v1640_v9 }
  0x36   : > { %1457 = vmatprep.subr.mxu0 %v1774_v63  ;;  %1436 = vmatmul.mubr.f32.gmra.mxu1 %v1813_v42 }
  0x37   : > { %1479 = vmatprep.subr.mxu1 %v1642_v10  ;;  %1458 = vmatpush3.msra.mxu0 %v1774_v63 }
  0x38   : > { %1459 = vmatprep.mubr.f32.mxu0 %v1745_v48  ;;  %1480 = vmatpush3.msra.mxu1 %v1642_v10 }
  0x39   : > { %1460 = vmatmul.mubr.f32.vlgmr.msra.gmra.mxu0 %v1756_v54  ;;  %1481 = vmatprep.subr.mxu1 %v1644_v11 }
  0x3a   : > { %1501 = vmatprep.subr.mxu0 %v1679_v21  ;;  %1438 = vmatprep.mubr.f32.mxu1 %v1815_v44 }
  0x3b   : > { %1482 = vmatpush3.msra.mxu1 %v1644_v11  ;;  %1502 = vmatpush3.msra.mxu0 %v1679_v21 }
  0x3c   : > { %1439 = vmatmul.mubr.f32.gmra.mxu1 %v1821_v52  ;;  %1483 = vmatprep.subr.mxu1 %v1659_v16 }
  0x3d   : > { %1503 = vmatprep.subr.mxu0 %v1682_v22  ;;  %1462 = vmatprep.mubr.f32.mxu0 %v1771_v62 }
  0x3e   : > { %1484 = vmatpush3.msra.mxu1 %v1659_v16  ;;  %1504 = vmatpush3.msra.mxu0 %v1682_v22 }
  0x3f   : > { %1485 = vmatprep.subr.mxu1 %v1669_v18  ;;  %1463 = vmatmul.mubr.f32.gmra.mxu0 %v1786_v12 }
  0x40   : > { %1505 = vmatprep.subr.mxu0 %v1685_v23  ;;  %1486 = vmatpush3.msra.mxu1 %v1669_v18 }
  0x41   : > { %1506 = vmatpush3.msra.mxu0 %v1685_v23  ;;  %1487 = vmatprep.subr.mxu1 %v1739_v46 }
  0x42   : > { %1507 = vmatprep.subr.mxu0 %v1693_v25  ;;  %1465 = vmatprep.mubr.f32.mxu0 %v1807_v40 }
  0x43   : > { %1488 = vmatpush3.msra.mxu1 %v1739_v46  ;;  %1489 = vmatprep.mubr.f32.mxu1 %v316_v58 }
  0x44   : > { %1508 = vmatpush3.msra.mxu0 %v1693_v25  ;;  %1490 = vmatmul.mubr.f32.vlgmr.msra.gmra.mxu1 %v326_v61 }
  0x45   : > { %1466 = vmatmul.mubr.f32.gmra.mxu0 %v1828_v0  ;;  %1509 = vmatprep.subr.mxu0 %v1696_v26 }
  0x46   : > { %1531 = vmatprep.subr.mxu1 %v1625_v3  ;;  %1510 = vmatpush3.msra.mxu0 %v1696_v26 }
  0x47   : > { %1532 = vmatpush3.msra.mxu1 %v1625_v3  ;;  %1511 = vmatprep.subr.mxu0 %v1720_v33 }
  0x48   : > { %1533 = vmatprep.subr.mxu1 %v1627_v4  ;;  %1468 = vmatprep.mubr.f32.mxu0 %v1834_v6 }
  0x49   : > { %1492 = vmatprep.mubr.f32.mxu1 %v336_v28  ;;  %1512 = vmatpush3.msra.mxu0 %v1720_v33 }
  0x4a   : > { %1534 = vmatpush3.msra.mxu1 %v1627_v4  ;;  %1469 = vmatmul.mubr.f32.gmra.mxu0 %v1838_v13 }
  0x4b   : > { %1493 = vmatmul.mubr.f32.gmra.mxu1 %v346_v34  ;;  %1513 = vmatprep.subr.mxu0 %v1750_v50 }
  0x4c   : > { %1535 = vmatprep.subr.mxu1 %v1629_v5  ;;  %1514 = vmatpush3.msra.mxu0 %v1750_v50 }
  0x4d   : > { %1536 = vmatpush3.msra.mxu1 %v1629_v5  ;;  %1515 = vmatprep.subr.mxu0 %v1764_v59 }
  0x4e   : > { %1537 = vmatprep.subr.mxu1 %v1640_v9  ;;  %1495 = vmatprep.mubr.f32.mxu1 %v356_v56 }
  0x4f   : > { %1516 = vmatpush3.msra.mxu0 %v1764_v59  ;;  %1538 = vmatpush3.msra.mxu1 %v1640_v9 }
  0x50   : > { %1517 = vmatprep.subr.mxu0 %v1794_v29  ;;  %1496 = vmatmul.mubr.f32.gmra.mxu1 %v366_v2 }
  0x51   : > { %1539 = vmatprep.subr.mxu1 %v1642_v10  ;;  %1518 = vmatpush3.msra.mxu0 %v1794_v29 }
  0x52   : > { %1519 = vmatprep.mubr.f32.mxu0 %v1735_v43  ;;  %1540 = vmatpush3.msra.mxu1 %v1642_v10 }
  0x53   : > { %1520 = vmatmul.mubr.f32.vlgmr.msra.gmra.mxu0 %v1741_v47  ;;  %1541 = vmatprep.subr.mxu1 %v1644_v11 }
  0x54   : > { %1498 = vmatprep.mubr.f32.mxu1 %v376_v32  ;;  %1542 = vmatpush3.msra.mxu1 %v1644_v11 }
  0x55   : > { %1522 = vmatprep.mubr.f32.mxu0 %v1758_v55  ;;  %1499 = vmatmul.mubr.f32.gmra.mxu1 %v386_v15 }
  0x56   : > { %1543 = vmatprep.subr.mxu1 %v1659_v16  ;;  %1549 = vmatprep.mubr.f32.mxu1 %v1735_v43 }
  0x57   : > { %1544 = vmatpush3.msra.mxu1 %v1659_v16  ;;  %1523 = vmatmul.mubr.f32.gmra.mxu0 %v1766_v60 }
  0x58   : > { %1545 = vmatprep.subr.mxu1 %v1669_v18  ;;  %1525 = vmatprep.mubr.f32.mxu0 %v1796_v30 }
  0x59   : > { %1546 = vmatpush3.msra.mxu1 %v1669_v18 }
  0x5a   : > { %1547 = vmatprep.subr.mxu1 %v1739_v46 }
  0x5b   : > { %1548 = vmatpush3.msra.mxu1 %v1739_v46  ;;  %1526 = vmatmul.mubr.f32.gmra.mxu0 %v1813_v42 }
  0x5c   : > { %1550 = vmatmul.mubr.f32.vlgmr.msra.gmra.mxu1 %v1741_v47  ;;  %1528 = vmatprep.mubr.f32.mxu0 %v1815_v44 }
  0x5d   : > { %1552 = vmatprep.mubr.f32.mxu1 %v1758_v55 }
  0x5f   : > { %1529 = vmatmul.mubr.f32.gmra.mxu0 %v1821_v52 }
  0x60   : > { %1553 = vmatmul.mubr.f32.gmra.mxu1 %v1766_v60 }
  0x61   : > { %1555 = vmatprep.mubr.f32.mxu1 %v1796_v30 }
  0x64   : > { %1556 = vmatmul.mubr.f32.gmra.mxu1 %v1813_v42 }
  0x65   : > { %1558 = vmatprep.mubr.f32.mxu1 %v1815_v44 }
  0x68   : > { %1559 = vmatmul.mubr.f32.gmra.mxu1 %v1821_v52 }
  0xe1   : > { %v1401_v3 = vpop.f32.mrf.mxu0 }
  0xe3   : > { %v320_v4 = vpop.f32.mrf.mxu0 }
  0xe8   : > { %v1404_v5 = vpop.f32.mrf.mxu0 }
  0xea   : > { %v340_v9 = vpop.f32.mrf.mxu0  ;;  %v1431_v10 = vpop.f32.mrf.mxu1 }
  0xeb   : > { %v513_v29 = vadd.f32 %v1431_v10, %v1401_v3 }
  0xec   : > { %v506_v16 = vpop.f32.mrf.mxu1 }
  0xed   : > { %v1407_v11 = vpop.f32.mrf.mxu0  ;;  %v507_v30 = vadd.f32 %v506_v16, %v320_v4 }
  0xef   : > { %v360_v18 = vpop.f32.mrf.mxu0 }
  0xf0   : > { %v1434_v20 = vpop.f32.mrf.mxu1 }
  0xf1   : > { %v525_v45 = vadd.f32 %v1434_v20, %v1404_v5 }
  0xf2   : > { %v518_v22 = vpop.f32.mrf.mxu1 }
  0xf3   : > { %v1410_v21 = vpop.f32.mrf.mxu0  ;;  %v519_v49 = vadd.f32 %v518_v22, %v340_v9 }
  0xf5   : > { %v380_v23 = vpop.f32.mrf.mxu0 }
  0xf6   : > { %v1437_v24 = vpop.f32.mrf.mxu1 }
  0xf7   : > { %v537_v6 = vadd.f32 %v1437_v24, %v1407_v11 }
  0xf8   : > { %v530_v26 = vpop.f32.mrf.mxu1 }
  0xf9   : > { %v1461_v25 = vpop.f32.mrf.mxu0  ;;  %v531_v8 = vadd.f32 %v530_v26, %v360_v18 }
  0xfa   : > { %v646_v40 = vadd.f32 %v1461_v25, %v513_v29 }
  0xfb   : > { %v638_v27 = vpop.f32.mrf.mxu0 }
  0xfc   : > { %v1440_v33 = vpop.f32.mrf.mxu1  ;;  %v639_v41 = vadd.f32 %v638_v27, %v507_v30 }
  0xfd   : > { %v549_v3 = vadd.f32 %v1440_v33, %v1410_v21 }
  0xfe   : > { %v542_v46 = vpop.f32.mrf.mxu1 }
  0xff   : > { %v1464_v38 = vpop.f32.mrf.mxu0  ;;  %v543_v4 = vadd.f32 %v542_v46, %v380_v23 }
 0x100   : > { %v660_v0 = vadd.f32 %v1464_v38, %v525_v45 }
 0x101   : > { %v652_v43 = vpop.f32.mrf.mxu0 }
 0x102   : > { %v653_v57 = vadd.f32 %v652_v43, %v519_v49 }
 0x104   : > { %v1491_v48 = vpop.f32.mrf.mxu1 }
 0x105   : > { %v1467_v47 = vpop.f32.mrf.mxu0  ;;  %v778_v51 = vadd.f32 %v1491_v48, %v646_v40 }
 0x106   : > { %v769_v50 = vpop.f32.mrf.mxu1  ;;  %v674_v35 = vadd.f32 %v1467_v47, %v537_v6 }
 0x107   : > { %v666_v54 = vpop.f32.mrf.mxu0  ;;  %v770_v52 = vadd.f32 %v769_v50, %v639_v41 }
 0x108   : > { %v667_v37 = vadd.f32 %v666_v54, %v531_v8 }
 0x10a   : > { %v1470_v58 = vpop.f32.mrf.mxu0 }
 0x10b   : > { %v1494_v55 = vpop.f32.mrf.mxu1  ;;  %v688_v22 = vadd.f32 %v1470_v58, %v549_v3 }
 0x10c   : > { %v680_v60 = vpop.f32.mrf.mxu0  ;;  %v794_v14 = vadd.f32 %v1494_v55, %v660_v0 }
 0x10d   : > { %v785_v59 = vpop.f32.mrf.mxu1  ;;  %v681_v26 = vadd.f32 %v680_v60, %v543_v4 }
 0x10e   : > { %v786_v7 = vadd.f32 %v785_v59, %v653_v57 }
 0x110   : > { %v1497_v61 = vpop.f32.mrf.mxu1 }
 0x111   : > { %v810_v5 = vadd.f32 %v1497_v61, %v674_v35 }
 0x112   : > { %v801_v62 = vpop.f32.mrf.mxu1 }
 0x113   : > { %v1521_v63 = vpop.f32.mrf.mxu0  ;;  %v802_v11 = vadd.f32 %v801_v62, %v667_v37 }
 0x114   : > { %v930_v1 = vadd.f32 %v1521_v63, %v778_v51 }
 0x115   : > { %v923_v12 = vpop.f32.mrf.mxu0  ;;  %v1500_v28 = vpop.f32.mrf.mxu1 }
 0x116   : > { %v924_v2 = vadd.f32 %v923_v12, %v770_v52  ;;  %v826_v47 = vadd.f32 %v1500_v28, %v688_v22 }
 0x117   : > { %v1524_v34 = vpop.f32.mrf.mxu0  ;;  %v817_v44 = vpop.f32.mrf.mxu1 }
 0x118   : > { %v942_v17 = vadd.f32 %v1524_v34, %v794_v14  ;;  %v818_v33 = vadd.f32 %v817_v44, %v681_v26 }
 0x119   : > { %v935_v42 = vpop.f32.mrf.mxu0 }
 0x11a   : > { %v936_v19 = vadd.f32 %v935_v42, %v786_v7 }
 0x11b   : > { %v1527_v53 = vpop.f32.mrf.mxu0 }
 0x11c   : > { %v1551_v56 = vpop.f32.mrf.mxu1  ;;  %v954_v27 = vadd.f32 %v1527_v53, %v810_v5 }
 0x11d   : > { %v947_v13 = vpop.f32.mrf.mxu0  ;;  %v1052_v32 = vadd.f32 %v1551_v56, %v930_v1 }
 0x11e   : > { %v1045_v31 = vpop.f32.mrf.mxu1  ;;  %v948_v38 = vadd.f32 %v947_v13, %v802_v11 }
 0x11f   : > { %v1046_v15 = vadd.f32 %v1045_v31, %v924_v2  ;;  %v1530_v9 = vpop.f32.mrf.mxu0  ;;  %v1093_v16 = vsel %vm1091_vm1, %v1052_v32, 0.0 }
 0x120   : > { %v1554_v36 = vpop.f32.mrf.mxu1  ;;  %v966_v61 = vadd.f32 %v1530_v9, %v826_v47 }
 0x121   : > { %v1092_v39 = vsel %vm1091_vm1, %v1046_v15, 0.0  ;;  %v1064_v18 = vadd.f32 %v1554_v36, %v942_v17  ;;  %v959_v48 = vpop.f32.mrf.mxu0 }
 0x122   : > { %v1057_v10 = vpop.f32.mrf.mxu1  ;;  %v1094_v24 = vadd.f32 %v1093_v16, %v1092_v39  ;;  %v960_v58 = vadd.f32 %v959_v48, %v818_v33 }
 0x123   : > { %v1058_v20 = vadd.f32 %v1057_v10, %v936_v19  ;;  %v1097_v46 = vsel %vm1091_vm1, %v1064_v18, 0.0 }
 0x124   : > { %v1557_v25 = vpop.f32.mrf.mxu1 }
 0x125   : > { %v1095_v43 = vsel %vm1091_vm1, %v1058_v20, 0.0  ;;  %v1076_v50 = vadd.f32 %v1557_v25, %v954_v27 }
 0x126   : > { %v1096_v21 = vadd.f32 %v1095_v43, %v1094_v24  ;;  %v1069_v23 = vpop.f32.mrf.mxu1 }
 0x127   : > { %v1070_v54 = vadd.f32 %v1069_v23, %v948_v38  ;;  %v1101_v12 = vsel %vm1091_vm1, %v1076_v50, 0.0 }
 0x128   : > { %v1098_v55 = vadd.f32 %v1097_v46, %v1096_v21  ;;  %v1560_v59 = vpop.f32.mrf.mxu1 }
 0x129   : > { %v1099_v62 = vsel %vm1091_vm1, %v1070_v54, 0.0  ;;  %v1088_v29 = vadd.f32 %v1560_v59, %v966_v61 }
 0x12a   : > { %v1100_v60 = vadd.f32 %v1099_v62, %v1098_v55  ;;  %v1081_v63 = vpop.f32.mrf.mxu1 }
 0x12b   : > { %v1082_v28 = vadd.f32 %v1081_v63, %v960_v58  ;;  %v1105_v41 = vsel %vm1091_vm1, %v1088_v29, 0.0 }
 0x12c   : > { %v1102_v30 = vadd.f32 %v1101_v12, %v1100_v60  ;;  %v1274_v12 = vld [vmem:[%s2012_s3] ss:$0 sm:$0xff] }
 0x12d   : > { %v1103_v34 = vsel %vm1091_vm1, %v1082_v28, 0.0 }
 0x12e   : > { %v1104_v40 = vadd.f32 %v1103_v34, %v1102_v30 }
 0x130   : > { %v1106_v42 = vadd.f32 %v1105_v41, %v1104_v40 }
 0x132   : > { %v1107_v44 = vrot.slane %v1106_v42, 4 }
 0x134   : > { %v1108_v45 = vadd.f32 %v1107_v44, %v1106_v42 }
 0x136   : > { %v1109_v49 = vrot.slane %v1108_v45, 2 }
 0x138   : > { %v1110_v51 = vadd.f32 %v1109_v49, %v1108_v45 }
 0x13a   : > { %v1111_v52 = vrot.slane %v1110_v51, 1 }
 0x13c   : > { %v1112_v53 = vadd.f32 %v1111_v52, %v1110_v51 }
 0x13e   : > { %v1114_v56 = vmul.f32 0.015625, %v1112_v53 }
 0x140   : > { %v1115_v0 = vsub.f32 %v1046_v15, %v1114_v56  ;;  %v1116_v57 = vsub.f32 %v1052_v32, %v1114_v56  ;;  %v1117_v1 = vsub.f32 %v1058_v20, %v1114_v56  ;;  %v1118_v2 = vsub.f32 %v1064_v18, %v1114_v56 }
 0x141   : > { %v1119_v6 = vsub.f32 %v1070_v54, %v1114_v56  ;;  %v1120_v14 = vsub.f32 %v1076_v50, %v1114_v56  ;;  %v1121_v17 = vsub.f32 %v1082_v28, %v1114_v56  ;;  %v1122_v15 = vsub.f32 %v1088_v29, %v1114_v56  ;;  %v1273_v50 = vld [vmem:[%s2011_s2] ss:$0 sm:$0xff] }
 0x142   : > { %v1123_v8 = vmul.f32 %v1115_v0, %v1115_v0  ;;  %v1124_v13 = vmul.f32 %v1116_v57, %v1116_v57  ;;  %v1125_v31 = vmul.f32 %v1117_v1, %v1117_v1  ;;  %v1126_v7 = vmul.f32 %v1118_v2, %v1118_v2 }
 0x143   : > { %v1127_v19 = vmul.f32 %v1119_v6, %v1119_v6  ;;  %v1128_v32 = vmul.f32 %v1120_v14, %v1120_v14  ;;  %v1129_v9 = vmul.f32 %v1121_v17, %v1121_v17  ;;  %v1130_v16 = vmul.f32 %v1122_v15, %v1122_v15 }
 0x144   : > { %v1131_v35 = vsel %vm1091_vm1, %v1123_v8, 0.0  ;;  %v1132_v36 = vsel %vm1091_vm1, %v1124_v13, 0.0  ;;  %v1134_v39 = vsel %vm1091_vm1, %v1125_v31, 0.0  ;;  %v1136_v4 = vsel %vm1091_vm1, %v1126_v7, 0.0 }
 0x145   : > { %v1133_v37 = vadd.f32 %v1132_v36, %v1131_v35  ;;  %v1138_v10 = vsel %vm1091_vm1, %v1127_v19, 0.0  ;;  %v1140_v18 = vsel %vm1091_vm1, %v1128_v32, 0.0  ;;  %v1142_v22 = vsel %vm1091_vm1, %v1129_v9, 0.0 }
 0x146   : > { %v1144_v25 = vsel %vm1091_vm1, %v1130_v16, 0.0 }
 0x147   : > { %v1135_v3 = vadd.f32 %v1134_v39, %v1133_v37 }
 0x149   : > { %v1137_v5 = vadd.f32 %v1136_v4, %v1135_v3 }
 0x14b   : > { %v1139_v11 = vadd.f32 %v1138_v10, %v1137_v5 }
 0x14d   : > { %v1141_v20 = vadd.f32 %v1140_v18, %v1139_v11 }
 0x14f   : > { %v1143_v24 = vadd.f32 %v1142_v22, %v1141_v20 }
 0x151   : > { %v1145_v26 = vadd.f32 %v1144_v25, %v1143_v24 }
 0x153   : > { %v1146_v27 = vrot.slane %v1145_v26, 4 }
 0x155   : > { %v1147_v38 = vadd.f32 %v1146_v27, %v1145_v26 }
 0x157   : > { %v1148_v43 = vrot.slane %v1147_v38, 2 }
 0x159   : > { %v1149_v47 = vadd.f32 %v1148_v43, %v1147_v38 }
 0x15b   : > { %v1150_v48 = vrot.slane %v1149_v47, 1 }
 0x15d   : > { %v1151_v21 = vadd.f32 %v1150_v48, %v1149_v47 }
 0x15f   : > { %v1152_v23 = vmul.f32 0.015625, %v1151_v21 }
 0x161   : > { %v1153_v33 = vadd.f32 1e-05, %v1152_v23 }
 0x163   : > { %1569 = vrsqrt.f32 %v1153_v33 }
 0x170   : > { %v1570_v46 = vpop.eup %1569 }
 0x171   : > { %v1155_v54 = vmul.f32 %v1570_v46, %v1115_v0  ;;  %v1156_v55 = vmul.f32 %v1570_v46, %v1116_v57  ;;  %v1157_v59 = vmul.f32 %v1570_v46, %v1117_v1  ;;  %v1158_v61 = vmul.f32 %v1570_v46, %v1118_v2 }
 0x172   : > { %v1159_v58 = vmul.f32 %v1570_v46, %v1119_v6  ;;  %v1160_v62 = vmul.f32 %v1570_v46, %v1120_v14  ;;  %v1161_v60 = vmul.f32 %v1570_v46, %v1121_v17  ;;  %v1162_v63 = vmul.f32 %v1570_v46, %v1122_v15 }
 0x173   : > { %v1170_v29 = vmul.f32 %v1273_v50, %v1155_v54  ;;  %v1171_v28 = vmul.f32 %v1273_v50, %v1156_v55  ;;  %v1172_v30 = vmul.f32 %v1273_v50, %v1157_v59  ;;  %v1173_v34 = vmul.f32 %v1273_v50, %v1158_v61 }
 0x174   : > { %v1174_v40 = vmul.f32 %v1273_v50, %v1159_v58  ;;  %v1175_v41 = vmul.f32 %v1273_v50, %v1160_v62  ;;  %v1176_v42 = vmul.f32 %v1273_v50, %v1161_v60  ;;  %v1177_v44 = vmul.f32 %v1273_v50, %v1162_v63 }
 0x175   : > { %v1185_v45 = vadd.f32 %v1274_v12, %v1170_v29  ;;  %v1186_v49 = vadd.f32 %v1274_v12, %v1171_v28  ;;  %v1187_v51 = vadd.f32 %v1274_v12, %v1172_v30  ;;  %v1188_v52 = vadd.f32 %v1274_v12, %v1173_v34 }
 0x176   : > { %v1189_v53 = vadd.f32 %v1274_v12, %v1174_v40  ;;  %v1190_v56 = vadd.f32 %v1274_v12, %v1175_v41  ;;  %v1191_v0 = vadd.f32 %v1274_v12, %v1176_v42  ;;  %v1192_v57 = vadd.f32 %v1274_v12, %v1177_v44 }
 0x177   : > { %v1193_v1 = vmax.f32 %v1185_v45, 0.0  ;;  %v1194_v2 = vmax.f32 %v1186_v49, 0.0  ;;  %v1195_v6 = vmax.f32 %v1187_v51, 0.0  ;;  %v1196_v8 = vmax.f32 %v1188_v52, 0.0 }
 0x178   : > { %v1197_v13 = vmax.f32 %v1189_v53, 0.0  ;;  %v1198_v31 = vmax.f32 %v1190_v56, 0.0  ;;  %v1199_v14 = vmax.f32 %v1191_v0, 0.0  ;;  %v1200_v7 = vmax.f32 %v1192_v57, 0.0 }
 0x179   : > { %1201 = vst.msk [vmem:[%s197_s22] sm:$0xff] %vm1091_vm1, %v1193_v1  ;;  %1202 = vst.msk [vmem:[%s197_s22 + $0x8] sm:$0xff] %vm1091_vm1, %v1194_v2 }
 0x17a   : > { %1203 = vst.msk [vmem:[%s197_s22 + $0x10] sm:$0xff] %vm1091_vm1, %v1195_v6  ;;  %1204 = vst.msk [vmem:[%s197_s22 + $0x18] sm:$0xff] %vm1091_vm1, %v1196_v8 }
 0x17b   : > { %1205 = vst.msk [vmem:[%s197_s22 + $0x20] sm:$0xff] %vm1091_vm1, %v1197_v13  ;;  %1206 = vst.msk [vmem:[%s197_s22 + $0x28] sm:$0xff] %vm1091_vm1, %v1198_v31 }
 0x17c   : > { %1207 = vst.msk [vmem:[%s197_s22 + $0x30] sm:$0xff] %vm1091_vm1, %v1199_v14  ;;  %1208 = vst.msk [vmem:[%s197_s22 + $0x38] sm:$0xff] %vm1091_vm1, %v1200_v7 }
 0x17d PF: > { %s14_s15 = sadd.s32 1, %s1577_s15  }
 0x17e   : > { %p11_p4 = scmp.ge.s32.totalorder %s14_s15, 4  }
 0x180   :  { %13 = sbr.rel (!%p11_p4) target bundleno = 1 (0x1), region = 66 }

</bundles_post_ra>
